<compile_context>
chip_gen: v6e
topology: v6e:2x2x1
jax: 0.10.0
libtpu: 0.0.40
codegen_flags: <defaults>
</compile_context>

<pallas_src>
import functools

import jax
import jax.numpy as jnp
from jax.experimental import pallas as pl
from jax.experimental.pallas import tpu as pltpu


def autopad(k, p=None, d=1):
    """Pad to 'same' shape outputs (mirrors the PyTorch helper)."""
    if d > 1:
        k = d * (k - 1) + 1 if isinstance(k, int) else [d * (x - 1) + 1 for x in k]
    if p is None:
        p = k // 2 if isinstance(k, int) else [x // 2 for x in k]
    return p


def _round_up(x, m):
    return -(-x // m) * m


def _pick_row_tile(ho, wo_pad, max_rows=1024):
    """Row tile so that tile_ho * wo_pad <= max_rows; prefer divisors of ho."""
    t_max = max(1, min(ho, max_rows // max(wo_pad, 1)))
    for t in range(t_max, max(1, (3 * t_max) // 4) - 1, -1):
        if ho % t == 0:
            return t
    return t_max  # non-divisor: wrapper pads Ho up to a multiple of the tile


def _conv_bn_silu_kernel(x_ref, w_ref, scale_ref, bias_ref, o_ref, scratch_ref,
                         *, ksize, stride, tile_ho, cin, fold):
    # x_ref     : (Hp, Wp, Cin)          padded input for this image (N squeezed)
    # w_ref     : (KH*KW*Cin, tCo)       taps folded into the contraction dim
    # scale_ref : (1, tCo) f32           folded BatchNorm scale
    # bias_ref  : (1, tCo) f32           folded BatchNorm bias
    # o_ref     : (tile_ho*Wo_pad, tCo)  lane-dense output slab
    # scratch   : fold  -> (m, KH*KW*Cin) im2col slab (compute dtype)
    #             !fold -> (m, tCo) f32 accumulator (fallback path)
    m, _ = o_ref.shape
    wo = m // tile_ho
    kf = ksize * ksize * cin

    row0 = pl.program_id(1) * (tile_ho * stride)
    if (tile_ho * stride) % 8 == 0:
        row0 = pl.multiple_of(row0, 8)

    def tap_slice(kh, kw):
        if stride == 1:
            return x_ref[pl.ds(row0 + kh, tile_ho), pl.ds(kw, wo), :]
        # TODO(synk): for stride>1, decimate W once per tile instead of per-tap
        # strided sublane reads (extra VPU/XLU filler in downsampling layers).
        return x_ref[pl.ds(row0 + kh, tile_ho, stride=stride),
                     pl.ds(kw, wo, stride=stride), :]

    if fold:
        # Build the im2col slab once per row tile (Cout axis is innermost and
        # "arbitrary", so the scratch is valid for every Cout tile).
        @pl.when(pl.program_id(2) == 0)
        def _build_patch():
            parts = [tap_slice(kh, kw)
                     for kh in range(ksize) for kw in range(ksize)]
            patch = parts[0] if len(parts) == 1 else jnp.concatenate(parts, axis=-1)
            scratch_ref[...] = patch.reshape(m, kf)

        # One MXU matmul with K = KH*KW*Cin, f32 accumulation on the MXU.
        y = jnp.dot(scratch_ref[...], w_ref[...],
                    preferred_element_type=jnp.float32)
    else:
        # Fallback: per-tap matmuls accumulated in a VMEM f32 scratch.
        scratch_ref[...] = jnp.zeros_like(scratch_ref)
        for kh in range(ksize):
            for kw in range(ksize):
                t = kh * ksize + kw
                scratch_ref[...] += jnp.dot(
                    tap_slice(kh, kw).reshape(m, cin),
                    w_ref[pl.ds(t * cin, cin), :],
                    preferred_element_type=jnp.float32)
        y = scratch_ref[...]

    # Folded BatchNorm (inference) per-channel affine + SiLU, in f32.
    y = y * scale_ref[...] + bias_ref[...]
    y = y * jax.nn.sigmoid(y)
    o_ref[...] = y.astype(o_ref.dtype)


def conv_bn_silu(x_nchw, weight_oihw, gamma, beta, running_mean, running_var,
                 *, k=1, s=1, p=None, d=1, g=1, eps=1e-5,
                 compute_dtype=jnp.bfloat16, max_tile_rows=1024):
    """Equivalent of Conv.forward(x): SiLU(BN(Conv2d(x))) for NCHW input."""
    assert g == 1, "groups > 1 not implemented"    # TODO(synk): grouped conv
    assert d == 1, "dilation > 1 not implemented"  # TODO(synk): dilated conv
    assert isinstance(k, int) and isinstance(s, int)  # TODO(synk): tuple k/s
    pad = autopad(k, p, d)

    N, C1, H, W = x_nchw.shape
    C2 = weight_oihw.shape[0]
    Ho = (H + 2 * pad - k) // s + 1
    Wo = (W + 2 * pad - k) // s + 1

    out_dtype = x_nchw.dtype
    cdt = jnp.dtype(compute_dtype if compute_dtype is not None else out_dtype)
    c_isize = cdt.itemsize
    o_isize = jnp.dtype(out_dtype).itemsize

    LANES = 128
    C2p = _round_up(C2, LANES)
    tCo = min(C2p, 256)            # matches the 256-wide MXU output on v6e/v7x
    n_co = C2p // tCo

    # Spatial padding so reshapes are layout-preserving and tiles divide evenly.
    Wo_pad = _round_up(Wo, 8)
    tile_ho = _pick_row_tile(Ho, Wo_pad, max_tile_rows)
    Ho_pad = _round_up(Ho, tile_ho)
    n_row = Ho_pad // tile_ho
    m = tile_ho * Wo_pad

    Hp_need = (Ho_pad - 1) * s + k
    Wp_need = (Wo_pad - 1) * s + k
    pad_b = max(pad, Hp_need - pad - H)
    pad_r = max(pad, Wp_need - pad - W)

    # NCHW -> NHWC, spatial zero-pad, cast to matmul dtype (glue, plain JAX).
    # TODO(synk): keep activations NHWC (and lane-padded) end-to-end across the
    # network so these per-layer transposes / pads / slices (full HBM passes
    # that can rival the conv itself on mem-bound layers) disappear.
    x_nhwc = jnp.transpose(x_nchw, (0, 2, 3, 1))
    x_pad = jnp.pad(x_nhwc, ((0, 0), (pad, pad_b), (pad, pad_r), (0, 0))).astype(cdt)
    Hp, Wp = x_pad.shape[1], x_pad.shape[2]

    # Weights (Cout, Cin, KH, KW) -> (KH, KW, Cin, Coutp) -> (KH*KW*Cin, Coutp):
    # taps folded into the contraction dim; Cout padded to 128 lanes.
    kf = k * k * C1
    w_hwio = jnp.transpose(weight_oihw, (2, 3, 1, 0))
    if C2p != C2:
        w_hwio = jnp.pad(w_hwio, ((0, 0), (0, 0), (0, 0), (0, C2p - C2)))
    w_fold = w_hwio.reshape(kf, C2p).astype(cdt)

    # Fold inference BatchNorm into per-channel scale / bias (kept in f32).
    inv_std = 1.0 / jnp.sqrt(running_var.astype(jnp.float32) + eps)
    scale = gamma.astype(jnp.float32) * inv_std
    bias = beta.astype(jnp.float32) - running_mean.astype(jnp.float32) * scale
    scale = jnp.pad(scale, (0, C2p - C2)).reshape(1, C2p)
    bias = jnp.pad(bias, (0, C2p - C2)).reshape(1, C2p)

    # Consistent (padded) cost estimate for the XLA scheduler.
    flops = 2 * N * Ho_pad * Wo_pad * kf * C2p
    bytes_accessed = int(x_pad.size * c_isize + w_fold.size * c_isize
                         + (scale.size + bias.size) * 4
                         + N * Ho_pad * Wo_pad * C2p * o_isize)
    cost = pl.CostEstimate(flops=int(flops),
                           transcendentals=int(N * Ho_pad * Wo_pad * C2p),
                           bytes_accessed=bytes_accessed)

    # Generation-aware VMEM limit (v7x: 64 MiB/TC, v5e/v6e: 128 MiB).
    try:
        vmem_cap = int(pltpu.get_tpu_info().vmem_capacity_bytes)
    except Exception:
        vmem_cap = 64 * 1024 * 1024

    def _vmem_estimate(fold):
        scratch = m * (kf * c_isize if fold else tCo * 4)
        return (2 * Hp * Wp * C1 * c_isize      # per-image input block
                + 2 * kf * tCo * c_isize        # weight tile (double-buffered)
                + 2 * 2 * tCo * 4               # scale / bias
                + 2 * m * tCo * o_isize         # output tiles (double-buffered)
                + m * tCo * 4                   # f32 matmul result / epilogue
                + scratch)

    def _run(fold):
        kernel = functools.partial(_conv_bn_silu_kernel, ksize=k, stride=s,
                                   tile_ho=tile_ho, cin=C1, fold=fold)
        scratch = (pltpu.VMEM((m, kf), cdt) if fold
                   else pltpu.VMEM((m, tCo), jnp.float32))
        vmem_limit = int(min(vmem_cap * 0.85,
                             max(32 * 1024 * 1024, 1.5 * _vmem_estimate(fold))))
        return pl.pallas_call(
            kernel,
            out_shape=jax.ShapeDtypeStruct((N, Ho_pad * Wo_pad, C2p), out_dtype),
            grid=(N, n_row, n_co),
            in_specs=[
                # Padded input: per-image block; index_map constant along the
                # row/Cout axes so it stays VMEM-resident across those steps.
                # TODO(synk): halo-aware row tiling of the input (overlapping
                # blocks / manual double-buffered DMA) for feature maps too big
                # for a per-image VMEM block (early high-res layers on v7x).
                pl.BlockSpec((None, Hp, Wp, C1), lambda n, r, c: (n, 0, 0, 0)),
                # TODO(synk): pipeline_mode=pl.Buffered(1) on constant-index
                # weight/scale/bias blocks once single-buffer mode is verified.
                pl.BlockSpec((kf, tCo), lambda n, r, c: (0, c)),
                pl.BlockSpec((1, tCo), lambda n, r, c: (0, c)),
                pl.BlockSpec((1, tCo), lambda n, r, c: (0, c)),
            ],
            out_specs=pl.BlockSpec((None, m, tCo), lambda n, r, c: (n, r, c)),
            scratch_shapes=[scratch],
            compiler_params=pltpu.CompilerParams(
                dimension_semantics=("parallel", "parallel", "arbitrary"),
                vmem_limit_bytes=vmem_limit),
            cost_estimate=cost,
        )(x_pad, w_fold, scale, bias)

    try:
        out2d = _run(fold=True)
        jax.block_until_ready(out2d)
    except Exception:
        # Conservative fallback (per-tap matmuls + VMEM f32 accumulator) if the
        # folded im2col path fails to lower on this jax/jaxlib version.
        out2d = _run(fold=False)

    # Lane/spatial-padded slab -> NHWC -> NCHW (matches PyTorch convention).
    out_nhwc = out2d.reshape(N, Ho_pad, Wo_pad, C2p)[:, :Ho, :Wo, :C2]
    return jnp.transpose(out_nhwc, (0, 3, 1, 2)).astype(out_dtype)


def _reference(x, w, gamma, beta, mean, var, k, s, eps=1e-5):
    pad = autopad(k)
    y = jax.lax.conv_general_dilated(
        x.astype(jnp.float32), w.astype(jnp.float32), window_strides=(s, s),
        padding=[(pad, pad), (pad, pad)],
        dimension_numbers=("NCHW", "OIHW", "NCHW"))
    y = (y - mean[None, :, None, None]) / jnp.sqrt(var[None, :, None, None] + eps) \
        * gamma[None, :, None, None] + beta[None, :, None, None]
    return y * jax.nn.sigmoid(y)


if __name__ == "__main__":
    key = jax.random.PRNGKey(0)

    # (c1, c2, k, s, H, W, compute_dtype, atol)
    cases = [
        (4, 8, 3, 1, 16, 16, jnp.float32, 1e-3),   # f32 baseline
        (4, 8, 3, 1, 16, 16, jnp.bfloat16, 5e-2),  # bf16 matmul path
        (4, 8, 3, 2, 15, 15, jnp.float32, 1e-3),   # stride-2, odd input size
        (8, 16, 1, 1, 13, 13, jnp.float32, 1e-3),  # 1x1 conv, Wo not /8 (padded)
    ]
    for idx, (c1, c2, kk, ss, H, W, cdt, tol) in enumerate(cases):
        key, kx, kw, kg, kb, km, kv = jax.random.split(key, 7)
        x = jax.random.normal(kx, (2, c1, H, W), dtype=jnp.float32)
        conv_weight = jax.random.normal(kw, (c2, c1, kk, kk), dtype=jnp.float32) * 0.1
        bn_gamma = 1.0 + 0.1 * jax.random.normal(kg, (c2,), dtype=jnp.float32)
        bn_beta = 0.1 * jax.random.normal(kb, (c2,), dtype=jnp.float32)
        bn_mean = 0.1 * jax.random.normal(km, (c2,), dtype=jnp.float32)
        bn_var = jnp.abs(1.0 + 0.1 * jax.random.normal(kv, (c2,), dtype=jnp.float32))

        out = conv_bn_silu(x, conv_weight, bn_gamma, bn_beta, bn_mean, bn_var,
                           k=kk, s=ss, compute_dtype=cdt)
        jax.block_until_ready(out)

        ref = _reference(x, conv_weight, bn_gamma, bn_beta, bn_mean, bn_var, kk, ss)
        assert out.shape == ref.shape, (idx, out.shape, ref.shape)
        err = float(jnp.max(jnp.abs(out.astype(jnp.float32) - ref)))
        assert err <= tol, (idx, err)

    print("KERNEL_OK")
</pallas_src>

<mosaic_0001>
module attributes {stable_mosaic.version = 11 : i64} {
  func.func @_conv_bn_silu_kernel(%arg0: i32, %arg1: i32, %arg2: i32, %arg3: memref<1x18x18x4xf32, #tpu.memory_space<vmem>>, %arg4: memref<36x128xf32, #tpu.memory_space<vmem>>, %arg5: memref<1x128xf32, #tpu.memory_space<vmem>>, %arg6: memref<1x128xf32, #tpu.memory_space<vmem>>, %arg7: memref<1x256x128xf32, #tpu.memory_space<vmem>>, %arg8: memref<256x36xf32, #tpu.memory_space<vmem>>) attributes {dimension_semantics = [#tpu.dimension_semantics<parallel>, #tpu.dimension_semantics<parallel>, #tpu.dimension_semantics<arbitrary>], iteration_bounds = array<i64: 2, 1, 1>, scalar_prefetch = 0 : i64, scratch_operands = 1 : i64, tpu.core_type = #tpu.core_type<tc>, window_params = [{transform_indices = @transform_0, window_bounds = array<i64: 1, 18, 18, 4>}, {transform_indices = @transform_1, window_bounds = array<i64: 36, 128>}, {transform_indices = @transform_2, window_bounds = array<i64: 1, 128>}, {transform_indices = @transform_3, window_bounds = array<i64: 1, 128>}, {transform_indices = @transform_4, window_bounds = array<i64: 1, 256, 128>}]} {
    %c16_i32 = arith.constant 16 : i32
    %0 = arith.muli %arg1, %c16_i32 : i32
    %1 = tpu.assume_multiple %0, 8 : i32
    %c0_i32 = arith.constant 0 : i32
    %2 = arith.cmpi eq, %arg2, %c0_i32 : i32
    %3 = arith.extui %2 : i1 to i32
    %c0_i32_0 = arith.constant 0 : i32
    %4 = arith.cmpi ne, %3, %c0_i32_0 : i32
    scf.if %4 {
      %c0_i32_12 = arith.constant 0 : i32
      %23 = arith.addi %1, %c0_i32_12 : i32
      %c0_13 = arith.constant 0 : index
      %24 = arith.index_cast %23 : i32 to index
      %c0_14 = arith.constant 0 : index
      %c0_15 = arith.constant 0 : index
      %25 = vector.load %arg3[%c0_13, %24, %c0_14, %c0_15] : memref<1x18x18x4xf32, #tpu.memory_space<vmem>>, vector<1x16x16x4xf32>
      %26 = vector.shape_cast %25 : vector<1x16x16x4xf32> to vector<16x16x4xf32>
      %c0_i32_16 = arith.constant 0 : i32
      %27 = arith.addi %1, %c0_i32_16 : i32
      %c0_17 = arith.constant 0 : index
      %28 = arith.index_cast %27 : i32 to index
      %c1 = arith.constant 1 : index
      %c0_18 = arith.constant 0 : index
      %29 = vector.load %arg3[%c0_17, %28, %c1, %c0_18] : memref<1x18x18x4xf32, #tpu.memory_space<vmem>>, vector<1x16x16x4xf32>
      %30 = vector.shape_cast %29 : vector<1x16x16x4xf32> to vector<16x16x4xf32>
      %c0_i32_19 = arith.constant 0 : i32
      %31 = arith.addi %1, %c0_i32_19 : i32
      %c0_20 = arith.constant 0 : index
      %32 = arith.index_cast %31 : i32 to index
      %c2 = arith.constant 2 : index
      %c0_21 = arith.constant 0 : index
      %33 = vector.load %arg3[%c0_20, %32, %c2, %c0_21] : memref<1x18x18x4xf32, #tpu.memory_space<vmem>>, vector<1x16x16x4xf32>
      %34 = vector.shape_cast %33 : vector<1x16x16x4xf32> to vector<16x16x4xf32>
      %c1_i32 = arith.constant 1 : i32
      %35 = arith.addi %1, %c1_i32 : i32
      %c0_22 = arith.constant 0 : index
      %36 = arith.index_cast %35 : i32 to index
      %c0_23 = arith.constant 0 : index
      %c0_24 = arith.constant 0 : index
      %37 = vector.load %arg3[%c0_22, %36, %c0_23, %c0_24] : memref<1x18x18x4xf32, #tpu.memory_space<vmem>>, vector<1x16x16x4xf32>
      %38 = vector.shape_cast %37 : vector<1x16x16x4xf32> to vector<16x16x4xf32>
      %c1_i32_25 = arith.constant 1 : i32
      %39 = arith.addi %1, %c1_i32_25 : i32
      %c0_26 = arith.constant 0 : index
      %40 = arith.index_cast %39 : i32 to index
      %c1_27 = arith.constant 1 : index
      %c0_28 = arith.constant 0 : index
      %41 = vector.load %arg3[%c0_26, %40, %c1_27, %c0_28] : memref<1x18x18x4xf32, #tpu.memory_space<vmem>>, vector<1x16x16x4xf32>
      %42 = vector.shape_cast %41 : vector<1x16x16x4xf32> to vector<16x16x4xf32>
      %c1_i32_29 = arith.constant 1 : i32
      %43 = arith.addi %1, %c1_i32_29 : i32
      %c0_30 = arith.constant 0 : index
      %44 = arith.index_cast %43 : i32 to index
      %c2_31 = arith.constant 2 : index
      %c0_32 = arith.constant 0 : index
      %45 = vector.load %arg3[%c0_30, %44, %c2_31, %c0_32] : memref<1x18x18x4xf32, #tpu.memory_space<vmem>>, vector<1x16x16x4xf32>
      %46 = vector.shape_cast %45 : vector<1x16x16x4xf32> to vector<16x16x4xf32>
      %c2_i32 = arith.constant 2 : i32
      %47 = arith.addi %1, %c2_i32 : i32
      %c0_33 = arith.constant 0 : index
      %48 = arith.index_cast %47 : i32 to index
      %c0_34 = arith.constant 0 : index
      %c0_35 = arith.constant 0 : index
      %49 = vector.load %arg3[%c0_33, %48, %c0_34, %c0_35] : memref<1x18x18x4xf32, #tpu.memory_space<vmem>>, vector<1x16x16x4xf32>
      %50 = vector.shape_cast %49 : vector<1x16x16x4xf32> to vector<16x16x4xf32>
      %c2_i32_36 = arith.constant 2 : i32
      %51 = arith.addi %1, %c2_i32_36 : i32
      %c0_37 = arith.constant 0 : index
      %52 = arith.index_cast %51 : i32 to index
      %c1_38 = arith.constant 1 : index
      %c0_39 = arith.constant 0 : index
      %53 = vector.load %arg3[%c0_37, %52, %c1_38, %c0_39] : memref<1x18x18x4xf32, #tpu.memory_space<vmem>>, vector<1x16x16x4xf32>
      %54 = vector.shape_cast %53 : vector<1x16x16x4xf32> to vector<16x16x4xf32>
      %c2_i32_40 = arith.constant 2 : i32
      %55 = arith.addi %1, %c2_i32_40 : i32
      %c0_41 = arith.constant 0 : index
      %56 = arith.index_cast %55 : i32 to index
      %c2_42 = arith.constant 2 : index
      %c0_43 = arith.constant 0 : index
      %57 = vector.load %arg3[%c0_41, %56, %c2_42, %c0_43] : memref<1x18x18x4xf32, #tpu.memory_space<vmem>>, vector<1x16x16x4xf32>
      %58 = vector.shape_cast %57 : vector<1x16x16x4xf32> to vector<16x16x4xf32>
      %59 = tpu.concatenate %26, %30, %34, %38, %42, %46, %50, %54, %58 in 2 : vector<16x16x4xf32>, vector<16x16x4xf32>, vector<16x16x4xf32>, vector<16x16x4xf32>, vector<16x16x4xf32>, vector<16x16x4xf32>, vector<16x16x4xf32>, vector<16x16x4xf32>, vector<16x16x4xf32> -> vector<16x16x36xf32>
      %60 = vector.shape_cast %59 : vector<16x16x36xf32> to vector<256x36xf32>
      %c0_44 = arith.constant 0 : index
      %c0_45 = arith.constant 0 : index
      %61 = vector.load %arg8[%c0_44, %c0_45] : memref<256x36xf32, #tpu.memory_space<vmem>>, vector<256x36xf32>
      tpu.vector_store %arg8[%c0_44, %c0_45], %60 {strides = array<i32>} : memref<256x36xf32, #tpu.memory_space<vmem>>, vector<256x36xf32>,
    } else {
    }
    %c0 = arith.constant 0 : index
    %c0_1 = arith.constant 0 : index
    %5 = vector.load %arg8[%c0, %c0_1] : memref<256x36xf32, #tpu.memory_space<vmem>>, vector<256x36xf32>
    %c0_2 = arith.constant 0 : index
    %c0_3 = arith.constant 0 : index
    %6 = vector.load %arg4[%c0_2, %c0_3] : memref<36x128xf32, #tpu.memory_space<vmem>>, vector<36x128xf32>
    %cst = arith.constant dense<0.000000e+00> : vector<256x128xf32>
    %7 = tpu.matmul %5, %6, %cst {dimension_numbers = #tpu.dot_dimension_numbers<[1], [0], [0], [1], [0, 0, 1, 1], [], []>} : vector<256x36xf32>, vector<36x128xf32>, vector<256x128xf32> -> vector<256x128xf32>
    %c0_4 = arith.constant 0 : index
    %c0_5 = arith.constant 0 : index
    %8 = vector.load %arg5[%c0_4, %c0_5] : memref<1x128xf32, #tpu.memory_space<vmem>>, vector<1x128xf32>
    %9 = vector.broadcast %8 : vector<1x128xf32> to vector<256x128xf32>
    %10 = arith.mulf %7, %9 : vector<256x128xf32>
    %c0_6 = arith.constant 0 : index
    %c0_7 = arith.constant 0 : index
    %11 = vector.load %arg6[%c0_6, %c0_7] : memref<1x128xf32, #tpu.memory_space<vmem>>, vector<1x128xf32>
    %12 = vector.broadcast %11 : vector<1x128xf32> to vector<256x128xf32>
    %13 = arith.addf %10, %12 : vector<256x128xf32>
    %14 = arith.negf %13 : vector<256x128xf32>
    %15 = math.exp %14 : vector<256x128xf32>
    %cst_8 = arith.constant 1.000000e+00 : f32
    %16 = vector.broadcast %cst_8 : f32 to vector<256x128xf32>
    %17 = arith.addf %16, %15 : vector<256x128xf32>
    %18 = arith.divf %16, %17 : vector<256x128xf32>
    %19 = arith.mulf %13, %18 : vector<256x128xf32>
    %c0_9 = arith.constant 0 : index
    %c0_10 = arith.constant 0 : index
    %c0_11 = arith.constant 0 : index
    %20 = vector.load %arg7[%c0_9, %c0_10, %c0_11] : memref<1x256x128xf32, #tpu.memory_space<vmem>>, vector<1x256x128xf32>
    %21 = vector.shape_cast %20 : vector<1x256x128xf32> to vector<256x128xf32>
    %22 = vector.shape_cast %19 : vector<256x128xf32> to vector<1x256x128xf32>
    tpu.vector_store %arg7[%c0_9, %c0_10, %c0_11], %22 {strides = array<i32>} : memref<1x256x128xf32, #tpu.memory_space<vmem>>, vector<1x256x128xf32>,
    return
  }
  func.func @transform_0(%arg0: i32, %arg1: i32, %arg2: i32) -> (i32, i32, i32, i32) {
    %c0_i32 = arith.constant 0 : i32
    %c0_i32_0 = arith.constant 0 : i32
    %c0_i32_1 = arith.constant 0 : i32
    %c0_i32_2 = arith.constant 0 : i32
    return %arg0, %c0_i32, %c0_i32_0, %c0_i32_1 : i32, i32, i32, i32
  }
  func.func @transform_1(%arg0: i32, %arg1: i32, %arg2: i32) -> (i32, i32) {
    %c0_i32 = arith.constant 0 : i32
    %c0_i32_0 = arith.constant 0 : i32
    return %c0_i32, %arg2 : i32, i32
  }
  func.func @transform_2(%arg0: i32, %arg1: i32, %arg2: i32) -> (i32, i32) {
    %c0_i32 = arith.constant 0 : i32
    %c0_i32_0 = arith.constant 0 : i32
    return %c0_i32, %arg2 : i32, i32
  }
  func.func @transform_3(%arg0: i32, %arg1: i32, %arg2: i32) -> (i32, i32) {
    %c0_i32 = arith.constant 0 : i32
    %c0_i32_0 = arith.constant 0 : i32
    return %c0_i32, %arg2 : i32, i32
  }
  func.func @transform_4(%arg0: i32, %arg1: i32, %arg2: i32) -> (i32, i32, i32) {
    %c0_i32 = arith.constant 0 : i32
    return %arg0, %arg1, %arg2 : i32, i32, i32
  }
}

module attributes {stable_mosaic.version = 11 : i64} {
  func.func @_conv_bn_silu_kernel(%arg0: i32, %arg1: i32, %arg2: i32, %arg3: memref<1x18x18x4xf32, #tpu.memory_space<vmem>>, %arg4: memref<36x128xf32, #tpu.memory_space<vmem>>, %arg5: memref<1x128xf32, #tpu.memory_space<vmem>>, %arg6: memref<1x128xf32, #tpu.memory_space<vmem>>, %arg7: memref<1x256x128xf32, #tpu.memory_space<vmem>>, %arg8: memref<256x128xf32, #tpu.memory_space<vmem>>) attributes {dimension_semantics = [#tpu.dimension_semantics<parallel>, #tpu.dimension_semantics<parallel>, #tpu.dimension_semantics<arbitrary>], iteration_bounds = array<i64: 2, 1, 1>, scalar_prefetch = 0 : i64, scratch_operands = 1 : i64, tpu.core_type = #tpu.core_type<tc>, window_params = [{transform_indices = @transform_0, window_bounds = array<i64: 1, 18, 18, 4>}, {transform_indices = @transform_1, window_bounds = array<i64: 36, 128>}, {transform_indices = @transform_2, window_bounds = array<i64: 1, 128>}, {transform_indices = @transform_3, window_bounds = array<i64: 1, 128>}, {transform_indices = @transform_4, window_bounds = array<i64: 1, 256, 128>}]} {
    %c16_i32 = arith.constant 16 : i32
    %0 = arith.muli %arg1, %c16_i32 : i32
    %1 = tpu.assume_multiple %0, 8 : i32
    %cst = arith.constant 0.000000e+00 : f32
    %2 = vector.broadcast %cst : f32 to vector<256x128xf32>
    %c0 = arith.constant 0 : index
    %c0_0 = arith.constant 0 : index
    %3 = vector.load %arg8[%c0, %c0_0] : memref<256x128xf32, #tpu.memory_space<vmem>>, vector<256x128xf32>
    tpu.vector_store %arg8[%c0, %c0_0], %2 {strides = array<i32>} : memref<256x128xf32, #tpu.memory_space<vmem>>, vector<256x128xf32>,
    %c0_1 = arith.constant 0 : index
    %c0_2 = arith.constant 0 : index
    %4 = vector.load %arg8[%c0_1, %c0_2] : memref<256x128xf32, #tpu.memory_space<vmem>>, vector<256x128xf32>
    %c0_i32 = arith.constant 0 : i32
    %5 = arith.addi %1, %c0_i32 : i32
    %c0_3 = arith.constant 0 : index
    %6 = arith.index_cast %5 : i32 to index
    %c0_4 = arith.constant 0 : index
    %c0_5 = arith.constant 0 : index
    %7 = vector.load %arg3[%c0_3, %6, %c0_4, %c0_5] : memref<1x18x18x4xf32, #tpu.memory_space<vmem>>, vector<1x16x16x4xf32>
    %8 = vector.shape_cast %7 : vector<1x16x16x4xf32> to vector<16x16x4xf32>
    %9 = vector.shape_cast %8 : vector<16x16x4xf32> to vector<256x4xf32>
    %c0_6 = arith.constant 0 : index
    %c0_7 = arith.constant 0 : index
    %10 = vector.load %arg4[%c0_6, %c0_7] : memref<36x128xf32, #tpu.memory_space<vmem>>, vector<4x128xf32>
    %cst_8 = arith.constant dense<0.000000e+00> : vector<256x128xf32>
    %11 = tpu.matmul %9, %10, %cst_8 {dimension_numbers = #tpu.dot_dimension_numbers<[1], [0], [0], [1], [0, 0, 1, 1], [], []>} : vector<256x4xf32>, vector<4x128xf32>, vector<256x128xf32> -> vector<256x128xf32>
    %12 = arith.addf %4, %11 : vector<256x128xf32>
    %c0_9 = arith.constant 0 : index
    %c0_10 = arith.constant 0 : index
    %13 = vector.load %arg8[%c0_9, %c0_10] : memref<256x128xf32, #tpu.memory_space<vmem>>, vector<256x128xf32>
    tpu.vector_store %arg8[%c0_9, %c0_10], %12 {strides = array<i32>} : memref<256x128xf32, #tpu.memory_space<vmem>>, vector<256x128xf32>,
    %c0_11 = arith.constant 0 : index
    %c0_12 = arith.constant 0 : index
    %14 = vector.load %arg8[%c0_11, %c0_12] : memref<256x128xf32, #tpu.memory_space<vmem>>, vector<256x128xf32>
    %c0_i32_13 = arith.constant 0 : i32
    %15 = arith.addi %1, %c0_i32_13 : i32
    %c0_14 = arith.constant 0 : index
    %16 = arith.index_cast %15 : i32 to index
    %c1 = arith.constant 1 : index
    %c0_15 = arith.constant 0 : index
    %17 = vector.load %arg3[%c0_14, %16, %c1, %c0_15] : memref<1x18x18x4xf32, #tpu.memory_space<vmem>>, vector<1x16x16x4xf32>
    %18 = vector.shape_cast %17 : vector<1x16x16x4xf32> to vector<16x16x4xf32>
    %19 = vector.shape_cast %18 : vector<16x16x4xf32> to vector<256x4xf32>
    %c4 = arith.constant 4 : index
    %c0_16 = arith.constant 0 : index
    %20 = vector.load %arg4[%c4, %c0_16] : memref<36x128xf32, #tpu.memory_space<vmem>>, vector<4x128xf32>
    %cst_17 = arith.constant dense<0.000000e+00> : vector<256x128xf32>
    %21 = tpu.matmul %19, %20, %cst_17 {dimension_numbers = #tpu.dot_dimension_numbers<[1], [0], [0], [1], [0, 0, 1, 1], [], []>} : vector<256x4xf32>, vector<4x128xf32>, vector<256x128xf32> -> vector<256x128xf32>
    %22 = arith.addf %14, %21 : vector<256x128xf32>
    %c0_18 = arith.constant 0 : index
    %c0_19 = arith.constant 0 : index
    %23 = vector.load %arg8[%c0_18, %c0_19] : memref<256x128xf32, #tpu.memory_space<vmem>>, vector<256x128xf32>
    tpu.vector_store %arg8[%c0_18, %c0_19], %22 {strides = array<i32>} : memref<256x128xf32, #tpu.memory_space<vmem>>, vector<256x128xf32>,
    %c0_20 = arith.constant 0 : index
    %c0_21 = arith.constant 0 : index
    %24 = vector.load %arg8[%c0_20, %c0_21] : memref<256x128xf32, #tpu.memory_space<vmem>>, vector<256x128xf32>
    %c0_i32_22 = arith.constant 0 : i32
    %25 = arith.addi %1, %c0_i32_22 : i32
    %c0_23 = arith.constant 0 : index
    %26 = arith.index_cast %25 : i32 to index
    %c2 = arith.constant 2 : index
    %c0_24 = arith.constant 0 : index
    %27 = vector.load %arg3[%c0_23, %26, %c2, %c0_24] : memref<1x18x18x4xf32, #tpu.memory_space<vmem>>, vector<1x16x16x4xf32>
    %28 = vector.shape_cast %27 : vector<1x16x16x4xf32> to vector<16x16x4xf32>
    %29 = vector.shape_cast %28 : vector<16x16x4xf32> to vector<256x4xf32>
    %c8 = arith.constant 8 : index
    %c0_25 = arith.constant 0 : index
    %30 = vector.load %arg4[%c8, %c0_25] : memref<36x128xf32, #tpu.memory_space<vmem>>, vector<4x128xf32>
    %cst_26 = arith.constant dense<0.000000e+00> : vector<256x128xf32>
    %31 = tpu.matmul %29, %30, %cst_26 {dimension_numbers = #tpu.dot_dimension_numbers<[1], [0], [0], [1], [0, 0, 1, 1], [], []>} : vector<256x4xf32>, vector<4x128xf32>, vector<256x128xf32> -> vector<256x128xf32>
    %32 = arith.addf %24, %31 : vector<256x128xf32>
    %c0_27 = arith.constant 0 : index
    %c0_28 = arith.constant 0 : index
    %33 = vector.load %arg8[%c0_27, %c0_28] : memref<256x128xf32, #tpu.memory_space<vmem>>, vector<256x128xf32>
    tpu.vector_store %arg8[%c0_27, %c0_28], %32 {strides = array<i32>} : memref<256x128xf32, #tpu.memory_space<vmem>>, vector<256x128xf32>,
    %c0_29 = arith.constant 0 : index
    %c0_30 = arith.constant 0 : index
    %34 = vector.load %arg8[%c0_29, %c0_30] : memref<256x128xf32, #tpu.memory_space<vmem>>, vector<256x128xf32>
    %c1_i32 = arith.constant 1 : i32
    %35 = arith.addi %1, %c1_i32 : i32
    %c0_31 = arith.constant 0 : index
    %36 = arith.index_cast %35 : i32 to index
    %c0_32 = arith.constant 0 : index
    %c0_33 = arith.constant 0 : index
    %37 = vector.load %arg3[%c0_31, %36, %c0_32, %c0_33] : memref<1x18x18x4xf32, #tpu.memory_space<vmem>>, vector<1x16x16x4xf32>
    %38 = vector.shape_cast %37 : vector<1x16x16x4xf32> to vector<16x16x4xf32>
    %39 = vector.shape_cast %38 : vector<16x16x4xf32> to vector<256x4xf32>
    %c12 = arith.constant 12 : index
    %c0_34 = arith.constant 0 : index
    %40 = vector.load %arg4[%c12, %c0_34] : memref<36x128xf32, #tpu.memory_space<vmem>>, vector<4x128xf32>
    %cst_35 = arith.constant dense<0.000000e+00> : vector<256x128xf32>
    %41 = tpu.matmul %39, %40, %cst_35 {dimension_numbers = #tpu.dot_dimension_numbers<[1], [0], [0], [1], [0, 0, 1, 1], [], []>} : vector<256x4xf32>, vector<4x128xf32>, vector<256x128xf32> -> vector<256x128xf32>
    %42 = arith.addf %34, %41 : vector<256x128xf32>
    %c0_36 = arith.constant 0 : index
    %c0_37 = arith.constant 0 : index
    %43 = vector.load %arg8[%c0_36, %c0_37] : memref<256x128xf32, #tpu.memory_space<vmem>>, vector<256x128xf32>
    tpu.vector_store %arg8[%c0_36, %c0_37], %42 {strides = array<i32>} : memref<256x128xf32, #tpu.memory_space<vmem>>, vector<256x128xf32>,
    %c0_38 = arith.constant 0 : index
    %c0_39 = arith.constant 0 : index
    %44 = vector.load %arg8[%c0_38, %c0_39] : memref<256x128xf32, #tpu.memory_space<vmem>>, vector<256x128xf32>
    %c1_i32_40 = arith.constant 1 : i32
    %45 = arith.addi %1, %c1_i32_40 : i32
    %c0_41 = arith.constant 0 : index
    %46 = arith.index_cast %45 : i32 to index
    %c1_42 = arith.constant 1 : index
    %c0_43 = arith.constant 0 : index
    %47 = vector.load %arg3[%c0_41, %46, %c1_42, %c0_43] : memref<1x18x18x4xf32, #tpu.memory_space<vmem>>, vector<1x16x16x4xf32>
    %48 = vector.shape_cast %47 : vector<1x16x16x4xf32> to vector<16x16x4xf32>
    %49 = vector.shape_cast %48 : vector<16x16x4xf32> to vector<256x4xf32>
    %c16 = arith.constant 16 : index
    %c0_44 = arith.constant 0 : index
    %50 = vector.load %arg4[%c16, %c0_44] : memref<36x128xf32, #tpu.memory_space<vmem>>, vector<4x128xf32>
    %cst_45 = arith.constant dense<0.000000e+00> : vector<256x128xf32>
    %51 = tpu.matmul %49, %50, %cst_45 {dimension_numbers = #tpu.dot_dimension_numbers<[1], [0], [0], [1], [0, 0, 1, 1], [], []>} : vector<256x4xf32>, vector<4x128xf32>, vector<256x128xf32> -> vector<256x128xf32>
    %52 = arith.addf %44, %51 : vector<256x128xf32>
    %c0_46 = arith.constant 0 : index
    %c0_47 = arith.constant 0 : index
    %53 = vector.load %arg8[%c0_46, %c0_47] : memref<256x128xf32, #tpu.memory_space<vmem>>, vector<256x128xf32>
    tpu.vector_store %arg8[%c0_46, %c0_47], %52 {strides = array<i32>} : memref<256x128xf32, #tpu.memory_space<vmem>>, vector<256x128xf32>,
    %c0_48 = arith.constant 0 : index
    %c0_49 = arith.constant 0 : index
    %54 = vector.load %arg8[%c0_48, %c0_49] : memref<256x128xf32, #tpu.memory_space<vmem>>, vector<256x128xf32>
    %c1_i32_50 = arith.constant 1 : i32
    %55 = arith.addi %1, %c1_i32_50 : i32
    %c0_51 = arith.constant 0 : index
    %56 = arith.index_cast %55 : i32 to index
    %c2_52 = arith.constant 2 : index
    %c0_53 = arith.constant 0 : index
    %57 = vector.load %arg3[%c0_51, %56, %c2_52, %c0_53] : memref<1x18x18x4xf32, #tpu.memory_space<vmem>>, vector<1x16x16x4xf32>
    %58 = vector.shape_cast %57 : vector<1x16x16x4xf32> to vector<16x16x4xf32>
    %59 = vector.shape_cast %58 : vector<16x16x4xf32> to vector<256x4xf32>
    %c20 = arith.constant 20 : index
    %c0_54 = arith.constant 0 : index
    %60 = vector.load %arg4[%c20, %c0_54] : memref<36x128xf32, #tpu.memory_space<vmem>>, vector<4x128xf32>
    %cst_55 = arith.constant dense<0.000000e+00> : vector<256x128xf32>
    %61 = tpu.matmul %59, %60, %cst_55 {dimension_numbers = #tpu.dot_dimension_numbers<[1], [0], [0], [1], [0, 0, 1, 1], [], []>} : vector<256x4xf32>, vector<4x128xf32>, vector<256x128xf32> -> vector<256x128xf32>
    %62 = arith.addf %54, %61 : vector<256x128xf32>
    %c0_56 = arith.constant 0 : index
    %c0_57 = arith.constant 0 : index
    %63 = vector.load %arg8[%c0_56, %c0_57] : memref<256x128xf32, #tpu.memory_space<vmem>>, vector<256x128xf32>
    tpu.vector_store %arg8[%c0_56, %c0_57], %62 {strides = array<i32>} : memref<256x128xf32, #tpu.memory_space<vmem>>, vector<256x128xf32>,
    %c0_58 = arith.constant 0 : index
    %c0_59 = arith.constant 0 : index
    %64 = vector.load %arg8[%c0_58, %c0_59] : memref<256x128xf32, #tpu.memory_space<vmem>>, vector<256x128xf32>
    %c2_i32 = arith.constant 2 : i32
    %65 = arith.addi %1, %c2_i32 : i32
    %c0_60 = arith.constant 0 : index
    %66 = arith.index_cast %65 : i32 to index
    %c0_61 = arith.constant 0 : index
    %c0_62 = arith.constant 0 : index
    %67 = vector.load %arg3[%c0_60, %66, %c0_61, %c0_62] : memref<1x18x18x4xf32, #tpu.memory_space<vmem>>, vector<1x16x16x4xf32>
    %68 = vector.shape_cast %67 : vector<1x16x16x4xf32> to vector<16x16x4xf32>
    %69 = vector.shape_cast %68 : vector<16x16x4xf32> to vector<256x4xf32>
    %c24 = arith.constant 24 : index
    %c0_63 = arith.constant 0 : index
    %70 = vector.load %arg4[%c24, %c0_63] : memref<36x128xf32, #tpu.memory_space<vmem>>, vector<4x128xf32>
    %cst_64 = arith.constant dense<0.000000e+00> : vector<256x128xf32>
    %71 = tpu.matmul %69, %70, %cst_64 {dimension_numbers = #tpu.dot_dimension_numbers<[1], [0], [0], [1], [0, 0, 1, 1], [], []>} : vector<256x4xf32>, vector<4x128xf32>, vector<256x128xf32> -> vector<256x128xf32>
    %72 = arith.addf %64, %71 : vector<256x128xf32>
    %c0_65 = arith.constant 0 : index
    %c0_66 = arith.constant 0 : index
    %73 = vector.load %arg8[%c0_65, %c0_66] : memref<256x128xf32, #tpu.memory_space<vmem>>, vector<256x128xf32>
    tpu.vector_store %arg8[%c0_65, %c0_66], %72 {strides = array<i32>} : memref<256x128xf32, #tpu.memory_space<vmem>>, vector<256x128xf32>,
    %c0_67 = arith.constant 0 : index
    %c0_68 = arith.constant 0 : index
    %74 = vector.load %arg8[%c0_67, %c0_68] : memref<256x128xf32, #tpu.memory_space<vmem>>, vector<256x128xf32>
    %c2_i32_69 = arith.constant 2 : i32
    %75 = arith.addi %1, %c2_i32_69 : i32
    %c0_70 = arith.constant 0 : index
    %76 = arith.index_cast %75 : i32 to index
    %c1_71 = arith.constant 1 : index
    %c0_72 = arith.constant 0 : index
    %77 = vector.load %arg3[%c0_70, %76, %c1_71, %c0_72] : memref<1x18x18x4xf32, #tpu.memory_space<vmem>>, vector<1x16x16x4xf32>
    %78 = vector.shape_cast %77 : vector<1x16x16x4xf32> to vector<16x16x4xf32>
    %79 = vector.shape_cast %78 : vector<16x16x4xf32> to vector<256x4xf32>
    %c28 = arith.constant 28 : index
    %c0_73 = arith.constant 0 : index
    %80 = vector.load %arg4[%c28, %c0_73] : memref<36x128xf32, #tpu.memory_space<vmem>>, vector<4x128xf32>
    %cst_74 = arith.constant dense<0.000000e+00> : vector<256x128xf32>
    %81 = tpu.matmul %79, %80, %cst_74 {dimension_numbers = #tpu.dot_dimension_numbers<[1], [0], [0], [1], [0, 0, 1, 1], [], []>} : vector<256x4xf32>, vector<4x128xf32>, vector<256x128xf32> -> vector<256x128xf32>
    %82 = arith.addf %74, %81 : vector<256x128xf32>
    %c0_75 = arith.constant 0 : index
    %c0_76 = arith.constant 0 : index
    %83 = vector.load %arg8[%c0_75, %c0_76] : memref<256x128xf32, #tpu.memory_space<vmem>>, vector<256x128xf32>
    tpu.vector_store %arg8[%c0_75, %c0_76], %82 {strides = array<i32>} : memref<256x128xf32, #tpu.memory_space<vmem>>, vector<256x128xf32>,
    %c0_77 = arith.constant 0 : index
    %c0_78 = arith.constant 0 : index
    %84 = vector.load %arg8[%c0_77, %c0_78] : memref<256x128xf32, #tpu.memory_space<vmem>>, vector<256x128xf32>
    %c2_i32_79 = arith.constant 2 : i32
    %85 = arith.addi %1, %c2_i32_79 : i32
    %c0_80 = arith.constant 0 : index
    %86 = arith.index_cast %85 : i32 to index
    %c2_81 = arith.constant 2 : index
    %c0_82 = arith.constant 0 : index
    %87 = vector.load %arg3[%c0_80, %86, %c2_81, %c0_82] : memref<1x18x18x4xf32, #tpu.memory_space<vmem>>, vector<1x16x16x4xf32>
    %88 = vector.shape_cast %87 : vector<1x16x16x4xf32> to vector<16x16x4xf32>
    %89 = vector.shape_cast %88 : vector<16x16x4xf32> to vector<256x4xf32>
    %c32 = arith.constant 32 : index
    %c0_83 = arith.constant 0 : index
    %90 = vector.load %arg4[%c32, %c0_83] : memref<36x128xf32, #tpu.memory_space<vmem>>, vector<4x128xf32>
    %cst_84 = arith.constant dense<0.000000e+00> : vector<256x128xf32>
    %91 = tpu.matmul %89, %90, %cst_84 {dimension_numbers = #tpu.dot_dimension_numbers<[1], [0], [0], [1], [0, 0, 1, 1], [], []>} : vector<256x4xf32>, vector<4x128xf32>, vector<256x128xf32> -> vector<256x128xf32>
    %92 = arith.addf %84, %91 : vector<256x128xf32>
    %c0_85 = arith.constant 0 : index
    %c0_86 = arith.constant 0 : index
    %93 = vector.load %arg8[%c0_85, %c0_86] : memref<256x128xf32, #tpu.memory_space<vmem>>, vector<256x128xf32>
    tpu.vector_store %arg8[%c0_85, %c0_86], %92 {strides = array<i32>} : memref<256x128xf32, #tpu.memory_space<vmem>>, vector<256x128xf32>,
    %c0_87 = arith.constant 0 : index
    %c0_88 = arith.constant 0 : index
    %94 = vector.load %arg8[%c0_87, %c0_88] : memref<256x128xf32, #tpu.memory_space<vmem>>, vector<256x128xf32>
    %c0_89 = arith.constant 0 : index
    %c0_90 = arith.constant 0 : index
    %95 = vector.load %arg5[%c0_89, %c0_90] : memref<1x128xf32, #tpu.memory_space<vmem>>, vector<1x128xf32>
    %96 = vector.broadcast %95 : vector<1x128xf32> to vector<256x128xf32>
    %97 = arith.mulf %94, %96 : vector<256x128xf32>
    %c0_91 = arith.constant 0 : index
    %c0_92 = arith.constant 0 : index
    %98 = vector.load %arg6[%c0_91, %c0_92] : memref<1x128xf32, #tpu.memory_space<vmem>>, vector<1x128xf32>
    %99 = vector.broadcast %98 : vector<1x128xf32> to vector<256x128xf32>
    %100 = arith.addf %97, %99 : vector<256x128xf32>
    %101 = arith.negf %100 : vector<256x128xf32>
    %102 = math.exp %101 : vector<256x128xf32>
    %cst_93 = arith.constant 1.000000e+00 : f32
    %103 = vector.broadcast %cst_93 : f32 to vector<256x128xf32>
    %104 = arith.addf %103, %102 : vector<256x128xf32>
    %105 = arith.divf %103, %104 : vector<256x128xf32>
    %106 = arith.mulf %100, %105 : vector<256x128xf32>
    %c0_94 = arith.constant 0 : index
    %c0_95 = arith.constant 0 : index
    %c0_96 = arith.constant 0 : index
    %107 = vector.load %arg7[%c0_94, %c0_95, %c0_96] : memref<1x256x128xf32, #tpu.memory_space<vmem>>, vector<1x256x128xf32>
    %108 = vector.shape_cast %107 : vector<1x256x128xf32> to vector<256x128xf32>
    %109 = vector.shape_cast %106 : vector<256x128xf32> to vector<1x256x128xf32>
    tpu.vector_store %arg7[%c0_94, %c0_95, %c0_96], %109 {strides = array<i32>} : memref<1x256x128xf32, #tpu.memory_space<vmem>>, vector<1x256x128xf32>,
    return
  }
  func.func @transform_0(%arg0: i32, %arg1: i32, %arg2: i32) -> (i32, i32, i32, i32) {
    %c0_i32 = arith.constant 0 : i32
    %c0_i32_0 = arith.constant 0 : i32
    %c0_i32_1 = arith.constant 0 : i32
    %c0_i32_2 = arith.constant 0 : i32
    return %arg0, %c0_i32, %c0_i32_0, %c0_i32_1 : i32, i32, i32, i32
  }
  func.func @transform_1(%arg0: i32, %arg1: i32, %arg2: i32) -> (i32, i32) {
    %c0_i32 = arith.constant 0 : i32
    %c0_i32_0 = arith.constant 0 : i32
    return %c0_i32, %arg2 : i32, i32
  }
  func.func @transform_2(%arg0: i32, %arg1: i32, %arg2: i32) -> (i32, i32) {
    %c0_i32 = arith.constant 0 : i32
    %c0_i32_0 = arith.constant 0 : i32
    return %c0_i32, %arg2 : i32, i32
  }
  func.func @transform_3(%arg0: i32, %arg1: i32, %arg2: i32) -> (i32, i32) {
    %c0_i32 = arith.constant 0 : i32
    %c0_i32_0 = arith.constant 0 : i32
    return %c0_i32, %arg2 : i32, i32
  }
  func.func @transform_4(%arg0: i32, %arg1: i32, %arg2: i32) -> (i32, i32, i32) {
    %c0_i32 = arith.constant 0 : i32
    return %arg0, %arg1, %arg2 : i32, i32, i32
  }
}

</mosaic_0001>

<bundles_post_ra>
// kernel: tpu_custom_call.1
= control target key start
LH: loop header
LB: loop body
LE: loop exit
PB: predicated region body
PF: predicated region fallthrough
CT: control target
= control target key end

     0   :  { %9 = vsyncpa [#allocation4], 0  ;;  %s5155_s0 = inlined_call_operand.vmem [shape: f32[2,18,18,4], index: 0, kind: input, shape index: {}]   ;;  %s5156_s1 = inlined_call_operand.vmem [shape: f32[36,128], index: 1, kind: input, shape index: {}]   ;;  %s5157_s2 = inlined_call_operand.vmem [shape: f32[1,128], index: 2, kind: input, shape index: {}]   ;;  %s5158_s3 = inlined_call_operand.vmem [shape: f32[1,128], index: 3, kind: input, shape index: {}]   ;;  %s5159_s4 = inlined_call_operand.hbm [shape: f32[2,256,128], index: 4, kind: output, shape index: {}]  }
   0x1   :  { %11 = vsyncpa [#allocation4 + $0x1], 0  ;;  %s3413_s15 = smov 0   ;;  %s3415_s16 = smov 0  }
   0x2   :  { %s3417_s17 = smov 0   ;;  %s3419_s18 = smov 0  }
   0x3   :  { %s3421_s19 = smov 0   ;;  %s3423_s20 = smov 0  }
   0x4 LB: > { %s2727_s21 = sadd.s32 4294967295, %s3376_s20   ;;  %s2728_s22 = sadd.s32 4294967294, %s3376_s20   ;;  %s3376_s20 = sphi %s3423_s20, %s17_s20   ;;  %s3372_s19 = sphi %s3421_s19, %s5299_s19   ;;  %s3368_s18 = sphi %s3419_s18, %s5298_s18   ;;  %s3364_s17 = sphi %s3417_s17, %s5297_s17   ;;  %s3360_s16 = sphi %s3415_s16, %s5296_s16   ;;  %s3356_s15 = sphi %s3413_s15, %s5295_s15  }
   0x5   : > { %s36_s23 = sadd.s32 1, %s3372_s19  ;;  %s151_s24 = sadd.s32 1, %s3364_s17 }
   0x6   : > { %p38_p0 = scmp.ge.s32.totalorder %s36_s23, 2  ;;  %p161_p1 = scmp.ne.s32.totalorder %s3364_s17, %s3360_s16 }
   0x7   : > { %p162_p2 = scmp.eq.s32.totalorder %s2727_s21, 1  ;;  %p167_p3 = scmp.ne.s32.totalorder %s3360_s16, %s3356_s15 }
   0x8   : > { %s5301_s23 = smov (%p38_p0, %s36_s23), 0  ;;  %p168_p5 = scmp.eq.s32.totalorder %s2728_s22, 1 }
   0x9   : > { %p3453_p4 = por %p162_p2, %p161_p1  ;;  %s144_s26 = ssub.s32 %s3372_s19, %s5301_s23 }
   0xa   : > { %p2734_p6 = scmp.ge.s32.totalorder %s3376_s20, 1  ;;  %p149_p7 = scmp.eq.s32.totalorder %s144_s26, 0 }
   0xb   : > { %p3460_p8 = por %p168_p5, %p167_p3  ;;  %p213_p9 = scmp.lt.s32.totalorder %s3376_s20, 3 }
   0xc   : > { %s3466_s28 = scalar_select %p149_p7, %s3364_s17, %s151_s24  }
   0xd   : > { %p214_p10 = pnand %p2734_p6, %p213_p9 }
   0xf   : > { %217 = sbr.rel (%p214_p10) target bundleno = 909 (0x38d), region = 36 }
  0x14   : > { %p249_p11 = scmp.lt.s32.totalorder %s3368_s18, 1  ;;  %s3378_s8 = smov 4   ;;  %vm1590_vm0 = vcmask 31744   ;;  %vm1623_vm1 = vcmask 64512   ;;  %vm2021_vm2 = vcmask 1043456   ;;  %vm1656_vm3 = vcmask 97280  }
  0x15   : > { %s3379_s9 = smov 8   ;;  %s3380_s10 = smov 12   ;;  %vm1689_vm4 = vcmask 130048   ;;  %vm1722_vm5 = vcmask 162816   ;;  %vm1755_vm6 = vcmask 195584   ;;  %vm1788_vm7 = vcmask 228352  }
  0x16   : > { %s250_s29 = scalar_select %p249_p11, %s3368_s18, 1  ;;  %vm1821_vm8 = vcmask 261120   ;;  %vm1854_vm9 = vcmask 293888  }
  0x17   : > { %s3381_s11 = smov 16   ;;  %s3382_s12 = smov 20  }
  0x18   : > { %s3107_s30 = smul.u32 432, %s250_s29  ;;  %s3383_s13 = smov 24  }
  0x19   : > { %s3384_s14 = smov 28   ;;  %s3385_s24 = smov 32  }
  0x1a   : > { %s3473_s7 = scalar_lea.vmem %s5155_s0, %s3107_s30  ;;  %s3001_s26 = sshll.u32 %s3368_s18, 12 }
  0x1b   : > { %v3476_v0 = vld [vmem:[%s3473_s7 + $0x19] sm:$0xff]  ;;  %v304_v1 = vld [vmem:[%s3473_s7 + $0x1] sm:$0xff]  ;;  %v305_v3 = vld [vmem:[%s3473_s7 + $0x9] sm:$0xff]  ;;  %s5100_s6 = scalar_lea.hbm %s5159_s4, %s3001_s26  ;;  %s3386_s21 = smov [#allocation3]  }
  0x1c   : > { %602 = vrot.lane.b32.xlu1 %v3476_v0, %s3378_s8  ;;  %598 = vrot.lane.b32.xlu0 %v304_v1, %s3378_s8  ;;  %v3483_v2 = vld [vmem:[%s3473_s7 + $0x21] sm:$0xff]  ;;  %v3490_v4 = vld [vmem:[%s3473_s7 + $0x39] sm:$0xff]  ;;  %s3304_s22 = sshll.u32 %s3386_s21, 4  ;;  %s3305_s22 = int_to_ptr.vmem [resolvable:$false] %s3304_s22 }
  0x1d   : > { %v3493_v5 = vld [vmem:[%s3473_s7 + $0x31] sm:$0xff]  ;;  %v3503_v7 = vld [vmem:[%s3473_s7 + $0x49] sm:$0xff]  ;;  %v3513_v9 = vld [vmem:[%s3473_s7 + $0x61] sm:$0xff] }
  0x1e   : > { %v3500_v6 = vld [vmem:[%s3473_s7 + $0x51] sm:$0xff]  ;;  %v3510_v8 = vld [vmem:[%s3473_s7 + $0x69] sm:$0xff]  ;;  %5194 = vst [vmem:[#allocation7_spill] sm:$0xff] %v3513_v9  ;;  %v315_v10 = vld [vmem:[%s3473_s7 + $0x81] sm:$0xff] }
  0x1f   : > { %5193 = vst [vmem:[#allocation6_spill] sm:$0xff] %v3510_v8  ;;  %v314_v11 = vld [vmem:[%s3473_s7 + $0x79] sm:$0xff]  ;;  %v316_v13 = vld [vmem:[%s3473_s7 + $0x91] sm:$0xff]  ;;  %v318_v15 = vld [vmem:[%s3473_s7 + $0xa9] sm:$0xff] }
  0x20   : > { %604 = vrot.lane.b32.xlu1 %v3483_v2, %s3378_s8  ;;  %600 = vrot.lane.b32.xlu0 %v305_v3, %s3378_s8  ;;  %v317_v12 = vld [vmem:[%s3473_s7 + $0x99] sm:$0xff]  ;;  %v319_v14 = vld [vmem:[%s3473_s7 + $0xb1] sm:$0xff] }
  0x21   : > { %v321_v16 = vld [vmem:[%s3473_s7 + $0xc9] sm:$0xff]  ;;  %v320_v17 = vld [vmem:[%s3473_s7 + $0xc1] sm:$0xff]  ;;  %v3539_v19 = vld [vmem:[%s3473_s7 + $0xd9] sm:$0xff] }
  0x22   : > { %v3536_v18 = vld [vmem:[%s3473_s7 + $0xe1] sm:$0xff]  ;;  %v3546_v20 = vld [vmem:[%s3473_s7 + $0xf9] sm:$0xff]  ;;  %v3549_v21 = vld [vmem:[%s3473_s7 + $0xf1] sm:$0xff] }
  0x23   : > { %v3556_v22 = vld [vmem:[%s3473_s7 + $0x111] sm:$0xff]  ;;  %v3559_v23 = vld [vmem:[%s3473_s7 + $0x109] sm:$0xff]  ;;  %v3569_v25 = vld [vmem:[%s3473_s7 + $0x121] sm:$0xff] }
  0x24   : > { %608 = vrot.lane.b32.xlu1 %v3490_v4, %s3378_s8  ;;  %606 = vrot.lane.b32.xlu0 %v3493_v5, %s3378_s8  ;;  %5195 = vst [vmem:[#allocation8_spill] sm:$0xff] %v3556_v22  ;;  %v3566_v24 = vld [vmem:[%s3473_s7 + $0x129] sm:$0xff]  ;;  %5197 = vst [vmem:[#allocation10_spill] sm:$0xff] %v3569_v25  ;;  %v331_v26 = vld [vmem:[%s3473_s7 + $0x141] sm:$0xff] }
  0x25   : > { %5196 = vst [vmem:[#allocation9_spill] sm:$0xff] %v3566_v24  ;;  %v330_v27 = vld [vmem:[%s3473_s7 + $0x139] sm:$0xff]  ;;  %v332_v29 = vld [vmem:[%s3473_s7 + $0x151] sm:$0xff]  ;;  %v334_v31 = vld [vmem:[%s3473_s7 + $0x169] sm:$0xff] }
  0x26   : > { %v333_v28 = vld [vmem:[%s3473_s7 + $0x159] sm:$0xff]  ;;  %v335_v30 = vld [vmem:[%s3473_s7 + $0x171] sm:$0xff]  ;;  %v336_v33 = vld [vmem:[%s3473_s7 + $0x2] sm:$0xff] }
  0x27   : > { %v337_v32 = vld [vmem:[%s3473_s7 + $0xa] sm:$0xff]  ;;  %v3592_v34 = vld [vmem:[%s3473_s7 + $0x22] sm:$0xff]  ;;  %v3595_v35 = vld [vmem:[%s3473_s7 + $0x1a] sm:$0xff] }
  0x28   : > { %612 = vrot.lane.b32.xlu1 %v3500_v6, %s3378_s8  ;;  %610 = vrot.lane.b32.xlu0 %v3503_v7, %s3378_s8  ;;  %v3602_v36 = vld [vmem:[%s3473_s7 + $0x3a] sm:$0xff]  ;;  %v3605_v37 = vld [vmem:[%s3473_s7 + $0x32] sm:$0xff] }
  0x29   : > { %v3612_v38 = vld [vmem:[%s3473_s7 + $0x52] sm:$0xff]  ;;  %v3615_v39 = vld [vmem:[%s3473_s7 + $0x4a] sm:$0xff]  ;;  %v3625_v41 = vld [vmem:[%s3473_s7 + $0x62] sm:$0xff] }
  0x2a   : > { %5198 = vst [vmem:[#allocation11_spill] sm:$0xff] %v3612_v38  ;;  %v3622_v40 = vld [vmem:[%s3473_s7 + $0x6a] sm:$0xff]  ;;  %5200 = vst [vmem:[#allocation13_spill] sm:$0xff] %v3625_v41  ;;  %v347_v42 = vld [vmem:[%s3473_s7 + $0x82] sm:$0xff] }
  0x2b   : > { %5199 = vst [vmem:[#allocation12_spill] sm:$0xff] %v3622_v40  ;;  %v346_v43 = vld [vmem:[%s3473_s7 + $0x7a] sm:$0xff]  ;;  %v348_v45 = vld [vmem:[%s3473_s7 + $0x92] sm:$0xff]  ;;  %v350_v47 = vld [vmem:[%s3473_s7 + $0xaa] sm:$0xff] }
  0x2c   : > { %616 = vrot.lane.b32.xlu1 %v3510_v8, %s3378_s8  ;;  %614 = vrot.lane.b32.xlu0 %v3513_v9, %s3378_s8  ;;  %v349_v44 = vld [vmem:[%s3473_s7 + $0x9a] sm:$0xff]  ;;  %v351_v46 = vld [vmem:[%s3473_s7 + $0xb2] sm:$0xff] }
  0x2d   : > { %v353_v48 = vld [vmem:[%s3473_s7 + $0xca] sm:$0xff]  ;;  %v352_v49 = vld [vmem:[%s3473_s7 + $0xc2] sm:$0xff]  ;;  %v3651_v51 = vld [vmem:[%s3473_s7 + $0xda] sm:$0xff] }
  0x2e   : > { %v3648_v50 = vld [vmem:[%s3473_s7 + $0xe2] sm:$0xff]  ;;  %v3658_v52 = vld [vmem:[%s3473_s7 + $0xfa] sm:$0xff]  ;;  %v3661_v53 = vld [vmem:[%s3473_s7 + $0xf2] sm:$0xff] }
  0x2f   : > { %v3668_v54 = vld [vmem:[%s3473_s7 + $0x112] sm:$0xff]  ;;  %v3671_v55 = vld [vmem:[%s3473_s7 + $0x10a] sm:$0xff]  ;;  %v3681_v57 = vld [vmem:[%s3473_s7 + $0x122] sm:$0xff] }
  0x30   : > { %620 = vrot.lane.b32.xlu1 %v315_v10, %s3378_s8  ;;  %618 = vrot.lane.b32.xlu0 %v314_v11, %s3378_s8  ;;  %5201 = vst [vmem:[#allocation14_spill] sm:$0xff] %v3668_v54  ;;  %5202 = vst [vmem:[#allocation15_spill] sm:$0xff] %v3671_v55  ;;  %v3678_v56 = vld [vmem:[%s3473_s7 + $0x12a] sm:$0xff]  ;;  %v363_v58 = vld [vmem:[%s3473_s7 + $0x142] sm:$0xff] }
  0x31   : > { %5203 = vst [vmem:[#allocation16_spill] sm:$0xff] %v3678_v56  ;;  %5204 = vst [vmem:[#allocation17_spill] sm:$0xff] %v3681_v57  ;;  %v3689_v59 = vld [vmem:[%s3473_s7 + $0x13a] sm:$0xff]  ;;  %v364_v63 = vld [vmem:[%s3473_s7 + $0x152] sm:$0xff] }
  0x32   : > { %5205 = vst [vmem:[#allocation18_spill] sm:$0xff] %v3689_v59  ;;  %v365_v62 = vld [vmem:[%s3473_s7 + $0x15a] sm:$0xff]  ;;  %v367_v10 = vld [vmem:[%s3473_s7 + $0x172] sm:$0xff]  ;;  %v366_v11 = vld [vmem:[%s3473_s7 + $0x16a] sm:$0xff] }
  0x33   : > { %v3885_v9 = vld [vmem:[%s3473_s7 + $0x138] sm:$0xff] }
  0x34   : > { %624 = vrot.lane.b32.xlu1 %v317_v12, %s3378_s8  ;;  %622 = vrot.lane.b32.xlu0 %v316_v13, %s3378_s8 }
  0x38   : > { %628 = vrot.lane.b32.xlu1 %v319_v14, %s3378_s8  ;;  %626 = vrot.lane.b32.xlu0 %v318_v15, %s3378_s8 }
  0x3c   : > { %632 = vrot.lane.b32.xlu1 %v321_v16, %s3378_s8  ;;  %630 = vrot.lane.b32.xlu0 %v320_v17, %s3378_s8  ;;  %v3719_v16 = vld [vmem:[%s3473_s7 + $0x18] sm:$0xff]  ;;  %v3722_v17 = vld [vmem:[%s3473_s7 + $0x20] sm:$0xff] }
  0x3d   : > { %5210 = vst [vmem:[#allocation23_spill] sm:$0xff] %v3719_v16  ;;  %5211 = vst [vmem:[#allocation24_spill] sm:$0xff] %v3722_v17 }
  0x40   : > { %636 = vrot.lane.b32.xlu1 %v3536_v18, %s3378_s8  ;;  %634 = vrot.lane.b32.xlu0 %v3539_v19, %s3378_s8 }
  0x44   : > { %640 = vrot.lane.b32.xlu1 %v3546_v20, %s3378_s8  ;;  %638 = vrot.lane.b32.xlu0 %v3549_v21, %s3378_s8 }
  0x48   : > { %644 = vrot.lane.b32.xlu1 %v3556_v22, %s3378_s8  ;;  %642 = vrot.lane.b32.xlu0 %v3559_v23, %s3378_s8 }
  0x4c   : > { %648 = vrot.lane.b32.xlu1 %v3566_v24, %s3378_s8  ;;  %646 = vrot.lane.b32.xlu0 %v3569_v25, %s3378_s8  ;;  %v3871_v24 = vld [vmem:[%s3473_s7 + $0x128] sm:$0xff] }
  0x50   : > { %652 = vrot.lane.b32.xlu1 %v331_v26, %s3378_s8  ;;  %650 = vrot.lane.b32.xlu0 %v330_v27, %s3378_s8 }
  0x54   : > { %656 = vrot.lane.b32.xlu1 %v333_v28, %s3378_s8  ;;  %654 = vrot.lane.b32.xlu0 %v332_v29, %s3378_s8  ;;  %v3733_v28 = vld [vmem:[%s3473_s7 + $0x38] sm:$0xff]  ;;  %v3736_v29 = vld [vmem:[%s3473_s7 + $0x30] sm:$0xff] }
  0x58   : > { %660 = vrot.lane.b32.xlu1 %v335_v30, %s3378_s8  ;;  %658 = vrot.lane.b32.xlu0 %v334_v31, %s3378_s8 }
  0x5c   : > { %728 = vrot.lane.b32.xlu1 %v337_v32, %s3379_s9  ;;  %726 = vrot.lane.b32.xlu0 %v336_v33, %s3379_s9  ;;  %v3747_v32 = vld [vmem:[%s3473_s7 + $0x50] sm:$0xff]  ;;  %v3750_v33 = vld [vmem:[%s3473_s7 + $0x48] sm:$0xff] }
  0x60   : > { %732 = vrot.lane.b32.xlu1 %v3592_v34, %s3379_s9  ;;  %730 = vrot.lane.b32.xlu0 %v3595_v35, %s3379_s9 }
  0x64   : > { %736 = vrot.lane.b32.xlu1 %v3602_v36, %s3379_s9  ;;  %734 = vrot.lane.b32.xlu0 %v3605_v37, %s3379_s9 }
  0x68   : > { %740 = vrot.lane.b32.xlu1 %v3612_v38, %s3379_s9  ;;  %738 = vrot.lane.b32.xlu0 %v3615_v39, %s3379_s9 }
  0x6c   : > { %744 = vrot.lane.b32.xlu1 %v3622_v40, %s3379_s9  ;;  %742 = vrot.lane.b32.xlu0 %v3625_v41, %s3379_s9  ;;  %v3857_v40 = vld [vmem:[%s3473_s7 + $0x110] sm:$0xff]  ;;  %v3874_v41 = vld [vmem:[%s3473_s7 + $0x120] sm:$0xff] }
  0x70   : > { %748 = vrot.lane.b32.xlu1 %v347_v42, %s3379_s9  ;;  %746 = vrot.lane.b32.xlu0 %v346_v43, %s3379_s9  ;;  %v285_v42 = vld [vmem:[%s3473_s7 + $0x98] sm:$0xff] }
  0x74   : > { %752 = vrot.lane.b32.xlu1 %v349_v44, %s3379_s9  ;;  %750 = vrot.lane.b32.xlu0 %v348_v45, %s3379_s9  ;;  %v3760_v45 = vld [vmem:[%s3473_s7 + $0x68] sm:$0xff] }
  0x78   : > { %756 = vrot.lane.b32.xlu1 %v351_v46, %s3379_s9  ;;  %754 = vrot.lane.b32.xlu0 %v350_v47, %s3379_s9  ;;  %v3763_v46 = vld [vmem:[%s3473_s7 + $0x60] sm:$0xff] }
  0x7c   : > { %760 = vrot.lane.b32.xlu1 %v353_v48, %s3379_s9  ;;  %758 = vrot.lane.b32.xlu0 %v352_v49, %s3379_s9  ;;  %v287_v48 = vld [vmem:[%s3473_s7 + $0xb0] sm:$0xff]  ;;  %v286_v49 = vld [vmem:[%s3473_s7 + $0xa8] sm:$0xff] }
  0x80   : > { %764 = vrot.lane.b32.xlu1 %v3648_v50, %s3379_s9  ;;  %762 = vrot.lane.b32.xlu0 %v3651_v51, %s3379_s9 }
  0x84   : > { %768 = vrot.lane.b32.xlu1 %v3658_v52, %s3379_s9  ;;  %766 = vrot.lane.b32.xlu0 %v3661_v53, %s3379_s9 }
  0x88   : > { %772 = vrot.lane.b32.xlu1 %v3668_v54, %s3379_s9  ;;  %770 = vrot.lane.b32.xlu0 %v3671_v55, %s3379_s9 }
  0x8c   : > { %776 = vrot.lane.b32.xlu1 %v3678_v56, %s3379_s9  ;;  %774 = vrot.lane.b32.xlu0 %v3681_v57, %s3379_s9 }
  0x8e   : > { %v3691_v60 = vpop.permute.xlu1 %602  ;;  %v3693_v61 = vpop.permute.xlu0 %598 }
  0x8f   : > { %5206 = vst [vmem:[#allocation19_spill] sm:$0xff] %v3691_v60  ;;  %5207 = vst [vmem:[#allocation20_spill] sm:$0xff] %v3693_v61  ;;  %v3807_v60 = vld [vmem:[%s3473_s7 + $0xf8] sm:$0xff]  ;;  %v3835_v61 = vld [vmem:[%s3473_s7 + $0xe0] sm:$0xff] }
  0x90   : > { %780 = vrot.lane.b32.xlu1 %v363_v58, %s3379_s9  ;;  %778 = vrot.lane.b32.xlu0 %v3689_v59, %s3379_s9  ;;  %v3810_v59 = vld [vmem:[%s3473_s7 + $0xf0] sm:$0xff]  ;;  %5218 = vst [vmem:[#allocation31_spill] sm:$0xff] %v3835_v61 }
  0x92   : > { %v3700_v1 = vpop.permute.xlu1 %604  ;;  %v3702_v3 = vpop.permute.xlu0 %600 }
  0x93   : > { %5208 = vst [vmem:[#allocation21_spill] sm:$0xff] %v3700_v1  ;;  %5209 = vst [vmem:[#allocation22_spill] sm:$0xff] %v3702_v3 }
  0x94   : > { %784 = vrot.lane.b32.xlu1 %v365_v62, %s3379_s9  ;;  %782 = vrot.lane.b32.xlu0 %v364_v63, %s3379_s9  ;;  %v3775_v63 = vld [vmem:[%s3473_s7 + $0x80] sm:$0xff] }
  0x96   : > { %v3708_v12 = vpop.permute.xlu1 %608  ;;  %v3710_v13 = vpop.permute.xlu0 %606 }
  0x98   : > { %788 = vrot.lane.b32.xlu1 %v367_v10, %s3379_s9  ;;  %786 = vrot.lane.b32.xlu0 %v366_v11, %s3379_s9  ;;  %v3778_v10 = vld [vmem:[%s3473_s7 + $0x78] sm:$0xff] }
  0x9a   : > { %v3714_v14 = vpop.permute.xlu1 %612  ;;  %v3716_v15 = vpop.permute.xlu0 %610 }
  0x9c   : > { %856 = vrot.lane.b32.xlu1 %v3722_v17, %s3380_s10  ;;  %854 = vrot.lane.b32.xlu0 %v3719_v16, %s3380_s10  ;;  %v3795_v16 = vld [vmem:[%s3473_s7 + $0x90] sm:$0xff] }
  0x9e   : > { %v3728_v26 = vpop.permute.xlu1 %616  ;;  %v3730_v27 = vpop.permute.xlu0 %614 }
  0xa0   : > { %860 = vrot.lane.b32.xlu1 %v3733_v28, %s3380_s10  ;;  %858 = vrot.lane.b32.xlu0 %v3736_v29, %s3380_s10 }
  0xa2   : > { %v3742_v30 = vpop.permute.xlu1 %620  ;;  %v3744_v31 = vpop.permute.xlu0 %618 }
  0xa4   : > { %864 = vrot.lane.b32.xlu1 %v3747_v32, %s3380_s10  ;;  %862 = vrot.lane.b32.xlu0 %v3750_v33, %s3380_s10 }
  0xa6   : > { %v625_v43 = vpop.permute.xlu1 %624  ;;  %v3757_v44 = vpop.permute.xlu0 %622 }
  0xa7   : > { %v3766_v47 = vsel %vm1590_vm0, %v285_v42, %v625_v43 }
  0xa8   : > { %868 = vrot.lane.b32.xlu1 %v3760_v45, %s3380_s10  ;;  %866 = vrot.lane.b32.xlu0 %v3763_v46, %s3380_s10 }
  0xaa   : > { %v629_v58 = vpop.permute.xlu1 %628  ;;  %v627_v62 = vpop.permute.xlu0 %626 }
  0xab   : > { %v3781_v11 = vsel %vm1590_vm0, %v287_v48, %v629_v58  ;;  %v3784_v43 = vsel %vm1590_vm0, %v286_v49, %v627_v62 }
  0xac   : > { %872 = vrot.lane.b32.xlu1 %v3775_v63, %s3380_s10  ;;  %870 = vrot.lane.b32.xlu0 %v3778_v10, %s3380_s10 }
  0xae   : > { %v3790_v17 = vpop.permute.xlu1 %632  ;;  %v3792_v1 = vpop.permute.xlu0 %630 }
  0xaf   : > { %5212 = vst [vmem:[#allocation25_spill] sm:$0xff] %v3790_v17  ;;  %5213 = vst [vmem:[#allocation26_spill] sm:$0xff] %v3792_v1  ;;  %v3816_v1 = vld [vmem:[%s3473_s7 + $0xc0] sm:$0xff] }
  0xb0   : > { %876 = vrot.lane.b32.xlu1 %v285_v42, %s3380_s10  ;;  %874 = vrot.lane.b32.xlu0 %v3795_v16, %s3380_s10  ;;  %v3813_v42 = vld [vmem:[%s3473_s7 + $0xc8] sm:$0xff]  ;;  %5217 = vst [vmem:[#allocation30_spill] sm:$0xff] %v3816_v1 }
  0xb1   : > { %5216 = vst [vmem:[#allocation29_spill] sm:$0xff] %v3813_v42 }
  0xb2   : > { %v3800_v58 = vpop.permute.xlu1 %636  ;;  %v3802_v62 = vpop.permute.xlu0 %634 }
  0xb3   : > { %5214 = vst [vmem:[#allocation27_spill] sm:$0xff] %v3800_v58  ;;  %5215 = vst [vmem:[#allocation28_spill] sm:$0xff] %v3802_v62 }
  0xb4   : > { %880 = vrot.lane.b32.xlu1 %v287_v48, %s3380_s10  ;;  %878 = vrot.lane.b32.xlu0 %v286_v49, %s3380_s10 }
  0xb6   : > { %v641_v17 = vpop.permute.xlu1 %640  ;;  %v639_v3 = vpop.permute.xlu0 %638 }
  0xb7   : > { %v3820_v58 = vsel %vm1590_vm0, %v3807_v60, %v641_v17  ;;  %v3824_v48 = vsel %vm1590_vm0, %v3810_v59, %v639_v3  ;;  %v3838_v17 = vld [vmem:[%s3473_s7 + $0xd8] sm:$0xff] }
  0xb8   : > { %884 = vrot.lane.b32.xlu1 %v3813_v42, %s3380_s10  ;;  %882 = vrot.lane.b32.xlu0 %v3816_v1, %s3380_s10  ;;  %5219 = vst [vmem:[#allocation32_spill] sm:$0xff] %v3838_v17 }
  0xba   : > { %v3830_v49 = vpop.permute.xlu1 %644  ;;  %v3832_v62 = vpop.permute.xlu0 %642 }
  0xbc   : > { %888 = vrot.lane.b32.xlu1 %v3835_v61, %s3380_s10  ;;  %886 = vrot.lane.b32.xlu0 %v3838_v17, %s3380_s10  ;;  %v3860_v61 = vld [vmem:[%s3473_s7 + $0x108] sm:$0xff] }
  0xbe   : > { %v3844_v3 = vpop.permute.xlu1 %648  ;;  %v3846_v42 = vpop.permute.xlu0 %646 }
  0xc0   : > { %892 = vrot.lane.b32.xlu1 %v3807_v60, %s3380_s10  ;;  %890 = vrot.lane.b32.xlu0 %v3810_v59, %s3380_s10 }
  0xc2   : > { %v3852_v1 = vpop.permute.xlu1 %652  ;;  %v3854_v56 = vpop.permute.xlu0 %650 }
  0xc4   : > { %896 = vrot.lane.b32.xlu1 %v3857_v40, %s3380_s10  ;;  %894 = vrot.lane.b32.xlu0 %v3860_v61, %s3380_s10 }
  0xc6   : > { %v3866_v17 = vpop.permute.xlu1 %656  ;;  %v3868_v57 = vpop.permute.xlu0 %654 }
  0xc8   : > { %900 = vrot.lane.b32.xlu1 %v3871_v24, %s3380_s10  ;;  %898 = vrot.lane.b32.xlu0 %v3874_v41, %s3380_s10 }
  0xca   : > { %v3880_v8 = vpop.permute.xlu1 %660  ;;  %v3882_v25 = vpop.permute.xlu0 %658 }
  0xcc   : > { %982 = vrot.lane.b32.xlu1 %v3476_v0, %s3381_s11  ;;  %902 = vrot.lane.b32.xlu0 %v3885_v9, %s3380_s10  ;;  %v1596_v0 = vsel %vm1590_vm0, %v3733_v28, %v3708_v12 }
  0xce   : > { %v3891_v54 = vpop.permute.xlu1 %728  ;;  %v3893_v38 = vpop.permute.xlu0 %726 }
  0xcf   : > { %5220 = vst [vmem:[#allocation33_spill] sm:$0xff] %v3891_v54 }
  0xd0   : > { %984 = vrot.lane.b32.xlu1 %v3483_v2, %s3381_s11  ;;  %1014 = vrot.lane.b32.xlu0 %v3539_v19, %s3381_s11  ;;  %v1595_v2 = vsel %vm1590_vm0, %v3736_v29, %v3710_v13 }
  0xd2   : > { %v3899_v55 = vpop.permute.xlu1 %732  ;;  %v3901_v22 = vpop.permute.xlu0 %730 }
  0xd3   : > { %5221 = vst [vmem:[#allocation34_spill] sm:$0xff] %v3899_v55  ;;  %5222 = vst [vmem:[#allocation35_spill] sm:$0xff] %v3901_v22 }
  0xd4   : > { %1110 = vrot.lane.b32.xlu1 %v3595_v35, %s3382_s12  ;;  %1016 = vrot.lane.b32.xlu0 %v3536_v18, %s3381_s11  ;;  %v1598_v18 = vsel %vm1590_vm0, %v3747_v32, %v3714_v14  ;;  %v1597_v35 = vsel %vm1590_vm0, %v3750_v33, %v3716_v15 }
  0xd6   : > { %v737_v19 = vpop.permute.xlu1 %736  ;;  %v735_v55 = vpop.permute.xlu0 %734 }
  0xd7   : > { %v3914_v22 = vsel %vm1623_vm1, %v1596_v0, %v737_v19  ;;  %v3917_v54 = vsel %vm1623_vm1, %v1595_v2, %v735_v55 }
  0xd8   : > { %1112 = vrot.lane.b32.xlu1 %v3592_v34, %s3382_s12  ;;  %1142 = vrot.lane.b32.xlu0 %v3651_v51, %s3382_s12  ;;  %v1600_v34 = vsel %vm1590_vm0, %v3760_v45, %v3728_v26  ;;  %v1599_v51 = vsel %vm1590_vm0, %v3763_v46, %v3730_v27  ;;  %v1601_v26 = vsel %vm1590_vm0, %v3778_v10, %v3744_v31 }
  0xda   : > { %v741_v12 = vpop.permute.xlu1 %740  ;;  %v739_v13 = vpop.permute.xlu0 %738 }
  0xdb   : > { %v3930_v0 = vsel %vm1623_vm1, %v1598_v18, %v741_v12  ;;  %v3933_v55 = vsel %vm1623_vm1, %v1597_v35, %v739_v13 }
  0xdc   : > { %1238 = vrot.lane.b32.xlu1 %v3736_v29, %s3383_s13  ;;  %1144 = vrot.lane.b32.xlu0 %v3648_v50, %s3382_s12  ;;  %v1602_v50 = vsel %vm1590_vm0, %v3775_v63, %v3742_v30 }
  0xde   : > { %v745_v14 = vpop.permute.xlu1 %744  ;;  %v743_v15 = vpop.permute.xlu0 %742 }
  0xdf   : > { %v3946_v2 = vsel %vm1623_vm1, %v1600_v34, %v745_v14  ;;  %v3949_v19 = vsel %vm1623_vm1, %v1599_v51, %v743_v15  ;;  %v1920_v15 = vld [vmem:[%s5156_s1 + $0x8] sm:$0xff] }
  0xe0   : > { %5223 = vst [vmem:[#allocation36_spill] sm:$0xff] %v3946_v2  ;;  %1240 = vrot.lane.b32.xlu1 %v3733_v28, %s3383_s13  ;;  %1270 = vrot.lane.b32.xlu0 %v3810_v59, %s3383_s13  ;;  %v1603_v59 = vsel %vm1590_vm0, %v3795_v16, %v3757_v44 }
  0xe2   : > { %v749_v27 = vpop.permute.xlu1 %748  ;;  %v747_v29 = vpop.permute.xlu0 %746 }
  0xe3   : > { %v3962_v18 = vsel %vm1623_vm1, %v1602_v50, %v749_v27  ;;  %v3965_v35 = vsel %vm1623_vm1, %v1601_v26, %v747_v29  ;;  %v1919_v27 = vld [vmem:[%s5156_s1] sm:$0xff] }
  0xe4   : > { %5224 = vst [vmem:[#allocation37_spill] sm:$0xff] %v3962_v18  ;;  %5225 = vst [vmem:[#allocation38_spill] sm:$0xff] %v3965_v35  ;;  %1366 = vrot.lane.b32.xlu1 %v3493_v5, %s3384_s14  ;;  %1272 = vrot.lane.b32.xlu0 %v3807_v60, %s3383_s13 }
  0xe6   : > { %v753_v28 = vpop.permute.xlu1 %752  ;;  %v751_v30 = vpop.permute.xlu0 %750 }
  0xe7   : > { %v3976_v31 = vsel %vm1623_vm1, %v3766_v47, %v753_v28  ;;  %v3979_v12 = vsel %vm1623_vm1, %v1603_v59, %v751_v30 }
  0xe8   : > { %5226 = vst [vmem:[#allocation39_spill] sm:$0xff] %v3976_v31  ;;  %5227 = vst [vmem:[#allocation40_spill] sm:$0xff] %v3979_v12  ;;  %986 = vrot.lane.b32.xlu1 %v3493_v5, %s3381_s11  ;;  %1398 = vrot.lane.b32.xlu0 %v3549_v21, %s3384_s14  ;;  %v1923_v5 = vld [vmem:[%s5156_s1 + $0x20] sm:$0xf] }
  0xe9   : > { %3039 = vmatprep.subr.msk.mxu0 %vm2021_vm2, %v1923_v5  ;;  %3097 = vmatprep.subr.msk.mxu1 %vm2021_vm2, %v1923_v5 }
  0xea   : > { %v757_v60 = vpop.permute.xlu1 %756  ;;  %v755_v13 = vpop.permute.xlu0 %754  ;;  %3040 = vmatpush3.msk.msra.mxu0 %vm2021_vm2, %v1923_v5  ;;  %3102 = vmatpush3.msk.msra.mxu1 %vm2021_vm2, %v1923_v5 }
  0xeb   : > { %v3987_v44 = vsel %vm1623_vm1, %v3781_v11, %v757_v60  ;;  %v3991_v34 = vsel %vm1623_vm1, %v3784_v43, %v755_v13  ;;  %v1921_v11 = vld [vmem:[%s5156_s1 + $0x10] sm:$0xff]  ;;  %v4063_v13 = vld [vmem:[%s3473_s7 + $0x140] sm:$0xff] }
  0xec   : > { %5228 = vst [vmem:[#allocation41_spill] sm:$0xff] %v3987_v44  ;;  %5229 = vst [vmem:[#allocation42_spill] sm:$0xff] %v3991_v34  ;;  %1368 = vrot.lane.b32.xlu1 %v3490_v4, %s3384_s14  ;;  %1018 = vrot.lane.b32.xlu0 %v3549_v21, %s3381_s11  ;;  %v1922_v21 = vld [vmem:[%s5156_s1 + $0x18] sm:$0xff] }
  0xed   : > { %3041 = vmatprep.subr.mxu0 %v1922_v21  ;;  %3098 = vmatprep.subr.mxu1 %v1922_v21  ;;  %v5251_v44 = vld [vmem:[#allocation13_spill] sm:$0xff] }
  0xee   : > { %v4000_v47 = vpop.permute.xlu1 %760  ;;  %v4002_v51 = vpop.permute.xlu0 %758  ;;  %3042 = vmatpush3.msra.mxu0 %v1922_v21  ;;  %3103 = vmatpush3.msra.mxu1 %v1922_v21  ;;  %v5253_v34 = vld [vmem:[#allocation17_spill] sm:$0xff] }
  0xef   : > { %3043 = vmatprep.subr.mxu0 %v1921_v11  ;;  %3099 = vmatprep.subr.mxu1 %v1921_v11 }
  0xf0   : > { %1494 = vrot.lane.b32.xlu1 %v3605_v37, %s3385_s24  ;;  %1400 = vrot.lane.b32.xlu0 %v3546_v20, %s3384_s14 }
  0xf1   : > { %3044 = vmatpush3.msra.mxu0 %v1921_v11  ;;  %3104 = vmatpush3.msra.mxu1 %v1921_v11 }
  0xf2   : > { %v4014_v43 = vpop.permute.xlu1 %764  ;;  %v4016_v14 = vpop.permute.xlu0 %762  ;;  %3045 = vmatprep.subr.mxu0 %v1920_v15  ;;  %3100 = vmatprep.subr.mxu1 %v1920_v15 }
  0xf3   : > { %3046 = vmatpush3.msra.mxu0 %v1920_v15  ;;  %3105 = vmatpush3.msra.mxu1 %v1920_v15  ;;  %v4082_v15 = vld [vmem:[%s3473_s7 + $0x158] sm:$0xff] }
  0xf4   : > { %988 = vrot.lane.b32.xlu1 %v3490_v4, %s3381_s11  ;;  %1526 = vrot.lane.b32.xlu0 %v3661_v53, %s3385_s24 }
  0xf5   : > { %3047 = vmatprep.subr.mxu0 %v1919_v27  ;;  %3101 = vmatprep.subr.mxu1 %v1919_v27 }
  0xf6   : > { %v769_v50 = vpop.permute.xlu1 %768  ;;  %v767_v26 = vpop.permute.xlu0 %766  ;;  %3048 = vmatpush3.msra.mxu0 %v1919_v27  ;;  %3106 = vmatpush3.msra.mxu1 %v1919_v27 }
  0xf7   : > { %v4030_v4 = vsel %vm1623_vm1, %v3820_v58, %v769_v50  ;;  %v4034_v29 = vsel %vm1623_vm1, %v3824_v48, %v767_v26  ;;  %v1614_v58 = vsel %vm1590_vm0, %v3857_v40, %v3830_v49  ;;  %v1613_v48 = vsel %vm1590_vm0, %v3860_v61, %v3832_v62  ;;  %v4085_v50 = vld [vmem:[%s3473_s7 + $0x150] sm:$0xff] }
  0xf8   : > { %1114 = vrot.lane.b32.xlu1 %v3605_v37, %s3382_s12  ;;  %1020 = vrot.lane.b32.xlu0 %v3546_v20, %s3381_s11  ;;  %v1616_v62 = vsel %vm1590_vm0, %v3871_v24, %v3844_v3  ;;  %v1615_v49 = vsel %vm1590_vm0, %v3874_v41, %v3846_v42  ;;  %v1617_v42 = vsel %vm1590_vm0, %v3885_v9, %v3854_v56 }
  0xf9   : > { %v1620_v56 = vsel %vm1590_vm0, %v4082_v15, %v3866_v17 }
  0xfa   : > { %v773_v59 = vpop.permute.xlu1 %772  ;;  %v771_v28 = vpop.permute.xlu0 %770 }
  0xfb   : > { %v4047_v37 = vsel %vm1623_vm1, %v1614_v58, %v773_v59  ;;  %v4050_v20 = vsel %vm1623_vm1, %v1613_v48, %v771_v28  ;;  %v303_v48 = vld [vmem:[%s3473_s7 + $0x170] sm:$0xff]  ;;  %v302_v59 = vld [vmem:[%s3473_s7 + $0x168] sm:$0xff] }
  0xfc   : > { %1496 = vrot.lane.b32.xlu1 %v3602_v36, %s3385_s24  ;;  %1146 = vrot.lane.b32.xlu0 %v3661_v53, %s3382_s12  ;;  %v1618_v53 = vsel %vm1590_vm0, %v4063_v13, %v3852_v1  ;;  %v1619_v1 = vsel %vm1590_vm0, %v4085_v50, %v3868_v57  ;;  %v1621_v57 = vsel %vm1590_vm0, %v302_v59, %v3882_v25 }
  0xfe   : > { %v777_v30 = vpop.permute.xlu1 %776  ;;  %v775_v60 = vpop.permute.xlu0 %774 }
  0xff   : > { %v4066_v5 = vsel %vm1623_vm1, %v1616_v62, %v777_v30  ;;  %v4069_v21 = vsel %vm1623_vm1, %v1615_v49, %v775_v60 }
 0x100   : > { %5230 = vst [vmem:[#allocation43_spill] sm:$0xff] %v4066_v5  ;;  %1116 = vrot.lane.b32.xlu1 %v3602_v36, %s3382_s12  ;;  %1528 = vrot.lane.b32.xlu0 %v3658_v52, %s3385_s24  ;;  %v5258_v5 = vld [vmem:[#allocation30_spill] sm:$0xff] }
 0x102   : > { %v781_v3 = vpop.permute.xlu1 %780  ;;  %v779_v11 = vpop.permute.xlu0 %778 }
 0x103   : > { %v4088_v36 = vsel %vm1623_vm1, %v1618_v53, %v781_v3  ;;  %v4091_v26 = vsel %vm1623_vm1, %v1617_v42, %v779_v11  ;;  %v5238_v3 = vld [vmem:[#allocation15_spill] sm:$0xff] }
 0x104   : > { %5231 = vst [vmem:[#allocation44_spill] sm:$0xff] %v4088_v36  ;;  %5232 = vst [vmem:[#allocation45_spill] sm:$0xff] %v4091_v26  ;;  %1242 = vrot.lane.b32.xlu1 %v3750_v33, %s3383_s13  ;;  %1148 = vrot.lane.b32.xlu0 %v3658_v52, %s3382_s12  ;;  %v1622_v52 = vsel %vm1590_vm0, %v303_v48, %v3880_v8  ;;  %v2871_v36 = vld [vmem:[%s3473_s7 + $0x79] sm:$0xff] }
 0x106   : > { %v785_v27 = vpop.permute.xlu1 %784  ;;  %v783_v58 = vpop.permute.xlu0 %782 }
 0x107   : > { %v4106_v28 = vsel %vm1623_vm1, %v1620_v56, %v785_v27  ;;  %v4109_v33 = vsel %vm1623_vm1, %v1619_v1, %v783_v58  ;;  %v5242_v27 = vld [vmem:[#allocation11_spill] sm:$0xff] }
 0x108   : > { %5233 = vst [vmem:[#allocation46_spill] sm:$0xff] %v4106_v28  ;;  %5234 = vst [vmem:[#allocation47_spill] sm:$0xff] %v4109_v33  ;;  %1244 = vrot.lane.b32.xlu1 %v3747_v32, %s3383_s13  ;;  %1274 = vrot.lane.b32.xlu0 %v3860_v61, %s3383_s13 }
 0x10a   : > { %v789_v17 = vpop.permute.xlu1 %788  ;;  %v787_v62 = vpop.permute.xlu0 %786 }
 0x10b   : > { %v4120_v49 = vsel %vm1623_vm1, %v1622_v52, %v789_v17  ;;  %v4123_v30 = vsel %vm1623_vm1, %v1621_v57, %v787_v62 }
 0x10c   : > { %5235 = vst [vmem:[#allocation48_spill] sm:$0xff] %v4120_v49  ;;  %5236 = vst [vmem:[#allocation49_spill] sm:$0xff] %v4123_v30  ;;  %1370 = vrot.lane.b32.xlu1 %v3503_v7, %s3384_s14  ;;  %1276 = vrot.lane.b32.xlu0 %v3857_v40, %s3383_s13 }
 0x10e   : > { %v4129_v61 = vpop.permute.xlu1 %856  ;;  %v4131_v8 = vpop.permute.xlu0 %854 }
 0x110   : > { %990 = vrot.lane.b32.xlu1 %v3503_v7, %s3381_s11  ;;  %1402 = vrot.lane.b32.xlu0 %v3559_v23, %s3384_s14  ;;  %v5237_v7 = vld [vmem:[#allocation8_spill] sm:$0xff] }
 0x112   : > { %v4137_v25 = vpop.permute.xlu1 %860  ;;  %v4139_v32 = vpop.permute.xlu0 %858 }
 0x114   : > { %1372 = vrot.lane.b32.xlu1 %v3500_v6, %s3384_s14  ;;  %1022 = vrot.lane.b32.xlu0 %v3559_v23, %s3381_s11 }
 0x116   : > { %v4145_v40 = vpop.permute.xlu1 %864  ;;  %v4147_v60 = vpop.permute.xlu0 %862 }
 0x118   : > { %1498 = vrot.lane.b32.xlu1 %v3615_v39, %s3385_s24  ;;  %1404 = vrot.lane.b32.xlu0 %v5237_v7, %s3384_s14 }
 0x11a   : > { %v4153_v53 = vpop.permute.xlu1 %868  ;;  %v4155_v42 = vpop.permute.xlu0 %866 }
 0x11c   : > { %992 = vrot.lane.b32.xlu1 %v3500_v6, %s3381_s11  ;;  %1530 = vrot.lane.b32.xlu0 %v5238_v3, %s3385_s24 }
 0x11e   : > { %v4161_v23 = vpop.permute.xlu1 %872  ;;  %v4163_v11 = vpop.permute.xlu0 %870 }
 0x11f   : > { %5239 = vst [vmem:[#allocation8_spill] sm:$0xff] %v4161_v23 }
 0x120   : > { %1118 = vrot.lane.b32.xlu1 %v3615_v39, %s3382_s12  ;;  %1024 = vrot.lane.b32.xlu0 %v5237_v7, %s3381_s11  ;;  %v5245_v39 = vld [vmem:[#allocation14_spill] sm:$0xff]  ;;  %v5248_v7 = vld [vmem:[#allocation7_spill] sm:$0xff] }
 0x122   : > { %v4169_v56 = vpop.permute.xlu1 %876  ;;  %v4171_v1 = vpop.permute.xlu0 %874 }
 0x123   : > { %5240 = vst [vmem:[#allocation15_spill] sm:$0xff] %v4169_v56  ;;  %5241 = vst [vmem:[#allocation50_spill] sm:$0xff] %v4171_v1 }
 0x124   : > { %1500 = vrot.lane.b32.xlu1 %v5242_v27, %s3385_s24  ;;  %1150 = vrot.lane.b32.xlu0 %v5238_v3, %s3382_s12 }
 0x126   : > { %v4177_v6 = vpop.permute.xlu1 %880  ;;  %v4179_v58 = vpop.permute.xlu0 %878 }
 0x127   : > { %5243 = vst [vmem:[#allocation11_spill] sm:$0xff] %v4177_v6  ;;  %5244 = vst [vmem:[#allocation51_spill] sm:$0xff] %v4179_v58  ;;  %v5254_v6 = vld [vmem:[#allocation12_spill] sm:$0xff] }
 0x128   : > { %1120 = vrot.lane.b32.xlu1 %v5242_v27, %s3382_s12  ;;  %1532 = vrot.lane.b32.xlu0 %v5245_v39, %s3385_s24 }
 0x12a   : > { %v4185_v48 = vpop.permute.xlu1 %884  ;;  %v4187_v59 = vpop.permute.xlu0 %882 }
 0x12b   : > { %5246 = vst [vmem:[#allocation14_spill] sm:$0xff] %v4185_v48  ;;  %5247 = vst [vmem:[#allocation52_spill] sm:$0xff] %v4187_v59 }
 0x12c   : > { %1246 = vrot.lane.b32.xlu1 %v3763_v46, %s3383_s13  ;;  %1152 = vrot.lane.b32.xlu0 %v5245_v39, %s3382_s12  ;;  %v5250_v39 = vld [vmem:[#allocation6_spill] sm:$0xff] }
 0x12e   : > { %v4193_v52 = vpop.permute.xlu1 %888  ;;  %v4195_v57 = vpop.permute.xlu0 %886 }
 0x130   : > { %1248 = vrot.lane.b32.xlu1 %v3760_v45, %s3383_s13  ;;  %1278 = vrot.lane.b32.xlu0 %v3874_v41, %s3383_s13  ;;  %v5249_v45 = vld [vmem:[#allocation10_spill] sm:$0xff] }
 0x132   : > { %v4201_v17 = vpop.permute.xlu1 %892  ;;  %v4203_v62 = vpop.permute.xlu0 %890 }
 0x134   : > { %1374 = vrot.lane.b32.xlu1 %v5248_v7, %s3384_s14  ;;  %1280 = vrot.lane.b32.xlu0 %v3871_v24, %s3383_s13 }
 0x136   : > { %v4209_v46 = vpop.permute.xlu1 %896  ;;  %v4211_v3 = vpop.permute.xlu0 %894 }
 0x138   : > { %994 = vrot.lane.b32.xlu1 %v5248_v7, %s3381_s11  ;;  %1406 = vrot.lane.b32.xlu0 %v5249_v45, %s3384_s14  ;;  %v5252_v7 = vld [vmem:[#allocation9_spill] sm:$0xff] }
 0x13a   : > { %v4217_v41 = vpop.permute.xlu1 %900  ;;  %v4219_v27 = vpop.permute.xlu0 %898 }
 0x13c   : > { %1376 = vrot.lane.b32.xlu1 %v5250_v39, %s3384_s14  ;;  %1026 = vrot.lane.b32.xlu0 %v5249_v45, %s3381_s11 }
 0x13e   : > { %v983_v24 = vpop.permute.xlu1 %982  ;;  %v4225_v49 = vpop.permute.xlu0 %902 }
 0x140   : > { %1502 = vrot.lane.b32.xlu1 %v5251_v44, %s3385_s24  ;;  %1408 = vrot.lane.b32.xlu0 %v5252_v7, %s3384_s14 }
 0x142   : > { %v4231_v48 = vpop.permute.xlu1 %984  ;;  %v1015_v30 = vpop.permute.xlu0 %1014 }
 0x144   : > { %996 = vrot.lane.b32.xlu1 %v5250_v39, %s3381_s11  ;;  %1534 = vrot.lane.b32.xlu0 %v5253_v34, %s3385_s24 }
 0x146   : > { %v1111_v59 = vpop.permute.xlu1 %1110  ;;  %v4237_v45 = vpop.permute.xlu0 %1016 }
 0x148   : > { %1122 = vrot.lane.b32.xlu1 %v5251_v44, %s3382_s12  ;;  %1028 = vrot.lane.b32.xlu0 %v5252_v7, %s3381_s11  ;;  %v5255_v44 = vld [vmem:[#allocation16_spill] sm:$0xff] }
 0x14a   : > { %v4243_v28 = vpop.permute.xlu1 %1112  ;;  %v1143_v31 = vpop.permute.xlu0 %1142 }
 0x14c   : > { %1504 = vrot.lane.b32.xlu1 %v5254_v6, %s3385_s24  ;;  %1154 = vrot.lane.b32.xlu0 %v5253_v34, %s3382_s12 }
 0x14e   : > { %v1239_v39 = vpop.permute.xlu1 %1238  ;;  %v4249_v33 = vpop.permute.xlu0 %1144 }
 0x150   : > { %1124 = vrot.lane.b32.xlu1 %v5254_v6, %s3382_s12  ;;  %1536 = vrot.lane.b32.xlu0 %v5255_v44, %s3385_s24  ;;  %v272_v6 = vld [vmem:[%s3473_s7] sm:$0xff] }
 0x152   : > { %v4255_v7 = vpop.permute.xlu1 %1240  ;;  %v1271_v12 = vpop.permute.xlu0 %1270 }
 0x154   : > { %1250 = vrot.lane.b32.xlu1 %v3778_v10, %s3383_s13  ;;  %1156 = vrot.lane.b32.xlu0 %v5255_v44, %s3382_s12  ;;  %v5256_v10 = vld [vmem:[#allocation20_spill] sm:$0xff] }
 0x155   : > { %v1591_v26 = vsel %vm1590_vm0, %v272_v6, %v5256_v10  ;;  %v5257_v10 = vld [vmem:[#allocation26_spill] sm:$0xff] }
 0x156   : > { %v1367_v34 = vpop.permute.xlu1 %1366  ;;  %v4261_v58 = vpop.permute.xlu0 %1272  ;;  %v1607_v2 = vsel %vm1590_vm0, %v5258_v5, %v5257_v10 }
 0x158   : > { %1252 = vrot.lane.b32.xlu1 %v3775_v63, %s3383_s13  ;;  %1282 = vrot.lane.b32.xlu0 %v3885_v9, %s3383_s13  ;;  %v1624_v63 = vsel %vm1623_vm1, %v1591_v26, %v3893_v38  ;;  %v2887_v9 = vld [vmem:[%s3473_s7 + $0x139] sm:$0xff]  ;;  %v1640_v38 = vsel %vm1623_vm1, %v1607_v2, %v4002_v51  ;;  %v273_v2 = vld [vmem:[%s3473_s7 + $0x8] sm:$0xff] }
 0x159   : > { %v1657_v44 = vsel %vm1656_vm3, %v1624_v63, %v4131_v8  ;;  %v1673_v5 = vsel %vm1656_vm3, %v1640_v38, %v4195_v57  ;;  %v2872_v57 = vld [vmem:[%s3473_s7 + $0x81] sm:$0xff] }
 0x15a   : > { %v4269_v18 = vpop.permute.xlu1 %986  ;;  %v1399_v56 = vpop.permute.xlu0 %1398  ;;  %v1690_v6 = vsel %vm1689_vm4, %v1657_v44, %v983_v24 }
 0x15b   : > { %v1723_v23 = vsel %vm1722_vm5, %v1690_v6, %v1111_v59 }
 0x15c   : > { %1378 = vrot.lane.b32.xlu1 %v2871_v36, %s3384_s14  ;;  %1284 = vrot.lane.b32.xlu0 %v4063_v13, %s3383_s13  ;;  %v1756_v26 = vsel %vm1755_vm6, %v1723_v23, %v1239_v39  ;;  %v2888_v23 = vld [vmem:[%s3473_s7 + $0x141] sm:$0xff] }
 0x15d   : > { %v1789_v8 = vsel %vm1788_vm7, %v1756_v26, %v1367_v34 }
 0x15e   : > { %v1369_v35 = vpop.permute.xlu1 %1368  ;;  %v4281_v1 = vpop.permute.xlu0 %1018 }
 0x160   : > { %904 = vrot.lane.b32.xlu1 %v4063_v13, %s3380_s10  ;;  %1410 = vrot.lane.b32.xlu0 %v2887_v9, %s3384_s14  ;;  %v1706_v13 = vsel %vm1689_vm4, %v1673_v5, %v1015_v30 }
 0x161   : > { %v1739_v44 = vsel %vm1722_vm5, %v1706_v13, %v1143_v31  ;;  %v5259_v31 = vld [vmem:[#allocation22_spill] sm:$0xff]  ;;  %v5262_v13 = vld [vmem:[#allocation29_spill] sm:$0xff] }
 0x162   : > { %v1495_v59 = vpop.permute.xlu1 %1494  ;;  %v1401_v24 = vpop.permute.xlu0 %1400  ;;  %v1772_v51 = vsel %vm1755_vm6, %v1739_v44, %v1271_v12  ;;  %v1592_v10 = vsel %vm1590_vm0, %v273_v2, %v5259_v31  ;;  %v5263_v2 = vld [vmem:[#allocation18_spill] sm:$0xff] }
 0x163   : > { %v1822_v63 = vsel %vm1821_vm8, %v1789_v8, %v1495_v59  ;;  %v1805_v39 = vsel %vm1788_vm7, %v1772_v51, %v1399_v56  ;;  %v5261_v59 = vld [vmem:[#allocation25_spill] sm:$0xff] }
 0x164   : > { %1855 = vst.msk [vmem:[#allocation2] sm:$0xff] %vm1854_vm9, %v1822_v63  ;;  %1030 = vrot.lane.b32.xlu1 %v2887_v9, %s3381_s11  ;;  %998 = vrot.lane.b32.xlu0 %v2871_v36, %s3381_s11  ;;  %v5260_v36 = vld [vmem:[#allocation33_spill] sm:$0xff]  ;;  %v1608_v63 = vsel %vm1590_vm0, %v5262_v13, %v5261_v59 }
 0x165   : > { %v1625_v12 = vsel %vm1623_vm1, %v1592_v10, %v5260_v36  ;;  %v2903_v9 = vld [vmem:[%s3473_s7 + $0x7a] sm:$0xff] }
 0x166   : > { %v4308_v34 = vpop.permute.xlu1 %988  ;;  %v1527_v30 = vpop.permute.xlu0 %1526  ;;  %v1658_v56 = vsel %vm1656_vm3, %v1625_v12, %v4129_v61  ;;  %v1641_v61 = vsel %vm1623_vm1, %v1608_v63, %v4000_v47  ;;  %v2842_v13 = vld [vmem:[%s3473_s7 + $0x98] sm:$0xff] }
 0x167   : > { %v1838_v6 = vsel %vm1821_vm8, %v1805_v39, %v1527_v30  ;;  %v1691_v5 = vsel %vm1689_vm4, %v1658_v56, %v4231_v48  ;;  %v1674_v51 = vsel %vm1656_vm3, %v1641_v61, %v4193_v52  ;;  %v2825_v52 = vld [vmem:[%s3473_s7 + $0x13a] sm:$0xff]  ;;  %v5265_v61 = vld [vmem:[#allocation23_spill] sm:$0xff] }
 0x168   : > { %1871 = vst.msk [vmem:[#allocation2 + $0x80] sm:$0xff] %vm1854_vm9, %v1838_v6  ;;  %1412 = vrot.lane.b32.xlu1 %v2888_v23, %s3384_s14  ;;  %1380 = vrot.lane.b32.xlu0 %v2872_v57, %s3384_s14  ;;  %v1724_v44 = vsel %vm1722_vm5, %v1691_v5, %v4243_v28  ;;  %v1707_v6 = vsel %vm1689_vm4, %v1674_v51, %v4237_v45  ;;  %v5266_v51 = vld [vmem:[#allocation35_spill] sm:$0xff] }
 0x169   : > { %v1757_v48 = vsel %vm1755_vm6, %v1724_v44, %v4255_v7  ;;  %v1740_v7 = vsel %vm1722_vm5, %v1707_v6, %v4249_v33  ;;  %v2920_v33 = vld [vmem:[%s3473_s7 + $0x142] sm:$0xff] }
 0x16a   : > { %v4321_v38 = vpop.permute.xlu1 %1114  ;;  %v4323_v26 = vpop.permute.xlu0 %1020  ;;  %v1790_v39 = vsel %vm1788_vm7, %v1757_v48, %v1369_v35  ;;  %v1773_v35 = vsel %vm1755_vm6, %v1740_v7, %v4261_v58  ;;  %v5267_v7 = vld [vmem:[#allocation28_spill] sm:$0xff] }
 0x16b   : > { %v1887_v8 = vld [vmem:[#allocation2] sm:$0xff]  ;;  %v1806_v45 = vsel %vm1788_vm7, %v1773_v35, %v1401_v24  ;;  %v5268_v35 = vld [vmem:[#allocation32_spill] sm:$0xff] }
 0x16c   : > { %1538 = vrot.lane.b32.xlu1 %v5263_v2, %s3385_s24  ;;  %1506 = vrot.lane.b32.xlu0 %v2903_v9, %s3385_s24  ;;  %v5264_v2 = vld [vmem:[#allocation19_spill] sm:$0xff] }
 0x16d   : > { %3049 = vmatprep.mubr.msk.f32.mxu0 %vm1854_vm9, %v1887_v8  ;;  %v1593_v48 = vsel %vm1590_vm0, %v5265_v61, %v5264_v2  ;;  %v5270_v2 = vld [vmem:[#allocation24_spill] sm:$0xff]  ;;  %v2874_v61 = vld [vmem:[%s3473_s7 + $0x99] sm:$0xff] }
 0x16e   : > { %v1497_v28 = vpop.permute.xlu1 %1496  ;;  %v1147_v30 = vpop.permute.xlu0 %1146 }
 0x16f   : > { %v1823_v31 = vsel %vm1821_vm8, %v1790_v39, %v1497_v28  ;;  %v1903_v47 = vld [vmem:[#allocation2 + $0x80] sm:$0xff]  ;;  %v1626_v39 = vsel %vm1623_vm1, %v1593_v48, %v5266_v51  ;;  %v2873_v28 = vld [vmem:[%s3473_s7 + $0x91] sm:$0xff] }
 0x170   : > { %1856 = vst.msk [vmem:[#allocation2 + $0x8] sm:$0xff] %vm1854_vm9, %v1823_v31  ;;  %1032 = vrot.lane.b32.xlu1 %v2888_v23, %s3381_s11  ;;  %1000 = vrot.lane.b32.xlu0 %v2872_v57, %s3381_s11  ;;  %v2904_v23 = vld [vmem:[%s3473_s7 + $0x82] sm:$0xff] }
 0x171   : > { %3073 = vmatprep.mubr.msk.f32.mxu1 %vm1854_vm9, %v1903_v47 }
 0x172   : > { %v4356_v10 = vpop.permute.xlu1 %1116  ;;  %v1529_v36 = vpop.permute.xlu0 %1528 }
 0x173   : > { %v1839_v12 = vsel %vm1821_vm8, %v1806_v45, %v1529_v36  ;;  %v2889_v36 = vld [vmem:[%s3473_s7 + $0x151] sm:$0xff] }
 0x174   : > { %1872 = vst.msk [vmem:[#allocation2 + $0x88] sm:$0xff] %vm1854_vm9, %v1839_v12  ;;  %1158 = vrot.lane.b32.xlu1 %v2825_v52, %s3382_s12  ;;  %1126 = vrot.lane.b32.xlu0 %v2903_v9, %s3382_s12  ;;  %v1609_v52 = vsel %vm1590_vm0, %v5268_v35, %v5267_v7  ;;  %v5272_v7 = vld [vmem:[#allocation27_spill] sm:$0xff] }
 0x176   : > { %v1243_v57 = vpop.permute.xlu1 %1242  ;;  %v4364_v58 = vpop.permute.xlu0 %1148 }
 0x177   : > { %v1888_v56 = vld [vmem:[#allocation2 + $0x8] sm:$0xff] }
 0x178   : > { %1540 = vrot.lane.b32.xlu1 %v2920_v33, %s3385_s24  ;;  %1508 = vrot.lane.b32.xlu0 %v2904_v23, %s3385_s24 }
 0x179   : > { %3050 = vmatmul.mubr.msk.f32.vlgmr.msra.gmra.mxu0 %vm1854_vm9, %v1888_v56 }
 0x17a   : > { %v1245_v24 = vpop.permute.xlu1 %1244  ;;  %v1275_v5 = vpop.permute.xlu0 %1274 }
 0x17b   : > { %v1904_v8 = vld [vmem:[#allocation2 + $0x88] sm:$0xff] }
 0x17c   : > { %1160 = vrot.lane.b32.xlu1 %v2920_v33, %s3382_s12  ;;  %1128 = vrot.lane.b32.xlu0 %v2904_v23, %s3382_s12 }
 0x17d   : > { %3074 = vmatmul.mubr.msk.f32.vlgmr.msra.gmra.mxu1 %vm1854_vm9, %v1904_v8 }
 0x17e   : > { %v1371_v9 = vpop.permute.xlu1 %1370  ;;  %v4372_v59 = vpop.permute.xlu0 %1276 }
 0x180   : > { %1286 = vrot.lane.b32.xlu1 %v4085_v50, %s3383_s13  ;;  %1254 = vrot.lane.b32.xlu0 %v3795_v16, %s3383_s13  ;;  %v1659_v16 = vsel %vm1656_vm3, %v1626_v39, %v4139_v32  ;;  %v1642_v32 = vsel %vm1623_vm1, %v1609_v52, %v4016_v14 }
 0x181   : > { %v1692_v47 = vsel %vm1689_vm4, %v1659_v16, %v4269_v18  ;;  %v1675_v18 = vsel %vm1656_vm3, %v1642_v32, %v4203_v62  ;;  %v2905_v32 = vld [vmem:[%s3473_s7 + $0x92] sm:$0xff] }
 0x182   : > { %v4379_v63 = vpop.permute.xlu1 %990  ;;  %v1403_v44 = vpop.permute.xlu0 %1402 }
 0x184   : > { %1256 = vrot.lane.b32.xlu1 %v2842_v13, %s3383_s13  ;;  %906 = vrot.lane.b32.xlu0 %v4085_v50, %s3380_s10  ;;  %v1725_v50 = vsel %vm1722_vm5, %v1692_v47, %v4321_v38  ;;  %v1708_v38 = vsel %vm1689_vm4, %v1675_v18, %v4281_v1  ;;  %v5269_v13 = vld [vmem:[#allocation21_spill] sm:$0xff] }
 0x185   : > { %v1758_v45 = vsel %vm1755_vm6, %v1725_v50, %v1243_v57  ;;  %v1741_v8 = vsel %vm1722_vm5, %v1708_v38, %v1147_v30  ;;  %v1594_v30 = vsel %vm1590_vm0, %v5270_v2, %v5269_v13 }
 0x186   : > { %v1373_v6 = vpop.permute.xlu1 %1372  ;;  %v4392_v31 = vpop.permute.xlu0 %1022  ;;  %v1791_v12 = vsel %vm1788_vm7, %v1758_v45, %v1371_v9  ;;  %v1774_v14 = vsel %vm1755_vm6, %v1741_v8, %v1275_v5 }
 0x187   : > { %v1807_v62 = vsel %vm1788_vm7, %v1774_v14, %v1403_v44  ;;  %v2890_v44 = vld [vmem:[%s3473_s7 + $0x159] sm:$0xff] }
 0x188   : > { %1382 = vrot.lane.b32.xlu1 %v2873_v28, %s3384_s14  ;;  %1288 = vrot.lane.b32.xlu0 %v4082_v15, %s3383_s13  ;;  %v2906_v14 = vld [vmem:[%s3473_s7 + $0x9a] sm:$0xff] }
 0x18a   : > { %v1499_v33 = vpop.permute.xlu1 %1498  ;;  %v1405_v23 = vpop.permute.xlu0 %1404 }
 0x18b   : > { %v1824_v56 = vsel %vm1821_vm8, %v1791_v12, %v1499_v33 }
 0x18c   : > { %1857 = vst.msk [vmem:[#allocation2 + $0x10] sm:$0xff] %vm1854_vm9, %v1824_v56  ;;  %908 = vrot.lane.b32.xlu1 %v4082_v15, %s3380_s10  ;;  %1414 = vrot.lane.b32.xlu0 %v2889_v36, %s3384_s14  ;;  %v5271_v15 = vld [vmem:[#allocation34_spill] sm:$0xff] }
 0x18d   : > { %v1627_v5 = vsel %vm1623_vm1, %v1594_v30, %v5271_v15  ;;  %v2859_v30 = vld [vmem:[%s3473_s7 + $0x168] sm:$0xff] }
 0x18e   : > { %v4421_v57 = vpop.permute.xlu1 %992  ;;  %v1531_v1 = vpop.permute.xlu0 %1530  ;;  %v1660_v48 = vsel %vm1656_vm3, %v1627_v5, %v4137_v25  ;;  %v2843_v15 = vld [vmem:[%s3473_s7 + $0xa8] sm:$0xff] }
 0x18f   : > { %v1840_v9 = vsel %vm1821_vm8, %v1807_v62, %v1531_v1  ;;  %v1693_v16 = vsel %vm1689_vm4, %v1660_v48, %v4308_v34  ;;  %v2921_v34 = vld [vmem:[%s3473_s7 + $0x152] sm:$0xff]  ;;  %v1661_v48 = vsel %vm1656_vm3, %v3917_v54, %v4147_v60  ;;  %v1677_v54 = vsel %vm1656_vm3, %v4034_v29, %v4211_v3  ;;  %v2891_v29 = vld [vmem:[%s3473_s7 + $0x169] sm:$0xff] }
 0x190   : > { %1873 = vst.msk [vmem:[#allocation2 + $0x90] sm:$0xff] %vm1854_vm9, %v1840_v9  ;;  %1034 = vrot.lane.b32.xlu1 %v2889_v36, %s3381_s11  ;;  %1002 = vrot.lane.b32.xlu0 %v2873_v28, %s3381_s11  ;;  %v5273_v28 = vld [vmem:[#allocation31_spill] sm:$0xff]  ;;  %v1726_v52 = vsel %vm1722_vm5, %v1693_v16, %v4356_v10 }
 0x191   : > { %v1610_v35 = vsel %vm1590_vm0, %v5273_v28, %v5272_v7  ;;  %v1759_v50 = vsel %vm1755_vm6, %v1726_v52, %v1245_v24  ;;  %v1694_v7 = vsel %vm1689_vm4, %v1661_v48, %v4379_v63  ;;  %v2875_v52 = vld [vmem:[%s3473_s7 + $0xa9] sm:$0xff]  ;;  %v2924_v48 = vld [vmem:[%s3473_s7 + $0x172] sm:$0xff] }
 0x192   : > { %v4436_v51 = vpop.permute.xlu1 %1118  ;;  %v4438_v39 = vpop.permute.xlu0 %1024  ;;  %v1643_v25 = vsel %vm1623_vm1, %v1610_v35, %v4014_v43  ;;  %v1792_v36 = vsel %vm1788_vm7, %v1759_v50, %v1373_v6 }
 0x193   : > { %v1889_v47 = vld [vmem:[#allocation2 + $0x10] sm:$0xff]  ;;  %v1676_v45 = vsel %vm1656_vm3, %v1643_v25, %v4201_v17  ;;  %v1727_v28 = vsel %vm1722_vm5, %v1694_v7, %v4436_v51  ;;  %v1710_v51 = vsel %vm1689_vm4, %v1677_v54, %v4392_v31  ;;  %v2845_v54 = vld [vmem:[%s3473_s7 + $0xc0] sm:$0xff] }
 0x194   : > { %1416 = vrot.lane.b32.xlu1 %v2890_v44, %s3384_s14  ;;  %1384 = vrot.lane.b32.xlu0 %v2874_v61, %s3384_s14  ;;  %v1709_v12 = vsel %vm1689_vm4, %v1676_v45, %v4323_v26  ;;  %v2860_v25 = vld [vmem:[%s3473_s7 + $0x170] sm:$0xff] }
 0x195   : > { %3052 = vmatprep.mubr.msk.f32.mxu0 %vm1854_vm9, %v1889_v47  ;;  %v1742_v43 = vsel %vm1722_vm5, %v1709_v12, %v4364_v58 }
 0x196   : > { %v1501_v18 = vpop.permute.xlu1 %1500  ;;  %v1151_v10 = vpop.permute.xlu0 %1150  ;;  %v1775_v17 = vsel %vm1755_vm6, %v1742_v43, %v4372_v59 }
 0x197   : > { %v1825_v33 = vsel %vm1821_vm8, %v1792_v36, %v1501_v18  ;;  %v1905_v38 = vld [vmem:[#allocation2 + $0x90] sm:$0xff]  ;;  %v1808_v26 = vsel %vm1788_vm7, %v1775_v17, %v1405_v23  ;;  %v2922_v23 = vld [vmem:[%s3473_s7 + $0x15a] sm:$0xff] }
 0x198   : > { %1858 = vst.msk [vmem:[#allocation2 + $0x18] sm:$0xff] %vm1854_vm9, %v1825_v33  ;;  %1542 = vrot.lane.b32.xlu1 %v2921_v34, %s3385_s24  ;;  %1510 = vrot.lane.b32.xlu0 %v2905_v32, %s3385_s24 }
 0x199   : > { %3076 = vmatprep.mubr.msk.f32.mxu1 %vm1854_vm9, %v1905_v38 }
 0x19a   : > { %v4470_v24 = vpop.permute.xlu1 %1120  ;;  %v1533_v6 = vpop.permute.xlu0 %1532 }
 0x19b   : > { %v1841_v58 = vsel %vm1821_vm8, %v1808_v26, %v1533_v6 }
 0x19c   : > { %1874 = vst.msk [vmem:[#allocation2 + $0x98] sm:$0xff] %vm1854_vm9, %v1841_v58  ;;  %1036 = vrot.lane.b32.xlu1 %v2890_v44, %s3381_s11  ;;  %1004 = vrot.lane.b32.xlu0 %v2874_v61, %s3381_s11  ;;  %v2844_v61 = vld [vmem:[%s3473_s7 + $0xb0] sm:$0xff] }
 0x19e   : > { %v1247_v56 = vpop.permute.xlu1 %1246  ;;  %v4476_v8 = vpop.permute.xlu0 %1152 }
 0x19f   : > { %v1890_v59 = vld [vmem:[#allocation2 + $0x18] sm:$0xff]  ;;  %v1760_v35 = vsel %vm1755_vm6, %v1727_v28, %v1247_v56 }
 0x1a0   : > { %1162 = vrot.lane.b32.xlu1 %v2921_v34, %s3382_s12  ;;  %1130 = vrot.lane.b32.xlu0 %v2905_v32, %s3382_s12  ;;  %v1743_v32 = vsel %vm1722_vm5, %v1710_v51, %v1151_v10  ;;  %v1662_v10 = vsel %vm1656_vm3, %v3914_v22, %v4145_v40  ;;  %v2892_v22 = vld [vmem:[%s3473_s7 + $0x171] sm:$0xff]  ;;  %v1663_v51 = vsel %vm1656_vm3, %v3933_v55, %v4155_v42  ;;  %v2877_v42 = vld [vmem:[%s3473_s7 + $0xc1] sm:$0xff] }
 0x1a1   : > { %3053 = vmatmul.mubr.msk.f32.gmra.mxu0 %vm1854_vm9, %v1890_v59  ;;  %v1695_v38 = vsel %vm1689_vm4, %v1662_v10, %v4421_v57  ;;  %v2876_v40 = vld [vmem:[%s3473_s7 + $0xb1] sm:$0xff]  ;;  %v1678_v57 = vsel %vm1656_vm3, %v4030_v4, %v4209_v46 }
 0x1a2   : > { %v1249_v62 = vpop.permute.xlu1 %1248  ;;  %v1279_v1 = vpop.permute.xlu0 %1278  ;;  %v1728_v17 = vsel %vm1722_vm5, %v1695_v38, %v4470_v24  ;;  %v1711_v56 = vsel %vm1689_vm4, %v1678_v57, %v4438_v39  ;;  %v2923_v46 = vld [vmem:[%s3473_s7 + $0x16a] sm:$0xff]  ;;  %v1680_v57 = vsel %vm1656_vm3, %v4047_v37, %v4217_v41 }
 0x1a3   : > { %v1906_v9 = vld [vmem:[#allocation2 + $0x98] sm:$0xff]  ;;  %v1776_v45 = vsel %vm1755_vm6, %v1743_v32, %v1279_v1  ;;  %v1761_v26 = vsel %vm1755_vm6, %v1728_v17, %v1249_v62  ;;  %v2907_v62 = vld [vmem:[%s3473_s7 + $0xaa] sm:$0xff]  ;;  %v2893_v17 = vld [vmem:[%s3473_s7 + $0x181] sm:$0xff] }
 0x1a4   : > { %1544 = vrot.lane.b32.xlu1 %v2922_v23, %s3385_s24  ;;  %1512 = vrot.lane.b32.xlu0 %v2906_v14, %s3385_s24 }
 0x1a5   : > { %3077 = vmatmul.mubr.msk.f32.gmra.mxu1 %vm1854_vm9, %v1906_v9 }
 0x1a6   : > { %v1375_v13 = vpop.permute.xlu1 %1374  ;;  %v4486_v2 = vpop.permute.xlu0 %1280 }
 0x1a7   : > { %v1793_v60 = vsel %vm1788_vm7, %v1760_v35, %v1375_v13 }
 0x1a8   : > { %1164 = vrot.lane.b32.xlu1 %v2922_v23, %s3382_s12  ;;  %1132 = vrot.lane.b32.xlu0 %v2906_v14, %s3382_s12  ;;  %v1744_v14 = vsel %vm1722_vm5, %v1711_v56, %v4476_v8 }
 0x1a9   : > { %v1777_v4 = vsel %vm1755_vm6, %v1744_v14, %v4486_v2 }
 0x1aa   : > { %v4492_v5 = vpop.permute.xlu1 %994  ;;  %v1407_v44 = vpop.permute.xlu0 %1406 }
 0x1ab   : > { %v1809_v3 = vsel %vm1788_vm7, %v1776_v45, %v1407_v44 }
 0x1ac   : > { %1290 = vrot.lane.b32.xlu1 %v2859_v30, %s3383_s13  ;;  %1258 = vrot.lane.b32.xlu0 %v2843_v15, %s3383_s13 }
 0x1ae   : > { %v1377_v16 = vpop.permute.xlu1 %1376  ;;  %v4500_v47 = vpop.permute.xlu0 %1026 }
 0x1af   : > { %v1794_v6 = vsel %vm1788_vm7, %v1761_v26, %v1377_v16  ;;  %v2908_v16 = vld [vmem:[%s3473_s7 + $0xb2] sm:$0xff] }
 0x1b0   : > { %1260 = vrot.lane.b32.xlu1 %v2844_v61, %s3383_s13  ;;  %910 = vrot.lane.b32.xlu0 %v2859_v30, %s3380_s10 }
 0x1b2   : > { %v1503_v50 = vpop.permute.xlu1 %1502  ;;  %v1409_v63 = vpop.permute.xlu0 %1408 }
 0x1b3   : > { %v1826_v34 = vsel %vm1821_vm8, %v1793_v60, %v1503_v50  ;;  %v1810_v39 = vsel %vm1788_vm7, %v1777_v4, %v1409_v63  ;;  %v2846_v63 = vld [vmem:[%s3473_s7 + $0xc8] sm:$0xff] }
 0x1b4   : > { %1859 = vst.msk [vmem:[#allocation2 + $0x20] sm:$0xff] %vm1854_vm9, %v1826_v34  ;;  %1386 = vrot.lane.b32.xlu1 %v2875_v52, %s3384_s14  ;;  %1292 = vrot.lane.b32.xlu0 %v2860_v25, %s3383_s13  ;;  %v1679_v34 = vsel %vm1656_vm3, %v4050_v20, %v4219_v27  ;;  %v2862_v27 = vld [vmem:[%s3473_s7 + $0x188] sm:$0xff] }
 0x1b6   : > { %v4525_v36 = vpop.permute.xlu1 %996  ;;  %v1535_v18 = vpop.permute.xlu0 %1534 }
 0x1b7   : > { %v1842_v31 = vsel %vm1821_vm8, %v1809_v3, %v1535_v18  ;;  %v1712_v3 = vsel %vm1689_vm4, %v1679_v34, %v4500_v47  ;;  %v2847_v34 = vld [vmem:[%s3473_s7 + $0xd8] sm:$0xff] }
 0x1b8   : > { %1875 = vst.msk [vmem:[#allocation2 + $0xa0] sm:$0xff] %vm1854_vm9, %v1842_v31  ;;  %912 = vrot.lane.b32.xlu1 %v2860_v25, %s3380_s10  ;;  %1418 = vrot.lane.b32.xlu0 %v2891_v29, %s3384_s14  ;;  %v2861_v25 = vld [vmem:[%s3473_s7 + $0x180] sm:$0xff] }
 0x1ba   : > { %v4534_v12 = vpop.permute.xlu1 %1122  ;;  %v4536_v33 = vpop.permute.xlu0 %1028 }
 0x1bb   : > { %v1891_v43 = vld [vmem:[#allocation2 + $0x20] sm:$0xff]  ;;  %v1713_v56 = vsel %vm1689_vm4, %v1680_v57, %v4536_v33  ;;  %v2878_v33 = vld [vmem:[%s3473_s7 + $0xc9] sm:$0xff] }
 0x1bc   : > { %1038 = vrot.lane.b32.xlu1 %v2891_v29, %s3381_s11  ;;  %1006 = vrot.lane.b32.xlu0 %v2875_v52, %s3381_s11  ;;  %v1696_v29 = vsel %vm1689_vm4, %v1663_v51, %v4492_v5  ;;  %v2863_v51 = vld [vmem:[%s3473_s7 + $0x198] sm:$0xff] }
 0x1bd   : > { %3055 = vmatprep.mubr.msk.f32.mxu0 %vm1854_vm9, %v1891_v43  ;;  %v1729_v18 = vsel %vm1722_vm5, %v1696_v29, %v4534_v12  ;;  %v2864_v29 = vld [vmem:[%s3473_s7 + $0x1a0] sm:$0xff] }
 0x1be   : > { %v1505_v58 = vpop.permute.xlu1 %1504  ;;  %v1155_v24 = vpop.permute.xlu0 %1154 }
 0x1bf   : > { %v1827_v59 = vsel %vm1821_vm8, %v1794_v6, %v1505_v58  ;;  %v1907_v23 = vld [vmem:[#allocation2 + $0xa0] sm:$0xff]  ;;  %v1745_v31 = vsel %vm1722_vm5, %v1712_v3, %v1155_v24 }
 0x1c0   : > { %1860 = vst.msk [vmem:[#allocation2 + $0x28] sm:$0xff] %vm1854_vm9, %v1827_v59  ;;  %1420 = vrot.lane.b32.xlu1 %v2892_v22, %s3384_s14  ;;  %1388 = vrot.lane.b32.xlu0 %v2876_v40, %s3384_s14  ;;  %v2848_v3 = vld [vmem:[%s3473_s7 + $0xe0] sm:$0xff] }
 0x1c1   : > { %3079 = vmatprep.mubr.msk.f32.mxu1 %vm1854_vm9, %v1907_v23 }
 0x1c2   : > { %v4566_v1 = vpop.permute.xlu1 %1124  ;;  %v1537_v9 = vpop.permute.xlu0 %1536 }
 0x1c3   : > { %v1843_v8 = vsel %vm1821_vm8, %v1810_v39, %v1537_v9  ;;  %v2925_v9 = vld [vmem:[%s3473_s7 + $0x182] sm:$0xff] }
 0x1c4   : > { %1876 = vst.msk [vmem:[#allocation2 + $0xa8] sm:$0xff] %vm1854_vm9, %v1843_v8  ;;  %1546 = vrot.lane.b32.xlu1 %v2923_v46, %s3385_s24  ;;  %1514 = vrot.lane.b32.xlu0 %v2907_v62, %s3385_s24  ;;  %v2909_v8 = vld [vmem:[%s3473_s7 + $0xc2] sm:$0xff] }
 0x1c6   : > { %v1251_v13 = vpop.permute.xlu1 %1250  ;;  %v4572_v2 = vpop.permute.xlu0 %1156 }
 0x1c7   : > { %v1892_v30 = vld [vmem:[#allocation2 + $0x28] sm:$0xff]  ;;  %v1762_v55 = vsel %vm1755_vm6, %v1729_v18, %v1251_v13  ;;  %v1665_v18 = vsel %vm1656_vm3, %v3949_v19, %v4163_v11  ;;  %v2879_v11 = vld [vmem:[%s3473_s7 + $0xd9] sm:$0xff] }
 0x1c8   : > { %1040 = vrot.lane.b32.xlu1 %v2892_v22, %s3381_s11  ;;  %1008 = vrot.lane.b32.xlu0 %v2876_v40, %s3381_s11  ;;  %v1664_v40 = vsel %vm1656_vm3, %v3930_v0, %v4153_v53  ;;  %v1746_v53 = vsel %vm1722_vm5, %v1713_v56, %v4572_v2  ;;  %v5274_v56 = vld [vmem:[#allocation8_spill] sm:$0xff] }
 0x1c9   : > { %3056 = vmatmul.mubr.msk.f32.gmra.mxu0 %vm1854_vm9, %v1892_v30  ;;  %v1697_v24 = vsel %vm1689_vm4, %v1664_v40, %v4525_v36  ;;  %v2894_v36 = vld [vmem:[%s3473_s7 + $0x189] sm:$0xff]  ;;  %v2880_v40 = vld [vmem:[%s3473_s7 + $0xe1] sm:$0xff] }
 0x1ca   : > { %v4577_v15 = vpop.permute.xlu1 %1252  ;;  %v1283_v44 = vpop.permute.xlu0 %1282  ;;  %v1730_v0 = vsel %vm1722_vm5, %v1697_v24, %v4566_v1  ;;  %v2911_v24 = vld [vmem:[%s3473_s7 + $0xda] sm:$0xff] }
 0x1cb   : > { %v1908_v61 = vld [vmem:[#allocation2 + $0xa8] sm:$0xff]  ;;  %v1778_v20 = vsel %vm1755_vm6, %v1745_v31, %v1283_v44  ;;  %v1763_v37 = vsel %vm1755_vm6, %v1730_v0, %v4577_v15  ;;  %v1681_v31 = vsel %vm1656_vm3, %v4069_v21, %v4225_v49  ;;  %v2895_v49 = vld [vmem:[%s3473_s7 + $0x199] sm:$0xff] }
 0x1cc   : > { %1166 = vrot.lane.b32.xlu1 %v2923_v46, %s3382_s12  ;;  %1134 = vrot.lane.b32.xlu0 %v2907_v62, %s3382_s12  ;;  %v5276_v0 = vld [vmem:[#allocation43_spill] sm:$0xff] }
 0x1cd   : > { %3080 = vmatmul.mubr.msk.f32.gmra.mxu1 %vm1854_vm9, %v1908_v61 }
 0x1ce   : > { %v1379_v7 = vpop.permute.xlu1 %1378  ;;  %v1285_v28 = vpop.permute.xlu0 %1284 }
 0x1cf   : > { %v1795_v5 = vsel %vm1788_vm7, %v1762_v55, %v1379_v7  ;;  %v1779_v41 = vsel %vm1755_vm6, %v1746_v53, %v1285_v28  ;;  %v2926_v7 = vld [vmem:[%s3473_s7 + $0x18a] sm:$0xff] }
 0x1d0   : > { %1548 = vrot.lane.b32.xlu1 %v2924_v48, %s3385_s24  ;;  %1516 = vrot.lane.b32.xlu0 %v2908_v16, %s3385_s24  ;;  %v2910_v28 = vld [vmem:[%s3473_s7 + $0xca] sm:$0xff] }
 0x1d2   : > { %v4586_v35 = vpop.permute.xlu1 %904  ;;  %v1411_v52 = vpop.permute.xlu0 %1410 }
 0x1d3   : > { %v1811_v47 = vsel %vm1788_vm7, %v1778_v20, %v1411_v52  ;;  %v1682_v53 = vsel %vm1656_vm3, %v5276_v0, %v4586_v35  ;;  %v5281_v0 = vld [vmem:[#allocation37_spill] sm:$0xff] }
 0x1d4   : > { %1168 = vrot.lane.b32.xlu1 %v2924_v48, %s3382_s12  ;;  %1136 = vrot.lane.b32.xlu0 %v2908_v16, %s3382_s12 }
 0x1d6   : > { %v4592_v60 = vpop.permute.xlu1 %1030  ;;  %v4594_v50 = vpop.permute.xlu0 %998 }
 0x1d8   : > { %1294 = vrot.lane.b32.xlu1 %v2861_v25, %s3383_s13  ;;  %1262 = vrot.lane.b32.xlu0 %v2845_v54, %s3383_s13 }
 0x1da   : > { %v1413_v32 = vpop.permute.xlu1 %1412  ;;  %v1381_v45 = vpop.permute.xlu0 %1380 }
 0x1db   : > { %v1812_v14 = vsel %vm1788_vm7, %v1779_v41, %v1413_v32  ;;  %v1796_v4 = vsel %vm1788_vm7, %v1763_v37, %v1381_v45 }
 0x1dc   : > { %1264 = vrot.lane.b32.xlu1 %v2846_v63, %s3383_s13  ;;  %914 = vrot.lane.b32.xlu0 %v2861_v25, %s3380_s10 }
 0x1de   : > { %v1539_v10 = vpop.permute.xlu1 %1538  ;;  %v1507_v38 = vpop.permute.xlu0 %1506 }
 0x1df   : > { %v1844_v12 = vsel %vm1821_vm8, %v1811_v47, %v1539_v10  ;;  %v1828_v43 = vsel %vm1821_vm8, %v1795_v5, %v1507_v38 }
 0x1e0   : > { %1877 = vst.msk [vmem:[#allocation2 + $0xb0] sm:$0xff] %vm1854_vm9, %v1844_v12  ;;  %1861 = vst.msk [vmem:[#allocation2 + $0x30] sm:$0xff] %vm1854_vm9, %v1828_v43  ;;  %1390 = vrot.lane.b32.xlu1 %v2877_v42, %s3384_s14  ;;  %1296 = vrot.lane.b32.xlu0 %v2862_v27, %s3383_s13 }
 0x1e2   : > { %v4627_v26 = vpop.permute.xlu1 %1032  ;;  %v4629_v22 = vpop.permute.xlu0 %1000 }
 0x1e4   : > { %916 = vrot.lane.b32.xlu1 %v2862_v27, %s3380_s10  ;;  %1422 = vrot.lane.b32.xlu0 %v2893_v17, %s3384_s14  ;;  %v1698_v27 = vsel %vm1689_vm4, %v1665_v18, %v4594_v50 }
 0x1e6   : > { %v4639_v6 = vpop.permute.xlu1 %1158  ;;  %v4641_v58 = vpop.permute.xlu0 %1126 }
 0x1e7   : > { %v1893_v59 = vld [vmem:[#allocation2 + $0x30] sm:$0xff]  ;;  %v1731_v47 = vsel %vm1722_vm5, %v1698_v27, %v4641_v58  ;;  %v2927_v58 = vld [vmem:[%s3473_s7 + $0x19a] sm:$0xff] }
 0x1e8   : > { %v1909_v23 = vld [vmem:[#allocation2 + $0xb0] sm:$0xff]  ;;  %1042 = vrot.lane.b32.xlu1 %v2893_v17, %s3381_s11  ;;  %1010 = vrot.lane.b32.xlu0 %v2877_v42, %s3381_s11  ;;  %v1714_v42 = vsel %vm1689_vm4, %v1681_v31, %v4592_v60  ;;  %v2896_v17 = vld [vmem:[%s3473_s7 + $0x1a1] sm:$0xff] }
 0x1e9   : > { %3058 = vmatprep.mubr.msk.f32.mxu0 %vm1854_vm9, %v1893_v59  ;;  %3082 = vmatprep.mubr.msk.f32.mxu1 %vm1854_vm9, %v1909_v23  ;;  %v1747_v5 = vsel %vm1722_vm5, %v1714_v42, %v4639_v6  ;;  %v5275_v59 = vld [vmem:[#allocation36_spill] sm:$0xff]  ;;  %v5277_v31 = vld [vmem:[#allocation50_spill] sm:$0xff]  ;;  %v5279_v42 = vld [vmem:[#allocation45_spill] sm:$0xff] }
 0x1ea   : > { %v1541_v46 = vpop.permute.xlu1 %1540  ;;  %v1509_v62 = vpop.permute.xlu0 %1508  ;;  %v1666_v23 = vsel %vm1656_vm3, %v5275_v59, %v5274_v56 }
 0x1eb   : > { %v1845_v39 = vsel %vm1821_vm8, %v1812_v14, %v1541_v46  ;;  %v1829_v1 = vsel %vm1821_vm8, %v1796_v4, %v1509_v62 }
 0x1ec   : > { %1878 = vst.msk [vmem:[#allocation2 + $0xb8] sm:$0xff] %vm1854_vm9, %v1845_v39  ;;  %1862 = vst.msk [vmem:[#allocation2 + $0x38] sm:$0xff] %vm1854_vm9, %v1829_v1  ;;  %1424 = vrot.lane.b32.xlu1 %v2894_v36, %s3384_s14  ;;  %1392 = vrot.lane.b32.xlu0 %v2878_v33, %s3384_s14  ;;  %v2912_v39 = vld [vmem:[%s3473_s7 + $0xe2] sm:$0xff] }
 0x1ee   : > { %v4670_v13 = vpop.permute.xlu1 %1160  ;;  %v4672_v2 = vpop.permute.xlu0 %1128 }
 0x1f0   : > { %1550 = vrot.lane.b32.xlu1 %v2925_v9, %s3385_s24  ;;  %1518 = vrot.lane.b32.xlu0 %v2909_v8, %s3385_s24 }
 0x1f2   : > { %v1287_v30 = vpop.permute.xlu1 %1286  ;;  %v1255_v15 = vpop.permute.xlu0 %1254 }
 0x1f3   : > { %v1894_v44 = vld [vmem:[#allocation2 + $0x38] sm:$0xff]  ;;  %v1780_v19 = vsel %vm1755_vm6, %v1747_v5, %v1287_v30  ;;  %v1764_v21 = vsel %vm1755_vm6, %v1731_v47, %v1255_v15 }
 0x1f4   : > { %v1910_v61 = vld [vmem:[#allocation2 + $0xb8] sm:$0xff]  ;;  %1044 = vrot.lane.b32.xlu1 %v2894_v36, %s3381_s11  ;;  %1012 = vrot.lane.b32.xlu0 %v2878_v33, %s3381_s11  ;;  %v1715_v36 = vsel %vm1689_vm4, %v1682_v53, %v4627_v26  ;;  %v1699_v33 = vsel %vm1689_vm4, %v1666_v23, %v4629_v22  ;;  %v2928_v22 = vld [vmem:[%s3473_s7 + $0x1a2] sm:$0xff]  ;;  %s3306_s7 = scalar_lea.vmem %s3305_s22, 8192 }
 0x1f5   : > { %3059 = vmatmul.mubr.msk.f32.gmra.mxu0 %vm1854_vm9, %v1894_v44  ;;  %3083 = vmatmul.mubr.msk.f32.gmra.mxu1 %vm1854_vm9, %v1910_v61  ;;  %v1748_v46 = vsel %vm1722_vm5, %v1715_v36, %v4670_v13  ;;  %v1732_v62 = vsel %vm1722_vm5, %v1699_v33, %v4672_v2  ;;  %v5280_v23 = vld [vmem:[#allocation15_spill] sm:$0xff] }
 0x1f6   : > { %v4680_v48 = vpop.permute.xlu1 %1256  ;;  %v4682_v16 = vpop.permute.xlu0 %906  ;;  %v1668_v53 = vsel %vm1656_vm3, %v5281_v0, %v5280_v23  ;;  %v5283_v0 = vld [vmem:[#allocation51_spill] sm:$0xff] }
 0x1f7   : > { %v1765_v35 = vsel %vm1755_vm6, %v1732_v62, %v4680_v48  ;;  %v1683_v27 = vsel %vm1656_vm3, %v5279_v42, %v4682_v16 }
 0x1f8   : > { %1170 = vrot.lane.b32.xlu1 %v2925_v9, %s3382_s12  ;;  %1138 = vrot.lane.b32.xlu0 %v2909_v8, %s3382_s12 }
 0x1fa   : > { %v1383_v52 = vpop.permute.xlu1 %1382  ;;  %v1289_v25 = vpop.permute.xlu0 %1288 }
 0x1fb   : > { %v1797_v60 = vsel %vm1788_vm7, %v1764_v21, %v1383_v52  ;;  %v1781_v26 = vsel %vm1755_vm6, %v1748_v46, %v1289_v25 }
 0x1fc   : > { %1552 = vrot.lane.b32.xlu1 %v2926_v7, %s3385_s24  ;;  %1520 = vrot.lane.b32.xlu0 %v2910_v28, %s3385_s24 }
 0x1fe   : > { %v4690_v54 = vpop.permute.xlu1 %908  ;;  %v1415_v63 = vpop.permute.xlu0 %1414 }
 0x1ff   : > { %v1813_v50 = vsel %vm1788_vm7, %v1780_v19, %v1415_v63 }
 0x200   : > { %1172 = vrot.lane.b32.xlu1 %v2926_v7, %s3382_s12  ;;  %1140 = vrot.lane.b32.xlu0 %v2910_v28, %s3382_s12 }
 0x202   : > { %v4696_v32 = vpop.permute.xlu1 %1034  ;;  %v4698_v45 = vpop.permute.xlu0 %1002 }
 0x203   : > { %v1716_v19 = vsel %vm1689_vm4, %v1683_v27, %v4696_v32 }
 0x204   : > { %1298 = vrot.lane.b32.xlu1 %v2863_v51, %s3383_s13  ;;  %1266 = vrot.lane.b32.xlu0 %v2847_v34, %s3383_s13 }
 0x206   : > { %v1417_v55 = vpop.permute.xlu1 %1416  ;;  %v1385_v20 = vpop.permute.xlu0 %1384 }
 0x207   : > { %v1814_v1 = vsel %vm1788_vm7, %v1781_v26, %v1417_v55  ;;  %v1798_v9 = vsel %vm1788_vm7, %v1765_v35, %v1385_v20  ;;  %v5278_v55 = vld [vmem:[#allocation38_spill] sm:$0xff] }
 0x208   : > { %1300 = vrot.lane.b32.xlu1 %v2864_v29, %s3383_s13  ;;  %1268 = vrot.lane.b32.xlu0 %v2848_v3, %s3383_s13  ;;  %v1667_v20 = vsel %vm1656_vm3, %v5278_v55, %v5277_v31  ;;  %s246_s13 = sand.u32 1, %s3360_s16  }
 0x209   : > { %v1700_v21 = vsel %vm1689_vm4, %v1667_v20, %v4698_v45  ;;  %v4804_v45 = vld [vmem:[%s5157_s2] ss:$0 sm:$0xff]  ;;  %s5109_s18 = scalar_lea.sflag [#allocation4], %s246_s13 }
 0x20a   : > { %v1543_v10 = vpop.permute.xlu1 %1542  ;;  %v1511_v38 = vpop.permute.xlu0 %1510 }
 0x20b   : > { %v1846_v12 = vsel %vm1821_vm8, %v1813_v50, %v1543_v10  ;;  %v1830_v43 = vsel %vm1821_vm8, %v1797_v60, %v1511_v38 }
 0x20c   : > { %1879 = vst.msk [vmem:[#allocation2 + $0xc0] sm:$0xff] %vm1854_vm9, %v1846_v12  ;;  %1863 = vst.msk [vmem:[#allocation2 + $0x40] sm:$0xff] %vm1854_vm9, %v1830_v43  ;;  %1426 = vrot.lane.b32.xlu1 %v2895_v49, %s3384_s14  ;;  %1394 = vrot.lane.b32.xlu0 %v2879_v11, %s3384_s14 }
 0x20e   : > { %v4734_v57 = vpop.permute.xlu1 %1036  ;;  %v4736_v6 = vpop.permute.xlu0 %1004 }
 0x210   : > { %1428 = vrot.lane.b32.xlu1 %v2896_v17, %s3384_s14  ;;  %1396 = vrot.lane.b32.xlu0 %v2880_v40, %s3384_s14  ;;  %v4811_v40 = vld [vmem:[%s5158_s3] ss:$0 sm:$0xff]  ;;  %s2735_s14 = sshll.u32 %s246_s13, 8 }
 0x212   : > { %v1163_v37 = vpop.permute.xlu1 %1162  ;;  %v1131_v41 = vpop.permute.xlu0 %1130 }
 0x213   : > { %v1895_v14 = vld [vmem:[#allocation2 + $0x40] sm:$0xff]  ;;  %v1749_v49 = vsel %vm1722_vm5, %v1716_v19, %v1163_v37  ;;  %v1733_v11 = vsel %vm1722_vm5, %v1700_v21, %v1131_v41  ;;  %v5282_v37 = vld [vmem:[#allocation44_spill] sm:$0xff] }
 0x214   : > { %v1911_v4 = vld [vmem:[#allocation2 + $0xc0] sm:$0xff]  ;;  %1554 = vrot.lane.b32.xlu1 %v2927_v58, %s3385_s24  ;;  %1522 = vrot.lane.b32.xlu0 %v2911_v24, %s3385_s24  ;;  %v1684_v41 = vsel %vm1656_vm3, %v5282_v37, %v4690_v54 }
 0x215   : > { %3061 = vmatprep.mubr.msk.f32.mxu0 %vm1854_vm9, %v1895_v14  ;;  %3085 = vmatprep.mubr.msk.f32.mxu1 %vm1854_vm9, %v1911_v4  ;;  %v1717_v14 = vsel %vm1689_vm4, %v1684_v41, %v4734_v57  ;;  %v1701_v4 = vsel %vm1689_vm4, %v1668_v53, %v4736_v6  ;;  %v5284_v53 = vld [vmem:[#allocation40_spill] sm:$0xff]  ;;  %v5285_v41 = vld [vmem:[#allocation47_spill] sm:$0xff] }
 0x216   : > { %v1545_v8 = vpop.permute.xlu1 %1544  ;;  %v1513_v13 = vpop.permute.xlu0 %1512  ;;  %v1669_v37 = vsel %vm1656_vm3, %v5284_v53, %v5283_v0 }
 0x217   : > { %v1847_v2 = vsel %vm1821_vm8, %v1814_v1, %v1545_v8  ;;  %v1831_v30 = vsel %vm1821_vm8, %v1798_v9, %v1513_v13 }
 0x218   : > { %1880 = vst.msk [vmem:[#allocation2 + $0xc8] sm:$0xff] %vm1854_vm9, %v1847_v2  ;;  %1864 = vst.msk [vmem:[#allocation2 + $0x48] sm:$0xff] %vm1854_vm9, %v1831_v30  ;;  %1556 = vrot.lane.b32.xlu1 %v2928_v22, %s3385_s24  ;;  %1524 = vrot.lane.b32.xlu0 %v2912_v39, %s3385_s24  ;;  %s4899_s24 = scalar_lea.vmem [#allocation3], %s2735_s14 }
 0x219   : > { %s2601_s29 = sshll.u32 %s4899_s24, 4  ;;  %s5103_s29 = int_to_ptr.vmem [resolvable:$true] %s2601_s29 }
 0x21a   : > { %v1165_v15 = vpop.permute.xlu1 %1164  ;;  %v1133_v44 = vpop.permute.xlu0 %1132  ;;  %s3300_s8 = scalar_lea.vmem %s5103_s29, 4096  ;;  %p3307_p1 = scmp.lt.s32.totalorder %s5103_s29, %s3305_s22 }
 0x21b   : > { %v1750_v62 = vsel %vm1722_vm5, %v1717_v14, %v1165_v15  ;;  %v1734_v1 = vsel %vm1722_vm5, %v1701_v4, %v1133_v44  ;;  %p3301_p12 = scmp.ne.s32.totalorder %s5103_s29, %s3300_s8  ;;  %p3308_p2 = scmp.lt.s32.totalorder %s3306_s7, %s3300_s8 }
 0x21d   : > { %p3302_p13 = pnand %p3301_p12, %p3453_p4  ;;  %p3309_p3 = por %p3308_p2, %p3307_p1 }
 0x21e   : > { %v1291_v61 = vpop.permute.xlu1 %1290  ;;  %v1259_v48 = vpop.permute.xlu0 %1258 }
 0x21f   : > { %v1896_v7 = vld [vmem:[#allocation2 + $0x48] sm:$0xff]  ;;  %v1782_v60 = vsel %vm1755_vm6, %v1749_v49, %v1291_v61  ;;  %v1766_v50 = vsel %vm1755_vm6, %v1733_v11, %v1259_v48  ;;  %p3303_p0 = pneg %p3302_p13 }
 0x220   : > { %v1912_v28 = vld [vmem:[#allocation2 + $0xc8] sm:$0xff]  ;;  %3062 = vmatmul.mubr.msk.f32.gmra.mxu0 %vm1854_vm9, %v1896_v7 }
 0x221   : > { %3086 = vmatmul.mubr.msk.f32.gmra.mxu1 %vm1854_vm9, %v1912_v28  ;;  %p3310_p5 = pnand %p3309_p3, %p3303_p0 }
 0x222   : > { %v1261_v52 = vpop.permute.xlu1 %1260  ;;  %v4775_v25 = vpop.permute.xlu0 %910 }
 0x223   : > { %v1767_v15 = vsel %vm1755_vm6, %v1734_v1, %v1261_v52 }
 0x226   : > { %v1387_v63 = vpop.permute.xlu1 %1386  ;;  %v1293_v51 = vpop.permute.xlu0 %1292 }
 0x227   : > { %v1799_v10 = vsel %vm1788_vm7, %v1766_v50, %v1387_v63  ;;  %v1783_v57 = vsel %vm1755_vm6, %v1750_v62, %v1293_v51 }
 0x22a   : > { %v4777_v34 = vpop.permute.xlu1 %912  ;;  %v1419_v29 = vpop.permute.xlu0 %1418 }
 0x22b   : > { %v1815_v16 = vsel %vm1788_vm7, %v1782_v60, %v1419_v29 }
 0x22e   : > { %v4779_v3 = vpop.permute.xlu1 %1038  ;;  %v4781_v18 = vpop.permute.xlu0 %1006 }
 0x232   : > { %v1421_v5 = vpop.permute.xlu1 %1420  ;;  %v1389_v47 = vpop.permute.xlu0 %1388 }
 0x233   : > { %v1816_v44 = vsel %vm1788_vm7, %v1783_v57, %v1421_v5  ;;  %v1800_v61 = vsel %vm1788_vm7, %v1767_v15, %v1389_v47 }
 0x236   : > { %v1547_v38 = vpop.permute.xlu1 %1546  ;;  %v1515_v12 = vpop.permute.xlu0 %1514 }
 0x237   : > { %v1848_v43 = vsel %vm1821_vm8, %v1815_v16, %v1547_v38  ;;  %v1832_v32 = vsel %vm1821_vm8, %v1799_v10, %v1515_v12 }
 0x238   : > { %1881 = vst.msk [vmem:[#allocation2 + $0xd0] sm:$0xff] %vm1854_vm9, %v1848_v43  ;;  %1865 = vst.msk [vmem:[#allocation2 + $0x50] sm:$0xff] %vm1854_vm9, %v1832_v32 }
 0x239   : > { %v3051_v17 = vpop.f32.mrf.mxu0 }
 0x23a   : > { %v2258_v58 = vmul.f32 %v3051_v17, %v4804_v45  ;;  %v4814_v24 = vpop.permute.xlu1 %1040  ;;  %v4816_v56 = vpop.permute.xlu0 %1008 }
 0x23b   : > { %v2091_v59 = vpop.f32.mrf.mxu0 }
 0x23c   : > { %v4825_v36 = vadd.f32 %v4811_v40, %v2258_v58  ;;  %v2257_v33 = vmul.f32 %v4804_v45, %v2091_v59 }
 0x23d   : > { %v3075_v46 = vpop.f32.mrf.mxu1 }
 0x23e   : > { %v2965_v35 = vmul.f32 -1.442695, %v4825_v36  ;;  %v4835_v26 = vadd.f32 %v4811_v40, %v2257_v33  ;;  %v2274_v54 = vmul.f32 %v3075_v46, %v4804_v45  ;;  %v4838_v22 = vpop.permute.xlu1 %1166  ;;  %v4840_v39 = vpop.permute.xlu0 %1134  ;;  %v1685_v33 = vsel %vm1656_vm3, %v5285_v41, %v4775_v25 }
 0x23f   : > { %v2171_v9 = vpop.f32.mrf.mxu1  ;;  %v1897_v6 = vld [vmem:[#allocation2 + $0x50] sm:$0xff] }
 0x240   : > { %v1913_v8 = vld [vmem:[#allocation2 + $0xd0] sm:$0xff]  ;;  %3172 = vpow2.f32 %v2965_v35  ;;  %v2964_v13 = vmul.f32 -1.442695, %v4835_v26  ;;  %v4846_v2 = vadd.f32 %v4811_v40, %v2274_v54  ;;  %v2273_v30 = vmul.f32 %v4804_v45, %v2171_v9  ;;  %3064 = vmatprep.mubr.msk.f32.mxu0 %vm1854_vm9, %v1897_v6 }
 0x241   : > { %3088 = vmatprep.mubr.msk.f32.mxu1 %vm1854_vm9, %v1913_v8  ;;  %v1718_v35 = vsel %vm1689_vm4, %v1685_v33, %v4779_v3  ;;  %v1702_v54 = vsel %vm1689_vm4, %v1669_v37, %v4781_v18 }
 0x242   : > { %3174 = vpow2.f32 %v2964_v13  ;;  %v2981_v48 = vmul.f32 -1.442695, %v4846_v2  ;;  %v4856_v7 = vadd.f32 %v4811_v40, %v2273_v30  ;;  %v1549_v28 = vpop.permute.xlu1 %1548  ;;  %v1517_v63 = vpop.permute.xlu0 %1516  ;;  %v1735_v1 = vsel %vm1722_vm5, %v1702_v54, %v4840_v39 }
 0x243   : > { %v1849_v51 = vsel %vm1821_vm8, %v1816_v44, %v1549_v28  ;;  %v1833_v29 = vsel %vm1821_vm8, %v1800_v61, %v1517_v63 }
 0x244   : > { %3176 = vpow2.f32 %v2981_v48  ;;  %v2980_v31 = vmul.f32 -1.442695, %v4856_v7  ;;  %1882 = vst.msk [vmem:[#allocation2 + $0xd8] sm:$0xff] %vm1854_vm9, %v1849_v51  ;;  %1866 = vst.msk [vmem:[#allocation2 + $0x58] sm:$0xff] %vm1854_vm9, %v1833_v29 }
 0x246   : > { %3178 = vpow2.f32 %v2980_v31  ;;  %v4863_v52 = vpop.permute.xlu1 %1168  ;;  %v4865_v55 = vpop.permute.xlu0 %1136 }
 0x24a   : > { %v1295_v20 = vpop.permute.xlu1 %1294  ;;  %v1263_v42 = vpop.permute.xlu0 %1262 }
 0x24b   : > { %v1898_v27 = vld [vmem:[#allocation2 + $0x58] sm:$0xff]  ;;  %v1768_v9 = vsel %vm1755_vm6, %v1735_v1, %v1263_v42 }
 0x24c   : > { %v1914_v5 = vld [vmem:[#allocation2 + $0xd8] sm:$0xff]  ;;  %3065 = vmatmul.mubr.msk.f32.gmra.mxu0 %vm1854_vm9, %v1898_v27 }
 0x24d   : > { %3089 = vmatmul.mubr.msk.f32.gmra.mxu1 %vm1854_vm9, %v1914_v5  ;;  %v3173_v47 = vpop.eup %3172 }
 0x24e   : > { %v2425_v19 = vadd.f32 1.0, %v3173_v47  ;;  %v4869_v21 = vpop.permute.xlu1 %1264  ;;  %v4871_v49 = vpop.permute.xlu0 %914 }
 0x24f   : > { %v3175_v11 = vpop.eup %3174 }
 0x250   : > { %3180 = vrcp.f32 %v2425_v19  ;;  %v2424_v60 = vadd.f32 1.0, %v3175_v11  ;;  %v5286_v19 = vld [vmem:[#allocation11_spill] sm:$0xff] }
 0x251   : > { %v3177_v50 = vpop.eup %3176  ;;  %v5287_v11 = vld [vmem:[#allocation39_spill] sm:$0xff] }
 0x252   : > { %3182 = vrcp.f32 %v2424_v60  ;;  %v2441_v10 = vadd.f32 1.0, %v3177_v50  ;;  %v1391_v16 = vpop.permute.xlu1 %1390  ;;  %v4873_v38 = vpop.permute.xlu0 %1296  ;;  %v1670_v60 = vsel %vm1656_vm3, %v5287_v11, %v5286_v19  ;;  %v5288_v50 = vld [vmem:[#allocation46_spill] sm:$0xff] }
 0x253   : > { %v3179_v12 = vpop.eup %3178  ;;  %v1801_v8 = vsel %vm1788_vm7, %v1768_v9, %v1391_v16  ;;  %v1703_v0 = vsel %vm1689_vm4, %v1670_v60, %v4816_v56  ;;  %v5292_v11 = vld [vmem:[#allocation14_spill] sm:$0xff]  ;;  %v5293_v60 = vld [vmem:[#allocation41_spill] sm:$0xff] }
 0x254   : > { %3184 = vrcp.f32 %v2441_v10  ;;  %v2440_v43 = vadd.f32 1.0, %v3179_v12  ;;  %v1686_v10 = vsel %vm1656_vm3, %v5288_v50, %v4777_v34  ;;  %v1736_v34 = vsel %vm1722_vm5, %v1703_v0, %v4865_v55 }
 0x255   : > { %v1672_v50 = vsel %vm1656_vm3, %v5293_v60, %v5292_v11 }
 0x256   : > { %3186 = vrcp.f32 %v2440_v43  ;;  %v4875_v32 = vpop.permute.xlu1 %916  ;;  %v1423_v17 = vpop.permute.xlu0 %1422 }
 0x25a   : > { %v4880_v58 = vpop.permute.xlu1 %1042  ;;  %v4882_v59 = vpop.permute.xlu0 %1010 }
 0x25d   : > { %v3181_v23 = vpop.eup %3180 }
 0x25e   : > { %v2521_v14 = vmul.f32 %v3181_v23, %v4825_v36  ;;  %v4891_v4 = vpop.permute.xlu1 %1424  ;;  %v4893_v46 = vpop.permute.xlu0 %1392  ;;  %v1751_v36 = vsel %vm1722_vm5, %v1718_v35, %v4838_v22  ;;  %v1719_v23 = vsel %vm1689_vm4, %v1686_v10, %v4814_v24  ;;  %v1769_v24 = vsel %vm1755_vm6, %v1736_v34, %v4869_v21 }
 0x25f   : > { %v3183_v62 = vpop.eup %3182  ;;  %v1784_v3 = vsel %vm1755_vm6, %v1751_v36, %v1295_v20  ;;  %v1752_v41 = vsel %vm1722_vm5, %v1719_v23, %v4863_v52  ;;  %v1802_v52 = vsel %vm1788_vm7, %v1769_v24, %v4893_v46 }
 0x260   : > { %2553 = vst [vmem:[%s4899_s24 + $0x8] sm:$0xff] %v2521_v14  ;;  %v2520_v25 = vmul.f32 %v3183_v62, %v4835_v26  ;;  %v1817_v26 = vsel %vm1788_vm7, %v1784_v3, %v1423_v17  ;;  %v1785_v56 = vsel %vm1755_vm6, %v1752_v41, %v4873_v38 }
 0x261   : > { %v3185_v57 = vpop.eup %3184  ;;  %v3054_v18 = vpop.f32.mrf.mxu0  ;;  %v1818_v14 = vsel %vm1788_vm7, %v1785_v56, %v4891_v4 }
 0x262   : > { %2552 = vst [vmem:[%s4899_s24] sm:$0xff] %v2520_v25  ;;  %v2537_v6 = vmul.f32 %v3185_v57, %v4846_v2  ;;  %v2260_v22 = vmul.f32 %v3054_v18, %v4804_v45  ;;  %v1551_v13 = vpop.permute.xlu1 %1550  ;;  %v1519_v30 = vpop.permute.xlu0 %1518 }
 0x263   : > { %v3187_v39 = vpop.eup %3186  ;;  %v1850_v15 = vsel %vm1821_vm8, %v1817_v26, %v1551_v13  ;;  %v1834_v44 = vsel %vm1821_vm8, %v1801_v8, %v1519_v30  ;;  %v2101_v61 = vpop.f32.mrf.mxu0 }
 0x264   : > { %2569 = vst [vmem:[%s4899_s24 + $0x88] sm:$0xff] %v2537_v6  ;;  %v2536_v48 = vmul.f32 %v3187_v39, %v4856_v7  ;;  %v4919_v2 = vadd.f32 %v4811_v40, %v2260_v22  ;;  %1883 = vst.msk [vmem:[#allocation2 + $0xe0] sm:$0xff] %vm1854_vm9, %v1850_v15  ;;  %v2259_v28 = vmul.f32 %v4804_v45, %v2101_v61  ;;  %v5289_v15 = vld [vmem:[#allocation52_spill] sm:$0xff] }
 0x265   : > { %1867 = vst.msk [vmem:[#allocation2 + $0x60] sm:$0xff] %vm1854_vm9, %v1834_v44  ;;  %v3078_v63 = vpop.f32.mrf.mxu1  ;;  %v5290_v44 = vld [vmem:[#allocation42_spill] sm:$0xff] }
 0x266   : > { %2568 = vst [vmem:[%s4899_s24 + $0x80] sm:$0xff] %v2536_v48  ;;  %v2967_v51 = vmul.f32 -1.442695, %v4919_v2  ;;  %v4927_v29 = vadd.f32 %v4811_v40, %v2259_v28  ;;  %v2276_v31 = vmul.f32 %v3078_v63, %v4804_v45  ;;  %v4930_v20 = vpop.permute.xlu1 %1044  ;;  %v4932_v7 = vpop.permute.xlu0 %1012  ;;  %v1671_v61 = vsel %vm1656_vm3, %v5290_v44, %v5289_v15  ;;  %v5291_v48 = vld [vmem:[#allocation49_spill] sm:$0xff] }
 0x267   : > { %v2181_v42 = vpop.f32.mrf.mxu1  ;;  %v1687_v28 = vsel %vm1656_vm3, %v5291_v48, %v4871_v49  ;;  %v1705_v41 = vsel %vm1689_vm4, %v1672_v50, %v4932_v7 }
 0x268   : > { %3188 = vpow2.f32 %v2967_v51  ;;  %v2966_v27 = vmul.f32 -1.442695, %v4927_v29  ;;  %v4936_v5 = vadd.f32 %v4811_v40, %v2276_v31  ;;  %v2275_v47 = vmul.f32 %v4804_v45, %v2181_v42 }
 0x269   : > { %v1720_v31 = vsel %vm1689_vm4, %v1687_v28, %v4880_v58  ;;  %v1704_v42 = vsel %vm1689_vm4, %v1671_v61, %v4882_v59 }
 0x26a   : > { %3190 = vpow2.f32 %v2966_v27  ;;  %v2983_v16 = vmul.f32 -1.442695, %v4936_v5  ;;  %v4947_v12 = vadd.f32 %v4811_v40, %v2275_v47  ;;  %v1171_v43 = vpop.permute.xlu1 %1170  ;;  %v1139_v17 = vpop.permute.xlu0 %1138 }
 0x26b   : > { %v1915_v37 = vld [vmem:[#allocation2 + $0xe0] sm:$0xff]  ;;  %v1753_v27 = vsel %vm1722_vm5, %v1720_v31, %v1171_v43  ;;  %v1737_v47 = vsel %vm1722_vm5, %v1704_v42, %v1139_v17 }
 0x26c   : > { %v1899_v53 = vld [vmem:[#allocation2 + $0x60] sm:$0xff]  ;;  %3192 = vpow2.f32 %v2983_v16  ;;  %v2982_v33 = vmul.f32 -1.442695, %v4947_v12  ;;  %3091 = vmatprep.mubr.msk.f32.mxu1 %vm1854_vm9, %v1915_v37  ;;  %v5294_v16 = vld [vmem:[#allocation48_spill] sm:$0xff] }
 0x26d   : > { %3067 = vmatprep.mubr.msk.f32.mxu0 %vm1854_vm9, %v1899_v53  ;;  %v1688_v58 = vsel %vm1656_vm3, %v5294_v16, %v4875_v32 }
 0x26e   : > { %3194 = vpow2.f32 %v2982_v33  ;;  %v1553_v55 = vpop.permute.xlu1 %1552  ;;  %v1521_v62 = vpop.permute.xlu0 %1520  ;;  %v1721_v37 = vsel %vm1689_vm4, %v1688_v58, %v4930_v20 }
 0x26f   : > { %v1851_v35 = vsel %vm1821_vm8, %v1818_v14, %v1553_v55  ;;  %v1835_v54 = vsel %vm1821_vm8, %v1802_v52, %v1521_v62 }
 0x270   : > { %1884 = vst.msk [vmem:[#allocation2 + $0xe8] sm:$0xff] %vm1854_vm9, %v1851_v35  ;;  %1868 = vst.msk [vmem:[#allocation2 + $0x68] sm:$0xff] %vm1854_vm9, %v1835_v54 }
 0x272   : > { %v1173_v21 = vpop.permute.xlu1 %1172  ;;  %v1141_v25 = vpop.permute.xlu0 %1140 }
 0x273   : > { %v1754_v33 = vsel %vm1722_vm5, %v1721_v37, %v1173_v21  ;;  %v1738_v24 = vsel %vm1722_vm5, %v1705_v41, %v1141_v25 }
 0x275   : > { %v3189_v38 = vpop.eup %3188 }
 0x276   : > { %v2427_v36 = vadd.f32 1.0, %v3189_v38  ;;  %v1299_v1 = vpop.permute.xlu1 %1298  ;;  %v1267_v4 = vpop.permute.xlu0 %1266 }
 0x277   : > { %v3191_v57 = vpop.eup %3190  ;;  %v1900_v3 = vld [vmem:[#allocation2 + $0x68] sm:$0xff]  ;;  %v1786_v49 = vsel %vm1755_vm6, %v1753_v27, %v1299_v1  ;;  %v1770_v10 = vsel %vm1755_vm6, %v1737_v47, %v1267_v4 }
 0x278   : > { %v1916_v46 = vld [vmem:[#allocation2 + $0xe8] sm:$0xff]  ;;  %3196 = vrcp.f32 %v2427_v36  ;;  %v2426_v9 = vadd.f32 1.0, %v3191_v57  ;;  %3068 = vmatmul.mubr.msk.f32.gmra.mxu0 %vm1854_vm9, %v1900_v3 }
 0x279   : > { %3092 = vmatmul.mubr.msk.f32.gmra.mxu1 %vm1854_vm9, %v1916_v46  ;;  %v3193_v18 = vpop.eup %3192 }
 0x27a   : > { %3198 = vrcp.f32 %v2426_v9  ;;  %v2443_v6 = vadd.f32 1.0, %v3193_v18  ;;  %v1301_v8 = vpop.permute.xlu1 %1300  ;;  %v1269_v26 = vpop.permute.xlu0 %1268 }
 0x27b   : > { %v3195_v22 = vpop.eup %3194  ;;  %v1787_v56 = vsel %vm1755_vm6, %v1754_v33, %v1301_v8  ;;  %v1771_v7 = vsel %vm1755_vm6, %v1738_v24, %v1269_v26 }
 0x27c   : > { %3200 = vrcp.f32 %v2443_v6  ;;  %v2442_v13 = vadd.f32 1.0, %v3195_v22 }
 0x27e   : > { %3202 = vrcp.f32 %v2442_v13  ;;  %v1427_v30 = vpop.permute.xlu1 %1426  ;;  %v1395_v39 = vpop.permute.xlu0 %1394 }
 0x27f   : > { %v1819_v43 = vsel %vm1788_vm7, %v1786_v49, %v1427_v30  ;;  %v1803_v17 = vsel %vm1788_vm7, %v1770_v10, %v1395_v39 }
 0x282   : > { %v1429_v63 = vpop.permute.xlu1 %1428  ;;  %v1397_v51 = vpop.permute.xlu0 %1396 }
 0x283   : > { %v1804_v55 = vsel %vm1788_vm7, %v1771_v7, %v1397_v51 }
 0x285   : > { %v3197_v19 = vpop.eup %3196 }
 0x286   : > { %v2523_v59 = vmul.f32 %v3197_v19, %v4919_v2  ;;  %v1555_v23 = vpop.permute.xlu1 %1554  ;;  %v1523_v0 = vpop.permute.xlu0 %1522 }
 0x287   : > { %v3199_v53 = vpop.eup %3198  ;;  %v1852_v34 = vsel %vm1821_vm8, %v1819_v43, %v1555_v23  ;;  %v1836_v32 = vsel %vm1821_vm8, %v1803_v17, %v1523_v0 }
 0x288   : > { %2555 = vst [vmem:[%s4899_s24 + $0x18] sm:$0xff] %v2523_v59  ;;  %v2522_v2 = vmul.f32 %v3199_v53, %v4927_v29  ;;  %1885 = vst.msk [vmem:[#allocation2 + $0xf0] sm:$0xff] %vm1854_vm9, %v1852_v34  ;;  %v1820_v29 = vsel %vm1788_vm7, %v1787_v56, %v1429_v63 }
 0x289   : > { %1869 = vst.msk [vmem:[#allocation2 + $0x70] sm:$0xff] %vm1854_vm9, %v1836_v32  ;;  %v3201_v20 = vpop.eup %3200  ;;  %v3057_v14 = vpop.f32.mrf.mxu0 }
 0x28a   : > { %2554 = vst [vmem:[%s4899_s24 + $0x10] sm:$0xff] %v2522_v2  ;;  %v2539_v52 = vmul.f32 %v3201_v20, %v4936_v5  ;;  %v2262_v62 = vmul.f32 %v3057_v14, %v4804_v45  ;;  %v1557_v35 = vpop.permute.xlu1 %1556  ;;  %v1525_v54 = vpop.permute.xlu0 %1524 }
 0x28b   : > { %v3203_v21 = vpop.eup %3202  ;;  %v1853_v25 = vsel %vm1821_vm8, %v1820_v29, %v1557_v35  ;;  %v1837_v38 = vsel %vm1821_vm8, %v1804_v55, %v1525_v54  ;;  %v2111_v36 = vpop.f32.mrf.mxu0 }
 0x28c   : > { %2571 = vst [vmem:[%s4899_s24 + $0x98] sm:$0xff] %v2539_v52  ;;  %v2538_v1 = vmul.f32 %v3203_v21, %v4947_v12  ;;  %v2301_v5 = vadd.f32 %v4811_v40, %v2262_v62  ;;  %1886 = vst.msk [vmem:[#allocation2 + $0xf8] sm:$0xff] %vm1854_vm9, %v1853_v25  ;;  %v2261_v4 = vmul.f32 %v4804_v45, %v2111_v36 }
 0x28d   : > { %1870 = vst.msk [vmem:[#allocation2 + $0x78] sm:$0xff] %vm1854_vm9, %v1837_v38  ;;  %v3081_v57 = vpop.f32.mrf.mxu1 }
 0x28e   : > { %2570 = vst [vmem:[%s4899_s24 + $0x90] sm:$0xff] %v2538_v1  ;;  %v2969_v3 = vmul.f32 -1.442695, %v2301_v5  ;;  %v2300_v46 = vadd.f32 %v4811_v40, %v2261_v4  ;;  %v2278_v9 = vmul.f32 %v3081_v57, %v4804_v45 }
 0x28f   : > { %v2191_v18 = vpop.f32.mrf.mxu1  ;;  %v1917_v8 = vld [vmem:[#allocation2 + $0xf0] sm:$0xff] }
 0x290   : > { %v1901_v6 = vld [vmem:[#allocation2 + $0x70] sm:$0xff]  ;;  %3204 = vpow2.f32 %v2969_v3  ;;  %v2968_v12 = vmul.f32 -1.442695, %v2300_v46  ;;  %v2317_v26 = vadd.f32 %v4811_v40, %v2278_v9  ;;  %v2277_v22 = vmul.f32 %v4804_v45, %v2191_v18  ;;  %3094 = vmatprep.mubr.msk.f32.mxu1 %vm1854_vm9, %v1917_v8 }
 0x291   : > { %3070 = vmatprep.mubr.msk.f32.mxu0 %vm1854_vm9, %v1901_v6 }
 0x292   : > { %3206 = vpow2.f32 %v2968_v12  ;;  %v2985_v13 = vmul.f32 -1.442695, %v2317_v26  ;;  %v2316_v30 = vadd.f32 %v4811_v40, %v2277_v22 }
 0x293   : > { %v1918_v15 = vld [vmem:[#allocation2 + $0xf8] sm:$0xff] }
 0x294   : > { %v1902_v39 = vld [vmem:[#allocation2 + $0x78] sm:$0xff]  ;;  %3208 = vpow2.f32 %v2985_v13  ;;  %v2984_v44 = vmul.f32 -1.442695, %v2316_v30  ;;  %3095 = vmatmul.mubr.msk.f32.gmra.mxu1 %vm1854_vm9, %v1918_v15 }
 0x295   : > { %3071 = vmatmul.mubr.msk.f32.gmra.mxu0 %vm1854_vm9, %v1902_v39 }
 0x296   : > { %3210 = vpow2.f32 %v2984_v44 }
 0x29d   : > { %v3205_v61 = vpop.eup %3204 }
 0x29e   : > { %v2429_v48 = vadd.f32 1.0, %v3205_v61 }
 0x29f   : > { %v3207_v28 = vpop.eup %3206 }
 0x2a0   : > { %3212 = vrcp.f32 %v2429_v48  ;;  %v2428_v63 = vadd.f32 1.0, %v3207_v28 }
 0x2a1   : > { %v3209_v51 = vpop.eup %3208 }
 0x2a2   : > { %3214 = vrcp.f32 %v2428_v63  ;;  %v2445_v31 = vadd.f32 1.0, %v3209_v51 }
 0x2a3   : > { %v3211_v42 = vpop.eup %3210 }
 0x2a4   : > { %3216 = vrcp.f32 %v2445_v31  ;;  %v2444_v27 = vadd.f32 1.0, %v3211_v42 }
 0x2a6   : > { %3218 = vrcp.f32 %v2444_v27 }
 0x2ad   : > { %v3213_v47 = vpop.eup %3212 }
 0x2ae   : > { %v2525_v19 = vmul.f32 %v3213_v47, %v2301_v5 }
 0x2af   : > { %v3215_v11 = vpop.eup %3214 }
 0x2b0   : > { %2557 = vst [vmem:[%s4899_s24 + $0x28] sm:$0xff] %v2525_v19  ;;  %v2524_v60 = vmul.f32 %v3215_v11, %v2300_v46 }
 0x2b1   : > { %v3217_v50 = vpop.eup %3216 }
 0x2b2   : > { %2556 = vst [vmem:[%s4899_s24 + $0x20] sm:$0xff] %v2524_v60  ;;  %v2541_v49 = vmul.f32 %v3217_v50, %v2317_v26 }
 0x2b3   : > { %v3219_v10 = vpop.eup %3218 }
 0x2b4   : > { %2573 = vst [vmem:[%s4899_s24 + $0xa8] sm:$0xff] %v2541_v49  ;;  %v2540_v16 = vmul.f32 %v3219_v10, %v2316_v30 }
 0x2b5   : > { %v3060_v58 = vpop.f32.mrf.mxu0  ;;  %v3084_v59 = vpop.f32.mrf.mxu1 }
 0x2b6   : > { %2572 = vst [vmem:[%s4899_s24 + $0xa0] sm:$0xff] %v2540_v16  ;;  %v2264_v43 = vmul.f32 %v3060_v58, %v4804_v45  ;;  %v2280_v17 = vmul.f32 %v3084_v59, %v4804_v45 }
 0x2b7   : > { %v2121_v23 = vpop.f32.mrf.mxu0  ;;  %v2201_v0 = vpop.f32.mrf.mxu1 }
 0x2b8   : > { %v2303_v53 = vadd.f32 %v4811_v40, %v2264_v43  ;;  %v2319_v37 = vadd.f32 %v4811_v40, %v2280_v17  ;;  %v2263_v41 = vmul.f32 %v4804_v45, %v2121_v23  ;;  %v2279_v34 = vmul.f32 %v4804_v45, %v2201_v0 }
 0x2ba   : > { %v2971_v32 = vmul.f32 -1.442695, %v2303_v53  ;;  %v2987_v2 = vmul.f32 -1.442695, %v2319_v37  ;;  %v2302_v33 = vadd.f32 %v4811_v40, %v2263_v41  ;;  %v2318_v24 = vadd.f32 %v4811_v40, %v2279_v34 }
 0x2bc   : > { %3220 = vpow2.f32 %v2971_v32  ;;  %v2970_v20 = vmul.f32 -1.442695, %v2302_v33  ;;  %v2986_v56 = vmul.f32 -1.442695, %v2318_v24 }
 0x2bd   : > { %3222 = vpow2.f32 %v2987_v2 }
 0x2be   : > { %3224 = vpow2.f32 %v2970_v20 }
 0x2bf   : > { %3226 = vpow2.f32 %v2986_v56 }
 0x2c9   : > { %v3221_v7 = vpop.eup %3220 }
 0x2ca   : > { %v3223_v14 = vpop.eup %3222  ;;  %v2431_v52 = vadd.f32 1.0, %v3221_v7 }
 0x2cb   : > { %v3225_v29 = vpop.eup %3224  ;;  %v2447_v55 = vadd.f32 1.0, %v3223_v14 }
 0x2cc   : > { %v3227_v62 = vpop.eup %3226  ;;  %3228 = vrcp.f32 %v2431_v52  ;;  %v2430_v35 = vadd.f32 1.0, %v3225_v29 }
 0x2cd   : > { %3230 = vrcp.f32 %v2447_v55  ;;  %v2446_v54 = vadd.f32 1.0, %v3227_v62 }
 0x2ce   : > { %3232 = vrcp.f32 %v2430_v35 }
 0x2cf   : > { %3234 = vrcp.f32 %v2446_v54 }
 0x2d9   : > { %v3229_v21 = vpop.eup %3228 }
 0x2da   : > { %v3231_v25 = vpop.eup %3230  ;;  %v2527_v38 = vmul.f32 %v3229_v21, %v2303_v53 }
 0x2db   : > { %v3233_v36 = vpop.eup %3232  ;;  %v2543_v1 = vmul.f32 %v3231_v25, %v2319_v37 }
 0x2dc   : > { %v3235_v5 = vpop.eup %3234  ;;  %2559 = vst [vmem:[%s4899_s24 + $0x38] sm:$0xff] %v2527_v38  ;;  %v2526_v4 = vmul.f32 %v3233_v36, %v2302_v33 }
 0x2dd   : > { %2575 = vst [vmem:[%s4899_s24 + $0xb8] sm:$0xff] %v2543_v1  ;;  %v2542_v57 = vmul.f32 %v3235_v5, %v2318_v24 }
 0x2de   : > { %2558 = vst [vmem:[%s4899_s24 + $0x30] sm:$0xff] %v2526_v4 }
 0x2df   : > { %2574 = vst [vmem:[%s4899_s24 + $0xb0] sm:$0xff] %v2542_v57 }
 0x2e0   : > { %v3063_v3 = vpop.f32.mrf.mxu0 }
 0x2e1   : > { %v3087_v46 = vpop.f32.mrf.mxu1  ;;  %v2266_v9 = vmul.f32 %v3063_v3, %v4804_v45 }
 0x2e2   : > { %v2282_v18 = vmul.f32 %v3087_v46, %v4804_v45  ;;  %v2131_v6 = vpop.f32.mrf.mxu0 }
 0x2e3   : > { %v2211_v8 = vpop.f32.mrf.mxu1  ;;  %v2305_v12 = vadd.f32 %v4811_v40, %v2266_v9  ;;  %v2265_v22 = vmul.f32 %v4804_v45, %v2131_v6 }
 0x2e4   : > { %v2321_v26 = vadd.f32 %v4811_v40, %v2282_v18  ;;  %v2281_v13 = vmul.f32 %v4804_v45, %v2211_v8 }
 0x2e5   : > { %v2973_v30 = vmul.f32 -1.442695, %v2305_v12  ;;  %v2304_v15 = vadd.f32 %v4811_v40, %v2265_v22 }
 0x2e6   : > { %v2989_v39 = vmul.f32 -1.442695, %v2321_v26  ;;  %v2320_v44 = vadd.f32 %v4811_v40, %v2281_v13 }
 0x2e7   : > { %3236 = vpow2.f32 %v2973_v30  ;;  %v2972_v61 = vmul.f32 -1.442695, %v2304_v15 }
 0x2e8   : > { %v2988_v48 = vmul.f32 -1.442695, %v2320_v44  ;;  %3238 = vpow2.f32 %v2989_v39 }
 0x2e9   : > { %3240 = vpow2.f32 %v2972_v61 }
 0x2ea   : > { %3242 = vpow2.f32 %v2988_v48 }
 0x2f4   : > { %v3237_v28 = vpop.eup %3236 }
 0x2f5   : > { %v3239_v63 = vpop.eup %3238  ;;  %v2433_v51 = vadd.f32 1.0, %v3237_v28 }
 0x2f6   : > { %v3241_v31 = vpop.eup %3240  ;;  %v2449_v42 = vadd.f32 1.0, %v3239_v63 }
 0x2f7   : > { %v3243_v27 = vpop.eup %3242  ;;  %3244 = vrcp.f32 %v2433_v51  ;;  %v2432_v47 = vadd.f32 1.0, %v3241_v31 }
 0x2f8   : > { %3246 = vrcp.f32 %v2449_v42  ;;  %v2448_v19 = vadd.f32 1.0, %v3243_v27 }
 0x2f9   : > { %3248 = vrcp.f32 %v2432_v47 }
 0x2fa   : > { %3250 = vrcp.f32 %v2448_v19 }
 0x304   : > { %v3245_v11 = vpop.eup %3244 }
 0x305   : > { %v3247_v60 = vpop.eup %3246  ;;  %v2529_v50 = vmul.f32 %v3245_v11, %v2305_v12 }
 0x306   : > { %v3249_v49 = vpop.eup %3248  ;;  %v2545_v10 = vmul.f32 %v3247_v60, %v2321_v26 }
 0x307   : > { %v3251_v16 = vpop.eup %3250  ;;  %2561 = vst [vmem:[%s4899_s24 + $0x48] sm:$0xff] %v2529_v50  ;;  %v2528_v58 = vmul.f32 %v3249_v49, %v2304_v15 }
 0x308   : > { %2577 = vst [vmem:[%s4899_s24 + $0xc8] sm:$0xff] %v2545_v10  ;;  %v2544_v59 = vmul.f32 %v3251_v16, %v2320_v44 }
 0x309   : > { %2560 = vst [vmem:[%s4899_s24 + $0x40] sm:$0xff] %v2528_v58 }
 0x30a   : > { %2576 = vst [vmem:[%s4899_s24 + $0xc0] sm:$0xff] %v2544_v59 }
 0x30c   : > { %v3066_v43 = vpop.f32.mrf.mxu0 }
 0x30d   : > { %v3090_v17 = vpop.f32.mrf.mxu1  ;;  %v2268_v23 = vmul.f32 %v3066_v43, %v4804_v45 }
 0x30e   : > { %v2284_v0 = vmul.f32 %v3090_v17, %v4804_v45  ;;  %v2141_v53 = vpop.f32.mrf.mxu0 }
 0x30f   : > { %v2221_v37 = vpop.f32.mrf.mxu1  ;;  %v2307_v41 = vadd.f32 %v4811_v40, %v2268_v23  ;;  %v2267_v32 = vmul.f32 %v4804_v45, %v2141_v53 }
 0x310   : > { %v2323_v34 = vadd.f32 %v4811_v40, %v2284_v0  ;;  %v2283_v2 = vmul.f32 %v4804_v45, %v2221_v37 }
 0x311   : > { %v2975_v33 = vmul.f32 -1.442695, %v2307_v41  ;;  %v2306_v20 = vadd.f32 %v4811_v40, %v2267_v32 }
 0x312   : > { %v2991_v24 = vmul.f32 -1.442695, %v2323_v34  ;;  %v2322_v56 = vadd.f32 %v4811_v40, %v2283_v2 }
 0x313   : > { %3252 = vpow2.f32 %v2975_v33  ;;  %v2974_v7 = vmul.f32 -1.442695, %v2306_v20 }
 0x314   : > { %v2990_v14 = vmul.f32 -1.442695, %v2322_v56  ;;  %3254 = vpow2.f32 %v2991_v24 }
 0x315   : > { %3256 = vpow2.f32 %v2974_v7 }
 0x316   : > { %3258 = vpow2.f32 %v2990_v14 }
 0x320   : > { %v3253_v52 = vpop.eup %3252 }
 0x321   : > { %v3255_v29 = vpop.eup %3254  ;;  %v2435_v55 = vadd.f32 1.0, %v3253_v52 }
 0x322   : > { %v3257_v62 = vpop.eup %3256  ;;  %v2451_v35 = vadd.f32 1.0, %v3255_v29 }
 0x323   : > { %v3259_v54 = vpop.eup %3258  ;;  %3260 = vrcp.f32 %v2435_v55  ;;  %v2434_v21 = vadd.f32 1.0, %v3257_v62 }
 0x324   : > { %3262 = vrcp.f32 %v2451_v35  ;;  %v2450_v25 = vadd.f32 1.0, %v3259_v54 }
 0x325   : > { %3264 = vrcp.f32 %v2434_v21 }
 0x326   : > { %3266 = vrcp.f32 %v2450_v25 }
 0x330   : > { %v3261_v38 = vpop.eup %3260 }
 0x331   : > { %v3263_v36 = vpop.eup %3262  ;;  %v2531_v1 = vmul.f32 %v3261_v38, %v2307_v41 }
 0x332   : > { %v3265_v5 = vpop.eup %3264  ;;  %v2547_v4 = vmul.f32 %v3263_v36, %v2323_v34 }
 0x333   : > { %v3267_v57 = vpop.eup %3266  ;;  %2563 = vst [vmem:[%s4899_s24 + $0x58] sm:$0xff] %v2531_v1  ;;  %v2530_v3 = vmul.f32 %v3265_v5, %v2306_v20 }
 0x334   : > { %2579 = vst [vmem:[%s4899_s24 + $0xd8] sm:$0xff] %v2547_v4  ;;  %v2546_v46 = vmul.f32 %v3267_v57, %v2322_v56 }
 0x335   : > { %2562 = vst [vmem:[%s4899_s24 + $0x50] sm:$0xff] %v2530_v3 }
 0x336   : > { %2578 = vst [vmem:[%s4899_s24 + $0xd0] sm:$0xff] %v2546_v46 }
 0x338   : > { %v3069_v9 = vpop.f32.mrf.mxu0 }
 0x339   : > { %v3093_v18 = vpop.f32.mrf.mxu1  ;;  %v2270_v6 = vmul.f32 %v3069_v9, %v4804_v45 }
 0x33a   : > { %v2286_v8 = vmul.f32 %v3093_v18, %v4804_v45  ;;  %v2151_v12 = vpop.f32.mrf.mxu0 }
 0x33b   : > { %v2231_v26 = vpop.f32.mrf.mxu1  ;;  %v2309_v22 = vadd.f32 %v4811_v40, %v2270_v6  ;;  %v2269_v30 = vmul.f32 %v4804_v45, %v2151_v12 }
 0x33c   : > { %v2325_v13 = vadd.f32 %v4811_v40, %v2286_v8  ;;  %v2285_v39 = vmul.f32 %v4804_v45, %v2231_v26 }
 0x33d   : > { %v2977_v15 = vmul.f32 -1.442695, %v2309_v22  ;;  %v2308_v61 = vadd.f32 %v4811_v40, %v2269_v30 }
 0x33e   : > { %v2993_v44 = vmul.f32 -1.442695, %v2325_v13  ;;  %v2324_v48 = vadd.f32 %v4811_v40, %v2285_v39 }
 0x33f   : > { %3268 = vpow2.f32 %v2977_v15  ;;  %v2976_v28 = vmul.f32 -1.442695, %v2308_v61 }
 0x340   : > { %v2992_v63 = vmul.f32 -1.442695, %v2324_v48  ;;  %3270 = vpow2.f32 %v2993_v44 }
 0x341   : > { %3272 = vpow2.f32 %v2976_v28 }
 0x342   : > { %3274 = vpow2.f32 %v2992_v63 }
 0x34c   : > { %v3269_v51 = vpop.eup %3268 }
 0x34d   : > { %v3271_v31 = vpop.eup %3270  ;;  %v2437_v42 = vadd.f32 1.0, %v3269_v51 }
 0x34e   : > { %v3273_v27 = vpop.eup %3272  ;;  %v2453_v47 = vadd.f32 1.0, %v3271_v31 }
 0x34f   : > { %v3275_v19 = vpop.eup %3274  ;;  %3276 = vrcp.f32 %v2437_v42  ;;  %v2436_v11 = vadd.f32 1.0, %v3273_v27 }
 0x350   : > { %3278 = vrcp.f32 %v2453_v47  ;;  %v2452_v60 = vadd.f32 1.0, %v3275_v19 }
 0x351   : > { %3280 = vrcp.f32 %v2436_v11 }
 0x352   : > { %3282 = vrcp.f32 %v2452_v60 }
 0x354   : > { %v3096_v49 = vpop.f32.mrf.mxu1 }
 0x355   : > { %v3072_v50 = vpop.f32.mrf.mxu0  ;;  %v2288_v16 = vmul.f32 %v3096_v49, %v4804_v45 }
 0x356   : > { %v2272_v10 = vmul.f32 %v3072_v50, %v4804_v45  ;;  %v2241_v59 = vpop.f32.mrf.mxu1 }
 0x357   : > { %v2161_v58 = vpop.f32.mrf.mxu0  ;;  %v2327_v17 = vadd.f32 %v4811_v40, %v2288_v16  ;;  %v2287_v0 = vmul.f32 %v4804_v45, %v2241_v59 }
 0x358   : > { %v2311_v43 = vadd.f32 %v4811_v40, %v2272_v10  ;;  %v2271_v23 = vmul.f32 %v4804_v45, %v2161_v58 }
 0x359   : > { %v2995_v37 = vmul.f32 -1.442695, %v2327_v17  ;;  %v2326_v34 = vadd.f32 %v4811_v40, %v2287_v0 }
 0x35a   : > { %v2979_v53 = vmul.f32 -1.442695, %v2311_v43  ;;  %v2310_v41 = vadd.f32 %v4811_v40, %v2271_v23 }
 0x35b   : > { %v2994_v2 = vmul.f32 -1.442695, %v2326_v34 }
 0x35c   : > { %3284 = vpow2.f32 %v2979_v53  ;;  %v2978_v32 = vmul.f32 -1.442695, %v2310_v41  ;;  %v3277_v33 = vpop.eup %3276 }
 0x35d   : > { %3286 = vpow2.f32 %v2995_v37  ;;  %v3279_v24 = vpop.eup %3278  ;;  %v2533_v20 = vmul.f32 %v3277_v33, %v2309_v22 }
 0x35e   : > { %3288 = vpow2.f32 %v2978_v32  ;;  %v3281_v56 = vpop.eup %3280  ;;  %v2549_v45 = vmul.f32 %v3279_v24, %v2325_v13 }
 0x35f   : > { %3290 = vpow2.f32 %v2994_v2  ;;  %v3283_v7 = vpop.eup %3282  ;;  %2565 = vst [vmem:[%s4899_s24 + $0x68] sm:$0xff] %v2533_v20  ;;  %v2532_v14 = vmul.f32 %v3281_v56, %v2308_v61 }
 0x360   : > { %2581 = vst [vmem:[%s4899_s24 + $0xe8] sm:$0xff] %v2549_v45  ;;  %v2548_v52 = vmul.f32 %v3283_v7, %v2324_v48 }
 0x361   : > { %2564 = vst [vmem:[%s4899_s24 + $0x60] sm:$0xff] %v2532_v14 }
 0x362   : > { %2580 = vst [vmem:[%s4899_s24 + $0xe0] sm:$0xff] %v2548_v52 }
 0x369   : > { %v3285_v40 = vpop.eup %3284 }
 0x36a   : > { %v3287_v29 = vpop.eup %3286  ;;  %v2439_v55 = vadd.f32 1.0, %v3285_v40 }
 0x36b   : > { %v3289_v62 = vpop.eup %3288  ;;  %v2455_v35 = vadd.f32 1.0, %v3287_v29 }
 0x36c   : > { %v3291_v54 = vpop.eup %3290  ;;  %3292 = vrcp.f32 %v2439_v55  ;;  %v2438_v21 = vadd.f32 1.0, %v3289_v62 }
 0x36d   : > { %3294 = vrcp.f32 %v2455_v35  ;;  %v2454_v25 = vadd.f32 1.0, %v3291_v54 }
 0x36e   : > { %3296 = vrcp.f32 %v2438_v21 }
 0x36f   : > { %3298 = vrcp.f32 %v2454_v25 }
 0x379   : > { %v3293_v38 = vpop.eup %3292 }
 0x37a   : > { %v3295_v36 = vpop.eup %3294  ;;  %v2535_v1 = vmul.f32 %v3293_v38, %v2311_v43 }
 0x37b   : > { %v3297_v5 = vpop.eup %3296  ;;  %v2551_v4 = vmul.f32 %v3295_v36, %v2327_v17 }
 0x37c   : > { %v3299_v57 = vpop.eup %3298  ;;  %2567 = vst [vmem:[%s4899_s24 + $0x78] sm:$0xff] %v2535_v1  ;;  %v2534_v3 = vmul.f32 %v3297_v5, %v2310_v41 }
 0x37d   : > { %2583 = vst [vmem:[%s4899_s24 + $0xf8] sm:$0xff] %v2551_v4  ;;  %v2550_v46 = vmul.f32 %v3299_v57, %v2326_v34 }
 0x37e   : > { %2566 = vst [vmem:[%s4899_s24 + $0x70] sm:$0xff] %v2534_v3 }
 0x37f   : > { %2582 = vst [vmem:[%s4899_s24 + $0xf0] sm:$0xff] %v2550_v46 }
 0x380   : > { %3313 = shalt.err (!%p3310_p5)
}
 0x381   : > { %s3314_s10 = scalar_lea.hbm %s5100_s6, 4096  ;;  %s3318_s13 = scalar_lea.hbm %s5159_s4, 8192 }
 0x382   : > { %p3315_p6 = scmp.ne.s32.totalorder %s5100_s6, %s3314_s10  ;;  %p3319_p10 = scmp.lt.s32.totalorder %s5100_s6, %s5159_s4 }
 0x383   : > { %p3320_p11 = scmp.lt.s32.totalorder %s3318_s13, %s3314_s10 }
 0x384   : > { %p3316_p7 = pnand %p3315_p6, %p3453_p4 }
 0x385   : > { %p3321_p12 = por %p3320_p11, %p3319_p10 }
 0x386   : > { %p3317_p9 = pneg %p3316_p7 }
 0x388   : > { %p3322_p13 = pnand %p3321_p12, %p3317_p9 }
 0x38a   : > { %3325 = shalt.err (!%p3322_p13)
}
 0x38b   : > { %s3387_s26 = smov 128  }
 0x38c   : > { %3108 = dma.vmem_to_hbm [thread:$0]  (%p3453_p4), %s5103_s29, 4096, %s5100_s6, %s5109_s18, %s3387_s26, %s3387_s26, %s3379_s9  }
 0x38d PF: > { %p3114_p0 = scmp.ge.s32.totalorder %s3376_s20, 2  ;;  %s2616_s30 = sand.u32 1, %s3356_s15  }
 0x38e   : > { %s2617_s5 = scalar_lea.sflag [#allocation4], %s2616_s30 }
 0x38f   : > { %p3111_p1 = pnand %p3114_p0, %p3460_p8 }
 0x391   : > { %p3112_p2 = pneg %p3111_p1 }
 0x393   : > { %3351 = dma.done.wait (%p3112_p2), %s2617_s5, 4096  }
 0x394   : > { %3353 = vsyncadd (%p3112_p2), %s2617_s5, 4294963200  ;;  %s17_s20 = sadd.s32 1, %s3376_s20   ;;  %s5295_s15 = smov %s3360_s16 }
 0x395   : > { %p14_p3 = scmp.ge.s32.totalorder %s17_s20, 4   ;;  %s5296_s16 = smov %s3364_s17 }
 0x396   : > { %s5297_s17 = smov %s3466_s28  ;;  %s5298_s18 = smov %s3372_s19 }
 0x397   : > { %s5299_s19 = smov %s5301_s23  ;;  %16 = sbr.rel (!%p14_p3) target bundleno = 4 (0x4), region = 87 }
 0x39c   :  { %2622 = vsyncpa [#allocation4], 1 }
 0x39d   :  { %2624 = vsyncpa [#allocation4 + $0x1], 1 }

// kernel: tpu_custom_call.1
= control target key start
LH: loop header
LB: loop body
LE: loop exit
PB: predicated region body
PF: predicated region fallthrough
CT: control target
= control target key end

     0   :  { %9 = vsyncpa [#allocation4], 0  ;;  %s8246_s0 = inlined_call_operand.vmem [shape: f32[2,18,18,4], index: 0, kind: input, shape index: {}]   ;;  %s8247_s1 = inlined_call_operand.vmem [shape: f32[36,128], index: 1, kind: input, shape index: {}]   ;;  %s8248_s2 = inlined_call_operand.vmem [shape: f32[1,128], index: 2, kind: input, shape index: {}]   ;;  %s8249_s3 = inlined_call_operand.vmem [shape: f32[1,128], index: 3, kind: input, shape index: {}]   ;;  %s8250_s4 = inlined_call_operand.hbm [shape: f32[2,256,128], index: 4, kind: output, shape index: {}]  }
   0x1   :  { %11 = vsyncpa [#allocation4 + $0x1], 0  ;;  %s6474_s15 = smov 0   ;;  %s6476_s16 = smov 0  }
   0x2   :  { %s6478_s17 = smov 0   ;;  %s6480_s18 = smov 0  }
   0x3   :  { %s6482_s19 = smov 0   ;;  %s6484_s20 = smov 0  }
   0x4 LB: > { %s4894_s21 = sadd.s32 4294967295, %s6444_s20   ;;  %s4895_s22 = sadd.s32 4294967294, %s6444_s20   ;;  %s6444_s20 = sphi %s6484_s20, %s17_s20   ;;  %s6440_s19 = sphi %s6482_s19, %s8492_s19   ;;  %s6436_s18 = sphi %s6480_s18, %s8491_s18   ;;  %s6432_s17 = sphi %s6478_s17, %s8490_s17   ;;  %s6428_s16 = sphi %s6476_s16, %s8489_s16   ;;  %s6424_s15 = sphi %s6474_s15, %s8488_s15  }
   0x5   : > { %s36_s23 = sadd.s32 1, %s6440_s19  ;;  %s151_s24 = sadd.s32 1, %s6432_s17 }
   0x6   : > { %p38_p0 = scmp.ge.s32.totalorder %s36_s23, 2  ;;  %p161_p1 = scmp.ne.s32.totalorder %s6432_s17, %s6428_s16 }
   0x7   : > { %p162_p2 = scmp.eq.s32.totalorder %s4894_s21, 1  ;;  %p167_p3 = scmp.ne.s32.totalorder %s6428_s16, %s6424_s15 }
   0x8   : > { %s8494_s23 = smov (%p38_p0, %s36_s23), 0  ;;  %p168_p5 = scmp.eq.s32.totalorder %s4895_s22, 1 }
   0x9   : > { %p6514_p4 = por %p162_p2, %p161_p1  ;;  %s144_s26 = ssub.s32 %s6440_s19, %s8494_s23 }
   0xa   : > { %p4901_p6 = scmp.ge.s32.totalorder %s6444_s20, 1  ;;  %p149_p7 = scmp.eq.s32.totalorder %s144_s26, 0 }
   0xb   : > { %p6521_p8 = por %p168_p5, %p167_p3  ;;  %p213_p9 = scmp.lt.s32.totalorder %s6444_s20, 3 }
   0xc   : > { %s6527_s28 = scalar_select %p149_p7, %s6432_s17, %s151_s24  }
   0xd   : > { %p214_p10 = pnand %p4901_p6, %p213_p9 }
   0xf   : > { %217 = sbr.rel (%p214_p10) target bundleno = 571 (0x23b), region = 36 }
  0x14   : > { %v364_v0 = vld [vmem:[%s8247_s1] sm:$0xf]  ;;  %vm462_vm0 = vcmask 1043456   ;;  %p249_p11 = scmp.lt.s32.totalorder %s6436_s18, 1  ;;  %v819_v1 = vld [vmem:[%s8247_s1 + $0x4] sm:$0xf] }
  0x15   : > { %6180 = vmatprep.subr.msk.mxu1 %vm462_vm0, %v364_v0  ;;  %5730 = vmatprep.subr.msk.mxu0 %vm462_vm0, %v364_v0  ;;  %v1272_v2 = vld [vmem:[%s8247_s1 + $0x8] sm:$0xf]  ;;  %vm365_vm1 = vcmask 31744   ;;  %v6574_v9 = vld [vmem:[%s8247_s1 + $0xc] sm:$0xf]  ;;  %s246_s14 = sand.u32 1, %s6428_s16  }
  0x16   : > { %6181 = vmatpush3.msk.msra.mxu1 %vm462_vm0, %v364_v0  ;;  %5731 = vmatpush3.msk.msra.mxu0 %vm462_vm0, %v364_v0  ;;  %s250_s9 = scalar_select %p249_p11, %s6436_s18, 1  ;;  %v6579_v10 = vld [vmem:[%s8247_s1 + $0x10] sm:$0xf]  ;;  %v6738_v43 = vld [vmem:[%s8247_s1 + $0x14] sm:$0xf] }
  0x17   : > { %5780 = vmatprep.subr.msk.mxu1 %vm462_vm0, %v819_v1  ;;  %5830 = vmatprep.subr.msk.mxu0 %vm462_vm0, %v1272_v2  ;;  %v6743_v44 = vld [vmem:[%s8247_s1 + $0x18] sm:$0xf]  ;;  %s8023_s21 = sshll.u32 %s246_s14, 8  ;;  %s5432_s24 = sshll.u32 %s6436_s18, 12 }
  0x18   : > { %s6182_s10 = smul.u32 432, %s250_s9  ;;  %s8044_s22 = scalar_lea.vmem [#allocation3], %s8023_s21 }
  0x19   : > { %s4768_s26 = sshll.u32 %s8044_s22, 4  ;;  %s8192_s5 = scalar_lea.hbm %s8250_s4, %s5432_s24  ;;  %s8194_s26 = int_to_ptr.vmem [resolvable:$true] %s4768_s26 }
  0x1a   : > { %s6549_s13 = scalar_lea.vmem %s8246_s0, %s6182_s10  ;;  %s8201_s18 = scalar_lea.sflag [#allocation4], %s246_s14 }
  0x1b   : > { %v332_v3 = vld [vmem:[%s6549_s13] sm:$0xff]  ;;  %v333_v5 = vld [vmem:[%s6549_s13 + $0x8] sm:$0xff]  ;;  %v6563_v7 = vld [vmem:[%s6549_s13 + $0x18] sm:$0xff]  ;;  %s6368_s6 = scalar_lea.vmem %s8194_s26, 4096  ;;  %s6446_s7 = smov [#allocation3]  }
  0x1c   : > { %v6553_v4 = vld [vmem:[%s6549_s13 + $0xc0] sm:$0xff]  ;;  %5732 = vmatprep.mubr.msk.f32.mxu0 %vm365_vm1, %v332_v3  ;;  %v6560_v6 = vld [vmem:[%s6549_s13 + $0xc8] sm:$0xff]  ;;  %v6566_v8 = vld [vmem:[%s6549_s13 + $0xd8] sm:$0xff]  ;;  %p6369_p12 = scmp.ne.s32.totalorder %s8194_s26, %s6368_s6  ;;  %s6372_s8 = sshll.u32 %s6446_s7, 4  ;;  %s6373_s8 = int_to_ptr.vmem [resolvable:$false] %s6372_s8 }
  0x1d   : > { %5756 = vmatprep.mubr.msk.f32.mxu1 %vm365_vm1, %v6553_v4  ;;  %5733 = vmatmul.mubr.msk.f32.vlgmr.msra.gmra.mxu0 %vm365_vm1, %v333_v5  ;;  %v6584_v11 = vld [vmem:[%s6549_s13 + $0x20] sm:$0xff]  ;;  %v6594_v13 = vld [vmem:[%s6549_s13 + $0x30] sm:$0xff]  ;;  %v6612_v15 = vld [vmem:[%s6549_s13 + $0x38] sm:$0xff]  ;;  %s6374_s9 = scalar_lea.vmem %s6373_s8, 8192  ;;  %p6375_p1 = scmp.lt.s32.totalorder %s8194_s26, %s6373_s8 }
  0x1e   : > { %5757 = vmatmul.mubr.msk.f32.vlgmr.msra.gmra.mxu1 %vm365_vm1, %v6560_v6  ;;  %5831 = vmatpush3.msk.msra.mxu0 %vm462_vm0, %v1272_v2  ;;  %v6587_v12 = vld [vmem:[%s6549_s13 + $0xe0] sm:$0xff]  ;;  %v6597_v14 = vld [vmem:[%s6549_s13 + $0xf0] sm:$0xff]  ;;  %v6615_v16 = vld [vmem:[%s6549_s13 + $0xf8] sm:$0xff]  ;;  %p6370_p13 = pnand %p6369_p12, %p6514_p4  ;;  %p6376_p2 = scmp.lt.s32.totalorder %s6374_s9, %s6368_s6 }
  0x1f   : > { %5781 = vmatpush3.msk.msra.mxu1 %vm462_vm0, %v819_v1  ;;  %5735 = vmatprep.mubr.msk.f32.mxu0 %vm365_vm1, %v6563_v7  ;;  %v6618_v17 = vld [vmem:[%s6549_s13 + $0x48] sm:$0xff]  ;;  %v6632_v19 = vld [vmem:[%s6549_s13 + $0x50] sm:$0xff]  ;;  %v6638_v21 = vld [vmem:[%s6549_s13 + $0x60] sm:$0xff] }
  0x20   : > { %5759 = vmatprep.mubr.msk.f32.mxu1 %vm365_vm1, %v6566_v8  ;;  %5880 = vmatprep.subr.msk.mxu1 %vm462_vm0, %v6574_v9  ;;  %v6621_v18 = vld [vmem:[%s6549_s13 + $0x108] sm:$0xff]  ;;  %v6635_v20 = vld [vmem:[%s6549_s13 + $0x110] sm:$0xff]  ;;  %v6641_v22 = vld [vmem:[%s6549_s13 + $0x120] sm:$0xff]  ;;  %p6371_p0 = pneg %p6370_p13  ;;  %p6377_p3 = por %p6376_p2, %p6375_p1 }
  0x21   : > { %5930 = vmatprep.subr.msk.mxu0 %vm462_vm0, %v6579_v10  ;;  %5736 = vmatmul.mubr.msk.f32.gmra.mxu0 %vm365_vm1, %v6584_v11  ;;  %v6652_v23 = vld [vmem:[%s6549_s13 + $0x68] sm:$0xff]  ;;  %v6658_v25 = vld [vmem:[%s6549_s13 + $0x78] sm:$0xff]  ;;  %v6672_v27 = vld [vmem:[%s6549_s13 + $0x80] sm:$0xff] }
  0x22   : > { %5760 = vmatmul.mubr.msk.f32.gmra.mxu1 %vm365_vm1, %v6587_v12  ;;  %5738 = vmatprep.mubr.msk.f32.mxu0 %vm365_vm1, %v6594_v13  ;;  %v6655_v24 = vld [vmem:[%s6549_s13 + $0x128] sm:$0xff]  ;;  %v6661_v26 = vld [vmem:[%s6549_s13 + $0x138] sm:$0xff]  ;;  %v6675_v28 = vld [vmem:[%s6549_s13 + $0x140] sm:$0xff]  ;;  %p6378_p5 = pnand %p6377_p3, %p6371_p0 }
  0x23   : > { %5762 = vmatprep.mubr.msk.f32.mxu1 %vm365_vm1, %v6597_v14  ;;  %v6678_v29 = vld [vmem:[%s6549_s13 + $0x90] sm:$0xff]  ;;  %v6692_v31 = vld [vmem:[%s6549_s13 + $0x98] sm:$0xff]  ;;  %v6698_v33 = vld [vmem:[%s6549_s13 + $0xa8] sm:$0xff] }
  0x24   : > { %v6681_v30 = vld [vmem:[%s6549_s13 + $0x150] sm:$0xff]  ;;  %v6695_v32 = vld [vmem:[%s6549_s13 + $0x158] sm:$0xff]  ;;  %v6701_v34 = vld [vmem:[%s6549_s13 + $0x168] sm:$0xff] }
  0x25   : > { %5739 = vmatmul.mubr.msk.f32.gmra.mxu0 %vm365_vm1, %v6612_v15  ;;  %v6712_v35 = vld [vmem:[%s6549_s13 + $0xb0] sm:$0xff]  ;;  %v787_v37 = vld [vmem:[%s6549_s13 + $0x1] sm:$0xff]  ;;  %v6728_v41 = vld [vmem:[%s6549_s13 + $0x19] sm:$0xff] }
  0x26   : > { %5763 = vmatmul.mubr.msk.f32.gmra.mxu1 %vm365_vm1, %v6615_v16  ;;  %5741 = vmatprep.mubr.msk.f32.mxu0 %vm365_vm1, %v6618_v17  ;;  %v6715_v36 = vld [vmem:[%s6549_s13 + $0x170] sm:$0xff]  ;;  %v1240_v38 = vld [vmem:[%s6549_s13 + $0x2] sm:$0xff]  ;;  %v6731_v42 = vld [vmem:[%s6549_s13 + $0x1a] sm:$0xff] }
  0x27   : > { %5765 = vmatprep.mubr.msk.f32.mxu1 %vm365_vm1, %v6621_v18  ;;  %8320 = vst [vmem:[#allocation6_spill] sm:$0xff] %v6715_v36  ;;  %v788_v39 = vld [vmem:[%s6549_s13 + $0x9] sm:$0xff]  ;;  %8321 = vst [vmem:[#allocation7_spill] sm:$0xff] %v6731_v42  ;;  %v6750_v45 = vld [vmem:[%s6549_s13 + $0x21] sm:$0xff] }
  0x28   : > { %v1241_v40 = vld [vmem:[%s6549_s13 + $0xa] sm:$0xff]  ;;  %v6753_v46 = vld [vmem:[%s6549_s13 + $0x22] sm:$0xff]  ;;  %v6763_v48 = vld [vmem:[%s6549_s13 + $0x32] sm:$0xff] }
  0x29   : > { %5742 = vmatmul.mubr.msk.f32.gmra.mxu0 %vm365_vm1, %v6632_v19  ;;  %8322 = vst [vmem:[#allocation8_spill] sm:$0xff] %v6753_v46  ;;  %v6760_v47 = vld [vmem:[%s6549_s13 + $0x31] sm:$0xff]  ;;  %8323 = vst [vmem:[#allocation9_spill] sm:$0xff] %v6763_v48  ;;  %v6778_v49 = vld [vmem:[%s6549_s13 + $0x39] sm:$0xff] }
  0x2a   : > { %5766 = vmatmul.mubr.msk.f32.gmra.mxu1 %vm365_vm1, %v6635_v20  ;;  %5744 = vmatprep.mubr.msk.f32.mxu0 %vm365_vm1, %v6638_v21  ;;  %v6781_v50 = vld [vmem:[%s6549_s13 + $0x3a] sm:$0xff]  ;;  %v6784_v51 = vld [vmem:[%s6549_s13 + $0x49] sm:$0xff]  ;;  %v6798_v53 = vld [vmem:[%s6549_s13 + $0x51] sm:$0xff] }
  0x2b   : > { %5768 = vmatprep.mubr.msk.f32.mxu1 %vm365_vm1, %v6641_v22  ;;  %8324 = vst [vmem:[#allocation10_spill] sm:$0xff] %v6781_v50  ;;  %v6787_v52 = vld [vmem:[%s6549_s13 + $0x4a] sm:$0xff]  ;;  %v6801_v54 = vld [vmem:[%s6549_s13 + $0x52] sm:$0xff]  ;;  %v6804_v55 = vld [vmem:[%s6549_s13 + $0x61] sm:$0xff] }
  0x2c   : > { %8325 = vst [vmem:[#allocation11_spill] sm:$0xff] %v6787_v52  ;;  %8326 = vst [vmem:[#allocation12_spill] sm:$0xff] %v6801_v54  ;;  %v6807_v56 = vld [vmem:[%s6549_s13 + $0x62] sm:$0xff]  ;;  %v6821_v58 = vld [vmem:[%s6549_s13 + $0x6a] sm:$0xff] }
  0x2d   : > { %5745 = vmatmul.mubr.msk.f32.gmra.mxu0 %vm365_vm1, %v6652_v23  ;;  %8327 = vst [vmem:[#allocation13_spill] sm:$0xff] %v6807_v56  ;;  %v6818_v57 = vld [vmem:[%s6549_s13 + $0x69] sm:$0xff]  ;;  %8328 = vst [vmem:[#allocation14_spill] sm:$0xff] %v6821_v58  ;;  %v6824_v59 = vld [vmem:[%s6549_s13 + $0x79] sm:$0xff] }
  0x2e   : > { %5769 = vmatmul.mubr.msk.f32.gmra.mxu1 %vm365_vm1, %v6655_v24  ;;  %5747 = vmatprep.mubr.msk.f32.mxu0 %vm365_vm1, %v6658_v25  ;;  %v6827_v60 = vld [vmem:[%s6549_s13 + $0x7a] sm:$0xff]  ;;  %v6841_v62 = vld [vmem:[%s6549_s13 + $0x82] sm:$0xff]  ;;  %v6844_v63 = vld [vmem:[%s6549_s13 + $0x91] sm:$0xff] }
  0x2f   : > { %5771 = vmatprep.mubr.msk.f32.mxu1 %vm365_vm1, %v6661_v26  ;;  %8329 = vst [vmem:[#allocation15_spill] sm:$0xff] %v6827_v60  ;;  %v6838_v61 = vld [vmem:[%s6549_s13 + $0x81] sm:$0xff]  ;;  %8330 = vst [vmem:[#allocation16_spill] sm:$0xff] %v6841_v62  ;;  %v6847_v0 = vld [vmem:[%s6549_s13 + $0x92] sm:$0xff] }
  0x30   : > { %8331 = vst [vmem:[#allocation17_spill] sm:$0xff] %v6847_v0  ;;  %v6858_v1 = vld [vmem:[%s6549_s13 + $0x99] sm:$0xff]  ;;  %v6864_v3 = vld [vmem:[%s6549_s13 + $0xa9] sm:$0xff] }
  0x31   : > { %5748 = vmatmul.mubr.msk.f32.gmra.mxu0 %vm365_vm1, %v6672_v27  ;;  %v6861_v2 = vld [vmem:[%s6549_s13 + $0x9a] sm:$0xff]  ;;  %v6867_v5 = vld [vmem:[%s6549_s13 + $0xaa] sm:$0xff] }
  0x32   : > { %5772 = vmatmul.mubr.msk.f32.gmra.mxu1 %vm365_vm1, %v6675_v28  ;;  %5750 = vmatprep.mubr.msk.f32.mxu0 %vm365_vm1, %v6678_v29  ;;  %8332 = vst [vmem:[#allocation18_spill] sm:$0xff] %v6861_v2  ;;  %8333 = vst [vmem:[#allocation19_spill] sm:$0xff] %v6867_v5 }
  0x33   : > { %5774 = vmatprep.mubr.msk.f32.mxu1 %vm365_vm1, %v6681_v30 }
  0x35   : > { %5751 = vmatmul.mubr.msk.f32.gmra.mxu0 %vm365_vm1, %v6692_v31 }
  0x36   : > { %5775 = vmatmul.mubr.msk.f32.gmra.mxu1 %vm365_vm1, %v6695_v32  ;;  %5753 = vmatprep.mubr.msk.f32.mxu0 %vm365_vm1, %v6698_v33 }
  0x37   : > { %5777 = vmatprep.mubr.msk.f32.mxu1 %vm365_vm1, %v6701_v34 }
  0x39   : > { %5754 = vmatmul.mubr.msk.f32.gmra.mxu0 %vm365_vm1, %v6712_v35 }
  0x3a   : > { %5778 = vmatmul.mubr.msk.f32.gmra.mxu1 %vm365_vm1, %v6715_v36  ;;  %5832 = vmatprep.mubr.msk.f32.mxu0 %vm365_vm1, %v1240_v38  ;;  %v6887_v38 = vld [vmem:[%s6549_s13 + $0xc2] sm:$0xff]  ;;  %v7027_v36 = vld [vmem:[%s6549_s13 + $0x16a] sm:$0xff] }
  0x3b   : > { %5782 = vmatprep.mubr.msk.f32.mxu1 %vm365_vm1, %v787_v37  ;;  %v6884_v37 = vld [vmem:[%s6549_s13 + $0xc1] sm:$0xff]  ;;  %8335 = vst [vmem:[#allocation21_spill] sm:$0xff] %v6887_v38  ;;  %8355 = vst [vmem:[#allocation41_spill] sm:$0xff] %v7027_v36 }
  0x3d   : > { %5833 = vmatmul.mubr.msk.f32.vlgmr.msra.gmra.mxu0 %vm365_vm1, %v1241_v40  ;;  %v6901_v40 = vld [vmem:[%s6549_s13 + $0xca] sm:$0xff] }
  0x3e   : > { %5783 = vmatmul.mubr.msk.f32.vlgmr.msra.gmra.mxu1 %vm365_vm1, %v788_v39  ;;  %5931 = vmatpush3.msk.msra.mxu0 %vm462_vm0, %v6579_v10  ;;  %v6881_v10 = vld [vmem:[%s6549_s13 + $0xb2] sm:$0xff]  ;;  %v6898_v39 = vld [vmem:[%s6549_s13 + $0xc9] sm:$0xff]  ;;  %8336 = vst [vmem:[#allocation22_spill] sm:$0xff] %v6901_v40 }
  0x3f   : > { %5881 = vmatpush3.msk.msra.mxu1 %vm462_vm0, %v6574_v9  ;;  %5785 = vmatprep.mubr.msk.f32.mxu1 %vm365_vm1, %v6728_v41  ;;  %v6878_v9 = vld [vmem:[%s6549_s13 + $0xb1] sm:$0xff]  ;;  %8334 = vst [vmem:[#allocation20_spill] sm:$0xff] %v6881_v10 }
  0x40   : > { %5835 = vmatprep.mubr.msk.f32.mxu0 %vm365_vm1, %v6731_v42  ;;  %5980 = vmatprep.subr.msk.mxu1 %vm462_vm0, %v6738_v43  ;;  %v7024_v42 = vld [vmem:[%s6549_s13 + $0x169] sm:$0xff] }
  0x41   : > { %6030 = vmatprep.subr.msk.mxu0 %vm462_vm0, %v6743_v44  ;;  %5836 = vmatmul.mubr.msk.f32.gmra.mxu0 %vm365_vm1, %v6753_v46  ;;  %v7007_v46 = vld [vmem:[%s6549_s13 + $0x152] sm:$0xff] }
  0x42   : > { %5786 = vmatmul.mubr.msk.f32.gmra.mxu1 %vm365_vm1, %v6750_v45  ;;  %5838 = vmatprep.mubr.msk.f32.mxu0 %vm365_vm1, %v6763_v48  ;;  %v7004_v48 = vld [vmem:[%s6549_s13 + $0x151] sm:$0xff]  ;;  %8352 = vst [vmem:[#allocation38_spill] sm:$0xff] %v7007_v46 }
  0x43   : > { %5788 = vmatprep.mubr.msk.f32.mxu1 %vm365_vm1, %v6760_v47  ;;  %8351 = vst [vmem:[#allocation37_spill] sm:$0xff] %v7004_v48 }
  0x45   : > { %5839 = vmatmul.mubr.msk.f32.gmra.mxu0 %vm365_vm1, %v6781_v50  ;;  %v6987_v50 = vld [vmem:[%s6549_s13 + $0x13a] sm:$0xff] }
  0x46   : > { %5789 = vmatmul.mubr.msk.f32.gmra.mxu1 %vm365_vm1, %v6778_v49  ;;  %5841 = vmatprep.mubr.msk.f32.mxu0 %vm365_vm1, %v6787_v52  ;;  %v6984_v52 = vld [vmem:[%s6549_s13 + $0x139] sm:$0xff]  ;;  %8348 = vst [vmem:[#allocation34_spill] sm:$0xff] %v6987_v50 }
  0x47   : > { %5791 = vmatprep.mubr.msk.f32.mxu1 %vm365_vm1, %v6784_v51  ;;  %8347 = vst [vmem:[#allocation33_spill] sm:$0xff] %v6984_v52 }
  0x49   : > { %5842 = vmatmul.mubr.msk.f32.gmra.mxu0 %vm365_vm1, %v6801_v54  ;;  %v6967_v54 = vld [vmem:[%s6549_s13 + $0x122] sm:$0xff] }
  0x4a   : > { %5792 = vmatmul.mubr.msk.f32.gmra.mxu1 %vm365_vm1, %v6798_v53  ;;  %5844 = vmatprep.mubr.msk.f32.mxu0 %vm365_vm1, %v6807_v56  ;;  %v6964_v56 = vld [vmem:[%s6549_s13 + $0x121] sm:$0xff]  ;;  %8344 = vst [vmem:[#allocation30_spill] sm:$0xff] %v6967_v54 }
  0x4b   : > { %5794 = vmatprep.mubr.msk.f32.mxu1 %vm365_vm1, %v6804_v55  ;;  %8343 = vst [vmem:[#allocation29_spill] sm:$0xff] %v6964_v56 }
  0x4d   : > { %5845 = vmatmul.mubr.msk.f32.gmra.mxu0 %vm365_vm1, %v6821_v58  ;;  %v6947_v58 = vld [vmem:[%s6549_s13 + $0x10a] sm:$0xff] }
  0x4e   : > { %5795 = vmatmul.mubr.msk.f32.gmra.mxu1 %vm365_vm1, %v6818_v57  ;;  %5847 = vmatprep.mubr.msk.f32.mxu0 %vm365_vm1, %v6827_v60  ;;  %v6944_v60 = vld [vmem:[%s6549_s13 + $0x109] sm:$0xff]  ;;  %8341 = vst [vmem:[#allocation27_spill] sm:$0xff] %v6947_v58 }
  0x4f   : > { %5797 = vmatprep.mubr.msk.f32.mxu1 %vm365_vm1, %v6824_v59 }
  0x51   : > { %5848 = vmatmul.mubr.msk.f32.gmra.mxu0 %vm365_vm1, %v6841_v62  ;;  %v6927_v62 = vld [vmem:[%s6549_s13 + $0xf2] sm:$0xff] }
  0x52   : > { %5798 = vmatmul.mubr.msk.f32.gmra.mxu1 %vm365_vm1, %v6838_v61  ;;  %5850 = vmatprep.mubr.msk.f32.mxu0 %vm365_vm1, %v6847_v0  ;;  %v6924_v0 = vld [vmem:[%s6549_s13 + $0xf1] sm:$0xff]  ;;  %8339 = vst [vmem:[#allocation25_spill] sm:$0xff] %v6927_v62 }
  0x53   : > { %5800 = vmatprep.mubr.msk.f32.mxu1 %vm365_vm1, %v6844_v63 }
  0x55   : > { %5851 = vmatmul.mubr.msk.f32.gmra.mxu0 %vm365_vm1, %v6861_v2  ;;  %v6907_v2 = vld [vmem:[%s6549_s13 + $0xda] sm:$0xff] }
  0x56   : > { %5801 = vmatmul.mubr.msk.f32.gmra.mxu1 %vm365_vm1, %v6858_v1  ;;  %5853 = vmatprep.mubr.msk.f32.mxu0 %vm365_vm1, %v6867_v5  ;;  %v6904_v5 = vld [vmem:[%s6549_s13 + $0xd9] sm:$0xff]  ;;  %8337 = vst [vmem:[#allocation23_spill] sm:$0xff] %v6907_v2 }
  0x57   : > { %5803 = vmatprep.mubr.msk.f32.mxu1 %vm365_vm1, %v6864_v3 }
  0x59   : > { %5854 = vmatmul.mubr.msk.f32.gmra.mxu0 %vm365_vm1, %v6881_v10  ;;  %v6921_v10 = vld [vmem:[%s6549_s13 + $0xe2] sm:$0xff] }
  0x5a   : > { %5804 = vmatmul.mubr.msk.f32.gmra.mxu1 %vm365_vm1, %v6878_v9  ;;  %5856 = vmatprep.mubr.msk.f32.mxu0 %vm365_vm1, %v6887_v38  ;;  %v6918_v38 = vld [vmem:[%s6549_s13 + $0xe1] sm:$0xff]  ;;  %8338 = vst [vmem:[#allocation24_spill] sm:$0xff] %v6921_v10 }
  0x5b   : > { %5806 = vmatprep.mubr.msk.f32.mxu1 %vm365_vm1, %v6884_v37 }
  0x5d   : > { %5857 = vmatmul.mubr.msk.f32.gmra.mxu0 %vm365_vm1, %v6901_v40  ;;  %v6941_v40 = vld [vmem:[%s6549_s13 + $0xfa] sm:$0xff] }
  0x5e   : > { %5807 = vmatmul.mubr.msk.f32.gmra.mxu1 %vm365_vm1, %v6898_v39  ;;  %5859 = vmatprep.mubr.msk.f32.mxu0 %vm365_vm1, %v6907_v2  ;;  %v6938_v2 = vld [vmem:[%s6549_s13 + $0xf9] sm:$0xff]  ;;  %8340 = vst [vmem:[#allocation26_spill] sm:$0xff] %v6941_v40 }
  0x5f   : > { %5809 = vmatprep.mubr.msk.f32.mxu1 %vm365_vm1, %v6904_v5 }
  0x61   : > { %5860 = vmatmul.mubr.msk.f32.gmra.mxu0 %vm365_vm1, %v6921_v10  ;;  %v6961_v10 = vld [vmem:[%s6549_s13 + $0x112] sm:$0xff] }
  0x62   : > { %5810 = vmatmul.mubr.msk.f32.gmra.mxu1 %vm365_vm1, %v6918_v38  ;;  %5862 = vmatprep.mubr.msk.f32.mxu0 %vm365_vm1, %v6927_v62  ;;  %v6958_v62 = vld [vmem:[%s6549_s13 + $0x111] sm:$0xff]  ;;  %8342 = vst [vmem:[#allocation28_spill] sm:$0xff] %v6961_v10 }
  0x63   : > { %5812 = vmatprep.mubr.msk.f32.mxu1 %vm365_vm1, %v6924_v0 }
  0x65   : > { %5863 = vmatmul.mubr.msk.f32.gmra.mxu0 %vm365_vm1, %v6941_v40  ;;  %v6981_v40 = vld [vmem:[%s6549_s13 + $0x12a] sm:$0xff] }
  0x66   : > { %5813 = vmatmul.mubr.msk.f32.gmra.mxu1 %vm365_vm1, %v6938_v2  ;;  %5865 = vmatprep.mubr.msk.f32.mxu0 %vm365_vm1, %v6947_v58  ;;  %v6978_v58 = vld [vmem:[%s6549_s13 + $0x129] sm:$0xff]  ;;  %8346 = vst [vmem:[#allocation32_spill] sm:$0xff] %v6981_v40 }
  0x67   : > { %5815 = vmatprep.mubr.msk.f32.mxu1 %vm365_vm1, %v6944_v60  ;;  %8345 = vst [vmem:[#allocation31_spill] sm:$0xff] %v6978_v58 }
  0x69   : > { %5866 = vmatmul.mubr.msk.f32.gmra.mxu0 %vm365_vm1, %v6961_v10  ;;  %v7001_v10 = vld [vmem:[%s6549_s13 + $0x142] sm:$0xff] }
  0x6a   : > { %5816 = vmatmul.mubr.msk.f32.gmra.mxu1 %vm365_vm1, %v6958_v62  ;;  %5868 = vmatprep.mubr.msk.f32.mxu0 %vm365_vm1, %v6967_v54  ;;  %v6998_v54 = vld [vmem:[%s6549_s13 + $0x141] sm:$0xff]  ;;  %8350 = vst [vmem:[#allocation36_spill] sm:$0xff] %v7001_v10 }
  0x6b   : > { %5818 = vmatprep.mubr.msk.f32.mxu1 %vm365_vm1, %v6964_v56  ;;  %8349 = vst [vmem:[#allocation35_spill] sm:$0xff] %v6998_v54 }
  0x6d   : > { %5869 = vmatmul.mubr.msk.f32.gmra.mxu0 %vm365_vm1, %v6981_v40  ;;  %v7021_v40 = vld [vmem:[%s6549_s13 + $0x15a] sm:$0xff] }
  0x6e   : > { %5819 = vmatmul.mubr.msk.f32.gmra.mxu1 %vm365_vm1, %v6978_v58  ;;  %5871 = vmatprep.mubr.msk.f32.mxu0 %vm365_vm1, %v6987_v50  ;;  %v7018_v50 = vld [vmem:[%s6549_s13 + $0x159] sm:$0xff]  ;;  %8354 = vst [vmem:[#allocation40_spill] sm:$0xff] %v7021_v40 }
  0x6f   : > { %5821 = vmatprep.mubr.msk.f32.mxu1 %vm365_vm1, %v6984_v52  ;;  %8353 = vst [vmem:[#allocation39_spill] sm:$0xff] %v7018_v50 }
  0x71   : > { %5872 = vmatmul.mubr.msk.f32.gmra.mxu0 %vm365_vm1, %v7001_v10  ;;  %v7041_v10 = vld [vmem:[%s6549_s13 + $0x172] sm:$0xff] }
  0x72   : > { %5822 = vmatmul.mubr.msk.f32.gmra.mxu1 %vm365_vm1, %v6998_v54  ;;  %5874 = vmatprep.mubr.msk.f32.mxu0 %vm365_vm1, %v7007_v46  ;;  %v7038_v46 = vld [vmem:[%s6549_s13 + $0x171] sm:$0xff]  ;;  %8356 = vst [vmem:[#allocation42_spill] sm:$0xff] %v7041_v10 }
  0x73   : > { %5824 = vmatprep.mubr.msk.f32.mxu1 %vm365_vm1, %v7004_v48 }
  0x75   : > { %5875 = vmatmul.mubr.msk.f32.gmra.mxu0 %vm365_vm1, %v7021_v40 }
  0x76   : > { %5825 = vmatmul.mubr.msk.f32.gmra.mxu1 %vm365_vm1, %v7018_v50  ;;  %5877 = vmatprep.mubr.msk.f32.mxu0 %vm365_vm1, %v7027_v36  ;;  %v7058_v36 = vld [vmem:[%s8247_s1 + $0x1c] sm:$0xf] }
  0x77   : > { %5827 = vmatprep.mubr.msk.f32.mxu1 %vm365_vm1, %v7024_v42 }
  0x79   : > { %5878 = vmatmul.mubr.msk.f32.gmra.mxu0 %vm365_vm1, %v7041_v10  ;;  %v7063_v10 = vld [vmem:[%s8247_s1 + $0x20] sm:$0xf] }
  0x7a   : > { %5828 = vmatmul.mubr.msk.f32.gmra.mxu1 %vm365_vm1, %v7038_v46  ;;  %5932 = vmatprep.mubr.msk.f32.mxu0 %vm365_vm1, %v6728_v41  ;;  %v8358_v41 = vld [vmem:[#allocation6_spill] sm:$0xff] }
  0x7b   : > { %5882 = vmatprep.mubr.msk.f32.mxu1 %vm365_vm1, %v6563_v7  ;;  %v7182_v7 = vld [vmem:[%s6549_s13 + $0x180] sm:$0xff] }
  0x7d   : > { %5933 = vmatmul.mubr.msk.f32.vlgmr.msra.gmra.mxu0 %vm365_vm1, %v6750_v45  ;;  %v8361_v45 = vld [vmem:[#allocation8_spill] sm:$0xff] }
  0x7e   : > { %5883 = vmatmul.mubr.msk.f32.vlgmr.msra.gmra.mxu1 %vm365_vm1, %v6584_v11  ;;  %6031 = vmatpush3.msk.msra.mxu0 %vm462_vm0, %v6743_v44  ;;  %v7185_v11 = vld [vmem:[%s6549_s13 + $0x181] sm:$0xff]  ;;  %v7199_v44 = vld [vmem:[%s6549_s13 + $0x189] sm:$0xff] }
  0x7f   : > { %5981 = vmatpush3.msk.msra.mxu1 %vm462_vm0, %v6738_v43  ;;  %5885 = vmatprep.mubr.msk.f32.mxu1 %vm365_vm1, %v6594_v13  ;;  %8357 = vst [vmem:[#allocation43_spill] sm:$0xff] %v7185_v11  ;;  %v7196_v43 = vld [vmem:[%s6549_s13 + $0x188] sm:$0xff]  ;;  %8359 = vst [vmem:[#allocation6_spill] sm:$0xff] %v7199_v44 }
  0x80   : > { %5935 = vmatprep.mubr.msk.f32.mxu0 %vm365_vm1, %v6760_v47  ;;  %6080 = vmatprep.subr.msk.mxu1 %vm462_vm0, %v7058_v36 }
  0x81   : > { %6130 = vmatprep.subr.msk.mxu0 %vm462_vm0, %v7063_v10  ;;  %5936 = vmatmul.mubr.msk.f32.gmra.mxu0 %vm365_vm1, %v6778_v49 }
  0x82   : > { %5886 = vmatmul.mubr.msk.f32.gmra.mxu1 %vm365_vm1, %v6612_v15  ;;  %5938 = vmatprep.mubr.msk.f32.mxu0 %vm365_vm1, %v6784_v51 }
  0x83   : > { %5888 = vmatprep.mubr.msk.f32.mxu1 %vm365_vm1, %v6618_v17 }
  0x85   : > { %5939 = vmatmul.mubr.msk.f32.gmra.mxu0 %vm365_vm1, %v6798_v53 }
  0x86   : > { %5889 = vmatmul.mubr.msk.f32.gmra.mxu1 %vm365_vm1, %v6632_v19  ;;  %5941 = vmatprep.mubr.msk.f32.mxu0 %vm365_vm1, %v6804_v55 }
  0x87   : > { %5891 = vmatprep.mubr.msk.f32.mxu1 %vm365_vm1, %v6638_v21 }
  0x89   : > { %5942 = vmatmul.mubr.msk.f32.gmra.mxu0 %vm365_vm1, %v6818_v57 }
  0x8a   : > { %5892 = vmatmul.mubr.msk.f32.gmra.mxu1 %vm365_vm1, %v6652_v23  ;;  %5944 = vmatprep.mubr.msk.f32.mxu0 %vm365_vm1, %v6824_v59 }
  0x8b   : > { %5894 = vmatprep.mubr.msk.f32.mxu1 %vm365_vm1, %v6658_v25 }
  0x8d   : > { %5945 = vmatmul.mubr.msk.f32.gmra.mxu0 %vm365_vm1, %v6838_v61 }
  0x8e   : > { %5895 = vmatmul.mubr.msk.f32.gmra.mxu1 %vm365_vm1, %v6672_v27  ;;  %5947 = vmatprep.mubr.msk.f32.mxu0 %vm365_vm1, %v6844_v63 }
  0x8f   : > { %5897 = vmatprep.mubr.msk.f32.mxu1 %vm365_vm1, %v6678_v29 }
  0x91   : > { %5948 = vmatmul.mubr.msk.f32.gmra.mxu0 %vm365_vm1, %v6858_v1 }
  0x92   : > { %5898 = vmatmul.mubr.msk.f32.gmra.mxu1 %vm365_vm1, %v6692_v31  ;;  %5950 = vmatprep.mubr.msk.f32.mxu0 %vm365_vm1, %v6864_v3 }
  0x93   : > { %5900 = vmatprep.mubr.msk.f32.mxu1 %vm365_vm1, %v6698_v33 }
  0x95   : > { %5951 = vmatmul.mubr.msk.f32.gmra.mxu0 %vm365_vm1, %v6878_v9 }
  0x96   : > { %5901 = vmatmul.mubr.msk.f32.gmra.mxu1 %vm365_vm1, %v6712_v35  ;;  %5953 = vmatprep.mubr.msk.f32.mxu0 %vm365_vm1, %v6884_v37 }
  0x97   : > { %5903 = vmatprep.mubr.msk.f32.mxu1 %vm365_vm1, %v6553_v4 }
  0x99   : > { %5954 = vmatmul.mubr.msk.f32.gmra.mxu0 %vm365_vm1, %v6898_v39 }
  0x9a   : > { %5904 = vmatmul.mubr.msk.f32.gmra.mxu1 %vm365_vm1, %v6560_v6  ;;  %5956 = vmatprep.mubr.msk.f32.mxu0 %vm365_vm1, %v6904_v5 }
  0x9b   : > { %5906 = vmatprep.mubr.msk.f32.mxu1 %vm365_vm1, %v6566_v8 }
  0x9d   : > { %5957 = vmatmul.mubr.msk.f32.gmra.mxu0 %vm365_vm1, %v6918_v38 }
  0x9e   : > { %5907 = vmatmul.mubr.msk.f32.gmra.mxu1 %vm365_vm1, %v6587_v12  ;;  %5959 = vmatprep.mubr.msk.f32.mxu0 %vm365_vm1, %v6924_v0 }
  0x9f   : > { %5909 = vmatprep.mubr.msk.f32.mxu1 %vm365_vm1, %v6597_v14 }
  0xa1   : > { %5960 = vmatmul.mubr.msk.f32.gmra.mxu0 %vm365_vm1, %v6938_v2 }
  0xa2   : > { %5910 = vmatmul.mubr.msk.f32.gmra.mxu1 %vm365_vm1, %v6615_v16  ;;  %5962 = vmatprep.mubr.msk.f32.mxu0 %vm365_vm1, %v6944_v60 }
  0xa3   : > { %5912 = vmatprep.mubr.msk.f32.mxu1 %vm365_vm1, %v6621_v18 }
  0xa5   : > { %5963 = vmatmul.mubr.msk.f32.gmra.mxu0 %vm365_vm1, %v6958_v62 }
  0xa6   : > { %5913 = vmatmul.mubr.msk.f32.gmra.mxu1 %vm365_vm1, %v6635_v20  ;;  %5965 = vmatprep.mubr.msk.f32.mxu0 %vm365_vm1, %v6964_v56 }
  0xa7   : > { %5915 = vmatprep.mubr.msk.f32.mxu1 %vm365_vm1, %v6641_v22 }
  0xa9   : > { %5966 = vmatmul.mubr.msk.f32.gmra.mxu0 %vm365_vm1, %v6978_v58 }
  0xaa   : > { %5916 = vmatmul.mubr.msk.f32.gmra.mxu1 %vm365_vm1, %v6655_v24  ;;  %5968 = vmatprep.mubr.msk.f32.mxu0 %vm365_vm1, %v6984_v52  ;;  %v8384_v52 = vld [vmem:[#allocation28_spill] sm:$0xff] }
  0xab   : > { %5918 = vmatprep.mubr.msk.f32.mxu1 %vm365_vm1, %v6661_v26 }
  0xad   : > { %5969 = vmatmul.mubr.msk.f32.gmra.mxu0 %vm365_vm1, %v6998_v54 }
  0xae   : > { %5919 = vmatmul.mubr.msk.f32.gmra.mxu1 %vm365_vm1, %v6675_v28  ;;  %5971 = vmatprep.mubr.msk.f32.mxu0 %vm365_vm1, %v7004_v48 }
  0xaf   : > { %5921 = vmatprep.mubr.msk.f32.mxu1 %vm365_vm1, %v6681_v30 }
  0xb1   : > { %5972 = vmatmul.mubr.msk.f32.gmra.mxu0 %vm365_vm1, %v7018_v50 }
  0xb2   : > { %5922 = vmatmul.mubr.msk.f32.gmra.mxu1 %vm365_vm1, %v6695_v32  ;;  %5974 = vmatprep.mubr.msk.f32.mxu0 %vm365_vm1, %v7024_v42  ;;  %v8360_v42 = vld [vmem:[#allocation7_spill] sm:$0xff] }
  0xb3   : > { %5924 = vmatprep.mubr.msk.f32.mxu1 %vm365_vm1, %v6701_v34 }
  0xb5   : > { %5975 = vmatmul.mubr.msk.f32.gmra.mxu0 %vm365_vm1, %v7038_v46  ;;  %v8362_v46 = vld [vmem:[#allocation9_spill] sm:$0xff] }
  0xb6   : > { %5925 = vmatmul.mubr.msk.f32.gmra.mxu1 %vm365_vm1, %v8358_v41  ;;  %5977 = vmatprep.mubr.msk.f32.mxu0 %vm365_vm1, %v7185_v11  ;;  %v8380_v11 = vld [vmem:[#allocation26_spill] sm:$0xff] }
  0xb7   : > { %5927 = vmatprep.mubr.msk.f32.mxu1 %vm365_vm1, %v7182_v7 }
  0xb9   : > { %5978 = vmatmul.mubr.msk.f32.gmra.mxu0 %vm365_vm1, %v7199_v44 }
  0xba   : > { %5928 = vmatmul.mubr.msk.f32.gmra.mxu1 %vm365_vm1, %v7196_v43  ;;  %6032 = vmatprep.mubr.msk.f32.mxu0 %vm365_vm1, %v6594_v13  ;;  %v8364_v13 = vld [vmem:[#allocation11_spill] sm:$0xff] }
  0xbb   : > { %5982 = vmatprep.mubr.msk.f32.mxu1 %vm365_vm1, %v8360_v42  ;;  %v8363_v42 = vld [vmem:[#allocation10_spill] sm:$0xff] }
  0xbd   : > { %6033 = vmatmul.mubr.msk.f32.vlgmr.msra.gmra.mxu0 %vm365_vm1, %v6612_v15  ;;  %v8365_v15 = vld [vmem:[#allocation12_spill] sm:$0xff] }
  0xbe   : > { %5983 = vmatmul.mubr.msk.f32.vlgmr.msra.gmra.mxu1 %vm365_vm1, %v8361_v45  ;;  %6131 = vmatpush3.msk.msra.mxu0 %vm462_vm0, %v7063_v10  ;;  %v8377_v10 = vld [vmem:[#allocation24_spill] sm:$0xff] }
  0xbf   : > { %6081 = vmatpush3.msk.msra.mxu1 %vm462_vm0, %v7058_v36  ;;  %5985 = vmatprep.mubr.msk.f32.mxu1 %vm365_vm1, %v8362_v46  ;;  %v8366_v36 = vld [vmem:[#allocation13_spill] sm:$0xff] }
  0xc0   : > { %6035 = vmatprep.mubr.msk.f32.mxu0 %vm365_vm1, %v6618_v17  ;;  %v8367_v17 = vld [vmem:[#allocation14_spill] sm:$0xff] }
  0xc1   : > { %6036 = vmatmul.mubr.msk.f32.gmra.mxu0 %vm365_vm1, %v6632_v19  ;;  %v8368_v19 = vld [vmem:[#allocation15_spill] sm:$0xff] }
  0xc2   : > { %5986 = vmatmul.mubr.msk.f32.gmra.mxu1 %vm365_vm1, %v8363_v42  ;;  %6038 = vmatprep.mubr.msk.f32.mxu0 %vm365_vm1, %v6638_v21  ;;  %v8369_v21 = vld [vmem:[#allocation16_spill] sm:$0xff] }
  0xc3   : > { %5988 = vmatprep.mubr.msk.f32.mxu1 %vm365_vm1, %v8364_v13 }
  0xc5   : > { %6039 = vmatmul.mubr.msk.f32.gmra.mxu0 %vm365_vm1, %v6652_v23  ;;  %v8370_v23 = vld [vmem:[#allocation17_spill] sm:$0xff] }
  0xc6   : > { %5989 = vmatmul.mubr.msk.f32.gmra.mxu1 %vm365_vm1, %v8365_v15  ;;  %6041 = vmatprep.mubr.msk.f32.mxu0 %vm365_vm1, %v6658_v25  ;;  %v8371_v25 = vld [vmem:[#allocation18_spill] sm:$0xff] }
  0xc7   : > { %5991 = vmatprep.mubr.msk.f32.mxu1 %vm365_vm1, %v8366_v36 }
  0xc9   : > { %6042 = vmatmul.mubr.msk.f32.gmra.mxu0 %vm365_vm1, %v6672_v27  ;;  %v8372_v27 = vld [vmem:[#allocation19_spill] sm:$0xff] }
  0xca   : > { %5992 = vmatmul.mubr.msk.f32.gmra.mxu1 %vm365_vm1, %v8367_v17  ;;  %6044 = vmatprep.mubr.msk.f32.mxu0 %vm365_vm1, %v6678_v29  ;;  %v8373_v29 = vld [vmem:[#allocation20_spill] sm:$0xff] }
  0xcb   : > { %5994 = vmatprep.mubr.msk.f32.mxu1 %vm365_vm1, %v8368_v19 }
  0xcd   : > { %6045 = vmatmul.mubr.msk.f32.gmra.mxu0 %vm365_vm1, %v6692_v31  ;;  %v8374_v31 = vld [vmem:[#allocation21_spill] sm:$0xff] }
  0xce   : > { %5995 = vmatmul.mubr.msk.f32.gmra.mxu1 %vm365_vm1, %v8369_v21  ;;  %6047 = vmatprep.mubr.msk.f32.mxu0 %vm365_vm1, %v6698_v33  ;;  %v8375_v33 = vld [vmem:[#allocation22_spill] sm:$0xff] }
  0xcf   : > { %5997 = vmatprep.mubr.msk.f32.mxu1 %vm365_vm1, %v8370_v23 }
  0xd1   : > { %6048 = vmatmul.mubr.msk.f32.gmra.mxu0 %vm365_vm1, %v6712_v35  ;;  %v8376_v35 = vld [vmem:[#allocation23_spill] sm:$0xff] }
  0xd2   : > { %5998 = vmatmul.mubr.msk.f32.gmra.mxu1 %vm365_vm1, %v8371_v25  ;;  %6050 = vmatprep.mubr.msk.f32.mxu0 %vm365_vm1, %v6553_v4 }
  0xd3   : > { %6000 = vmatprep.mubr.msk.f32.mxu1 %vm365_vm1, %v8372_v27 }
  0xd5   : > { %6051 = vmatmul.mubr.msk.f32.gmra.mxu0 %vm365_vm1, %v6560_v6 }
  0xd6   : > { %6001 = vmatmul.mubr.msk.f32.gmra.mxu1 %vm365_vm1, %v8373_v29  ;;  %6053 = vmatprep.mubr.msk.f32.mxu0 %vm365_vm1, %v6566_v8  ;;  %v8378_v8 = vld [vmem:[#allocation25_spill] sm:$0xff] }
  0xd7   : > { %6003 = vmatprep.mubr.msk.f32.mxu1 %vm365_vm1, %v8374_v31 }
  0xd9   : > { %6054 = vmatmul.mubr.msk.f32.gmra.mxu0 %vm365_vm1, %v6587_v12 }
  0xda   : > { %6004 = vmatmul.mubr.msk.f32.gmra.mxu1 %vm365_vm1, %v8375_v33  ;;  %6056 = vmatprep.mubr.msk.f32.mxu0 %vm365_vm1, %v6597_v14 }
  0xdb   : > { %6006 = vmatprep.mubr.msk.f32.mxu1 %vm365_vm1, %v8376_v35 }
  0xdd   : > { %v7277_v4 = vpop.f32.mrf.mxu0  ;;  %6057 = vmatmul.mubr.msk.f32.gmra.mxu0 %vm365_vm1, %v6615_v16  ;;  %v8381_v16 = vld [vmem:[#allocation27_spill] sm:$0xff] }
  0xde   : > { %v7279_v6 = vpop.f32.mrf.mxu1  ;;  %6007 = vmatmul.mubr.msk.f32.gmra.mxu1 %vm365_vm1, %v8377_v10  ;;  %6059 = vmatprep.mubr.msk.f32.mxu0 %vm365_vm1, %v6621_v18 }
  0xdf   : > { %6009 = vmatprep.mubr.msk.f32.mxu1 %vm365_vm1, %v8378_v8  ;;  %v7289_v12 = vpop.f32.mrf.mxu0 }
  0xe0   : > { %v7291_v45 = vpop.f32.mrf.mxu1 }
  0xe1   : > { %v7293_v14 = vpop.f32.mrf.mxu0  ;;  %6060 = vmatmul.mubr.msk.f32.gmra.mxu0 %vm365_vm1, %v6635_v20  ;;  %v8385_v20 = vld [vmem:[#allocation30_spill] sm:$0xff] }
  0xe2   : > { %v7295_v44 = vpop.f32.mrf.mxu1  ;;  %6010 = vmatmul.mubr.msk.f32.gmra.mxu1 %vm365_vm1, %v8380_v11  ;;  %6062 = vmatprep.mubr.msk.f32.mxu0 %vm365_vm1, %v6641_v22 }
  0xe3   : > { %8379 = vst [vmem:[#allocation7_spill] sm:$0xff] %v7295_v44  ;;  %6012 = vmatprep.mubr.msk.f32.mxu1 %vm365_vm1, %v8381_v16  ;;  %v7305_v18 = vpop.f32.mrf.mxu0  ;;  %v8392_v44 = vld [vmem:[#allocation36_spill] sm:$0xff] }
  0xe4   : > { %v7307_v50 = vpop.f32.mrf.mxu1 }
  0xe5   : > { %8382 = vst [vmem:[#allocation8_spill] sm:$0xff] %v7307_v50  ;;  %v7309_v48 = vpop.f32.mrf.mxu0  ;;  %6063 = vmatmul.mubr.msk.f32.gmra.mxu0 %vm365_vm1, %v6655_v24  ;;  %v8389_v24 = vld [vmem:[#allocation34_spill] sm:$0xff] }
  0xe6   : > { %v7311_v54 = vpop.f32.mrf.mxu1  ;;  %6013 = vmatmul.mubr.msk.f32.gmra.mxu1 %vm365_vm1, %v8384_v52  ;;  %6065 = vmatprep.mubr.msk.f32.mxu0 %vm365_vm1, %v6661_v26 }
  0xe7   : > { %8383 = vst [vmem:[#allocation9_spill] sm:$0xff] %v7311_v54  ;;  %6015 = vmatprep.mubr.msk.f32.mxu1 %vm365_vm1, %v8385_v20  ;;  %v7321_v22 = vpop.f32.mrf.mxu0  ;;  %v8388_v54 = vld [vmem:[#allocation32_spill] sm:$0xff] }
  0xe8   : > { %v7323_v58 = vpop.f32.mrf.mxu1 }
  0xe9   : > { %8386 = vst [vmem:[#allocation10_spill] sm:$0xff] %v7323_v58  ;;  %v7325_v50 = vpop.f32.mrf.mxu0  ;;  %6066 = vmatmul.mubr.msk.f32.gmra.mxu0 %vm365_vm1, %v6675_v28  ;;  %v8393_v28 = vld [vmem:[#allocation38_spill] sm:$0xff] }
  0xea   : > { %v7327_v56 = vpop.f32.mrf.mxu1  ;;  %6016 = vmatmul.mubr.msk.f32.gmra.mxu1 %vm365_vm1, %v8388_v54  ;;  %6068 = vmatprep.mubr.msk.f32.mxu0 %vm365_vm1, %v6681_v30 }
  0xeb   : > { %8387 = vst [vmem:[#allocation11_spill] sm:$0xff] %v7327_v56  ;;  %6018 = vmatprep.mubr.msk.f32.mxu1 %vm365_vm1, %v8389_v24  ;;  %v7337_v26 = vpop.f32.mrf.mxu0 }
  0xec   : > { %v7339_v20 = vpop.f32.mrf.mxu1 }
  0xed   : > { %8390 = vst [vmem:[#allocation12_spill] sm:$0xff] %v7339_v20  ;;  %v7341_v58 = vpop.f32.mrf.mxu0  ;;  %6069 = vmatmul.mubr.msk.f32.gmra.mxu0 %vm365_vm1, %v6695_v32  ;;  %v8396_v32 = vld [vmem:[#allocation41_spill] sm:$0xff] }
  0xee   : > { %v7343_v56 = vpop.f32.mrf.mxu1  ;;  %6019 = vmatmul.mubr.msk.f32.gmra.mxu1 %vm365_vm1, %v8392_v44  ;;  %6071 = vmatprep.mubr.msk.f32.mxu0 %vm365_vm1, %v6701_v34 }
  0xef   : > { %8391 = vst [vmem:[#allocation13_spill] sm:$0xff] %v7343_v56  ;;  %6021 = vmatprep.mubr.msk.f32.mxu1 %vm365_vm1, %v8393_v28  ;;  %v7353_v30 = vpop.f32.mrf.mxu0  ;;  %v7374_v28 = vld [vmem:[%s6549_s13 + $0x182] sm:$0xff] }
  0xf0   : > { %v7355_v20 = vpop.f32.mrf.mxu1  ;;  %8398 = vst [vmem:[#allocation17_spill] sm:$0xff] %v7374_v28 }
  0xf1   : > { %8394 = vst [vmem:[#allocation14_spill] sm:$0xff] %v7355_v20  ;;  %v7357_v24 = vpop.f32.mrf.mxu0  ;;  %6072 = vmatmul.mubr.msk.f32.gmra.mxu0 %vm365_vm1, %v8358_v41  ;;  %v5229_v41 = vld [vmem:[%s6549_s13 + $0x1a0] sm:$0xff] }
  0xf2   : > { %v7359_v56 = vpop.f32.mrf.mxu1  ;;  %6022 = vmatmul.mubr.msk.f32.gmra.mxu1 %vm365_vm1, %v7021_v40  ;;  %6074 = vmatprep.mubr.msk.f32.mxu0 %vm365_vm1, %v7182_v7  ;;  %v8400_v40 = vld [vmem:[#allocation42_spill] sm:$0xff]  ;;  %v7389_v7 = vld [vmem:[%s6549_s13 + $0x18a] sm:$0xff] }
  0xf3   : > { %8395 = vst [vmem:[#allocation15_spill] sm:$0xff] %v7359_v56  ;;  %6024 = vmatprep.mubr.msk.f32.mxu1 %vm365_vm1, %v8396_v32  ;;  %v7369_v34 = vpop.f32.mrf.mxu0  ;;  %v5228_v56 = vld [vmem:[%s6549_s13 + $0x198] sm:$0xff]  ;;  %8401 = vst [vmem:[#allocation19_spill] sm:$0xff] %v7389_v7 }
  0xf4   : > { %v7371_v20 = vpop.f32.mrf.mxu1 }
  0xf5   : > { %8397 = vst [vmem:[#allocation16_spill] sm:$0xff] %v7371_v20  ;;  %v7377_v44 = vpop.f32.mrf.mxu0  ;;  %6075 = vmatmul.mubr.msk.f32.gmra.mxu0 %vm365_vm1, %v7196_v43 }
  0xf6   : > { %v7379_v54 = vpop.f32.mrf.mxu1  ;;  %6025 = vmatmul.mubr.msk.f32.gmra.mxu1 %vm365_vm1, %v8400_v40  ;;  %6077 = vmatprep.mubr.msk.f32.mxu0 %vm365_vm1, %v5228_v56 }
  0xf7   : > { %8399 = vst [vmem:[#allocation18_spill] sm:$0xff] %v7379_v54  ;;  %6027 = vmatprep.mubr.msk.f32.mxu1 %vm365_vm1, %v7374_v28  ;;  %v7392_v32 = vpop.f32.mrf.mxu0 }
  0xf8   : > { %v7394_v20 = vpop.f32.mrf.mxu1 }
  0xf9   : > { %8402 = vst [vmem:[#allocation20_spill] sm:$0xff] %v7394_v20  ;;  %v7396_v52 = vpop.f32.mrf.mxu0  ;;  %6078 = vmatmul.mubr.msk.f32.gmra.mxu0 %vm365_vm1, %v5229_v41 }
  0xfa   : > { %v7398_v54 = vpop.f32.mrf.mxu1  ;;  %6028 = vmatmul.mubr.msk.f32.gmra.mxu1 %vm365_vm1, %v7389_v7  ;;  %6132 = vmatprep.mubr.msk.f32.mxu0 %vm365_vm1, %v8362_v46 }
  0xfb   : > { %8403 = vst [vmem:[#allocation21_spill] sm:$0xff] %v7398_v54  ;;  %6082 = vmatprep.mubr.msk.f32.mxu1 %vm365_vm1, %v6760_v47  ;;  %v7407_v56 = vpop.f32.mrf.mxu0 }
  0xfc   : > { %v7409_v40 = vpop.f32.mrf.mxu1 }
  0xfd   : > { %8404 = vst [vmem:[#allocation22_spill] sm:$0xff] %v7409_v40  ;;  %v5834_v20 = vpop.f32.mrf.mxu0  ;;  %6133 = vmatmul.mubr.msk.f32.vlgmr.msra.gmra.mxu0 %vm365_vm1, %v8363_v42 }
  0xfe   : > { %v5784_v43 = vpop.f32.mrf.mxu1  ;;  %6083 = vmatmul.mubr.msk.f32.vlgmr.msra.gmra.mxu1 %vm365_vm1, %v6778_v49  ;;  %6135 = vmatprep.mubr.msk.f32.mxu0 %vm365_vm1, %v8364_v13 }
  0xff   : > { %v1145_v41 = vadd.f32 %v5784_v43, %v7277_v4  ;;  %6085 = vmatprep.mubr.msk.f32.mxu1 %vm365_vm1, %v6784_v51  ;;  %v1438_v46 = vpop.f32.mrf.mxu0 }
 0x100   : > { %v985_v47 = vpop.f32.mrf.mxu1 }
 0x101   : > { %v7420_v54 = vadd.f32 %v5834_v20, %v1145_v41  ;;  %v1144_v40 = vadd.f32 %v985_v47, %v7289_v12  ;;  %v5837_v28 = vpop.f32.mrf.mxu0  ;;  %6136 = vmatmul.mubr.msk.f32.gmra.mxu0 %vm365_vm1, %v8365_v15 }
 0x102   : > { %v5787_v7 = vpop.f32.mrf.mxu1  ;;  %6086 = vmatmul.mubr.msk.f32.gmra.mxu1 %vm365_vm1, %v6798_v53  ;;  %6138 = vmatprep.mubr.msk.f32.mxu0 %vm365_vm1, %v8366_v36 }
 0x103   : > { %v7427_v49 = vadd.f32 %v1438_v46, %v1144_v40  ;;  %v1147_v51 = vadd.f32 %v5787_v7, %v7293_v14  ;;  %6088 = vmatprep.mubr.msk.f32.mxu1 %vm365_vm1, %v6804_v55  ;;  %v1448_v13 = vpop.f32.mrf.mxu0 }
 0x104   : > { %v995_v42 = vpop.f32.mrf.mxu1 }
 0x105   : > { %v7434_v4 = vadd.f32 %v5837_v28, %v1147_v51  ;;  %v1146_v12 = vadd.f32 %v995_v42, %v7305_v18  ;;  %v5840_v20 = vpop.f32.mrf.mxu0  ;;  %6139 = vmatmul.mubr.msk.f32.gmra.mxu0 %vm365_vm1, %v8367_v17 }
 0x106   : > { %v5790_v53 = vpop.f32.mrf.mxu1  ;;  %6089 = vmatmul.mubr.msk.f32.gmra.mxu1 %vm365_vm1, %v6818_v57  ;;  %6141 = vmatprep.mubr.msk.f32.mxu0 %vm365_vm1, %v8368_v19 }
 0x107   : > { %v7441_v15 = vadd.f32 %v1448_v13, %v1146_v12  ;;  %v1149_v55 = vadd.f32 %v5790_v53, %v7309_v48  ;;  %6091 = vmatprep.mubr.msk.f32.mxu1 %vm365_vm1, %v6824_v59  ;;  %v1458_v14 = vpop.f32.mrf.mxu0 }
 0x108   : > { %v1005_v36 = vpop.f32.mrf.mxu1 }
 0x109   : > { %v7448_v18 = vadd.f32 %v5840_v20, %v1149_v55  ;;  %v1148_v28 = vadd.f32 %v1005_v36, %v7321_v22  ;;  %v5843_v7 = vpop.f32.mrf.mxu0  ;;  %6142 = vmatmul.mubr.msk.f32.gmra.mxu0 %vm365_vm1, %v8369_v21 }
 0x10a   : > { %v5793_v57 = vpop.f32.mrf.mxu1  ;;  %6092 = vmatmul.mubr.msk.f32.gmra.mxu1 %vm365_vm1, %v6838_v61  ;;  %6144 = vmatprep.mubr.msk.f32.mxu0 %vm365_vm1, %v8370_v23 }
 0x10b   : > { %v7455_v48 = vadd.f32 %v1458_v14, %v1148_v28  ;;  %v1151_v59 = vadd.f32 %v5793_v57, %v7325_v50  ;;  %6094 = vmatprep.mubr.msk.f32.mxu1 %vm365_vm1, %v6844_v63  ;;  %v1468_v19 = vpop.f32.mrf.mxu0  ;;  %v8407_v14 = vld [vmem:[#allocation29_spill] sm:$0xff] }
 0x10c   : > { %v1015_v17 = vpop.f32.mrf.mxu1 }
 0x10d   : > { %v7462_v22 = vadd.f32 %v5843_v7, %v1151_v59  ;;  %v1150_v40 = vadd.f32 %v1015_v17, %v7337_v26  ;;  %v5846_v43 = vpop.f32.mrf.mxu0  ;;  %6145 = vmatmul.mubr.msk.f32.gmra.mxu0 %vm365_vm1, %v8371_v25  ;;  %v8409_v7 = vld [vmem:[#allocation8_spill] sm:$0xff] }
 0x10e   : > { %v5796_v61 = vpop.f32.mrf.mxu1  ;;  %6095 = vmatmul.mubr.msk.f32.gmra.mxu1 %vm365_vm1, %v6858_v1  ;;  %6147 = vmatprep.mubr.msk.f32.mxu0 %vm365_vm1, %v8372_v27 }
 0x10f   : > { %v7469_v50 = vadd.f32 %v1468_v19, %v1150_v40  ;;  %v1153_v63 = vadd.f32 %v5796_v61, %v7341_v58  ;;  %6097 = vmatprep.mubr.msk.f32.mxu1 %vm365_vm1, %v6864_v3  ;;  %v1478_v23 = vpop.f32.mrf.mxu0  ;;  %v8410_v19 = vld [vmem:[#allocation31_spill] sm:$0xff]  ;;  %v8411_v40 = vld [vmem:[#allocation32_spill] sm:$0xff] }
 0x110   : > { %v1025_v21 = vpop.f32.mrf.mxu1 }
 0x111   : > { %v7476_v26 = vadd.f32 %v5846_v43, %v1153_v63  ;;  %v1152_v41 = vadd.f32 %v1025_v21, %v7353_v30  ;;  %v5849_v47 = vpop.f32.mrf.mxu0  ;;  %6148 = vmatmul.mubr.msk.f32.gmra.mxu0 %vm365_vm1, %v8373_v29  ;;  %v8412_v43 = vld [vmem:[#allocation9_spill] sm:$0xff] }
 0x112   : > { %v5799_v1 = vpop.f32.mrf.mxu1  ;;  %6098 = vmatmul.mubr.msk.f32.gmra.mxu1 %vm365_vm1, %v6878_v9  ;;  %6150 = vmatprep.mubr.msk.f32.mxu0 %vm365_vm1, %v8374_v31  ;;  %v8413_v21 = vld [vmem:[#allocation33_spill] sm:$0xff] }
 0x113   : > { %v7483_v58 = vadd.f32 %v1478_v23, %v1152_v41  ;;  %v1155_v3 = vadd.f32 %v5799_v1, %v7357_v24  ;;  %6100 = vmatprep.mubr.msk.f32.mxu1 %vm365_vm1, %v6884_v37  ;;  %v1488_v27 = vpop.f32.mrf.mxu0  ;;  %v8414_v23 = vld [vmem:[#allocation34_spill] sm:$0xff] }
 0x114   : > { %v1035_v25 = vpop.f32.mrf.mxu1 }
 0x115   : > { %v7490_v30 = vadd.f32 %v5849_v47, %v1155_v3  ;;  %v1154_v46 = vadd.f32 %v1035_v25, %v7369_v34  ;;  %v5852_v51 = vpop.f32.mrf.mxu0  ;;  %6151 = vmatmul.mubr.msk.f32.gmra.mxu0 %vm365_vm1, %v8375_v33  ;;  %v8415_v3 = vld [vmem:[#allocation10_spill] sm:$0xff] }
 0x116   : > { %v5802_v9 = vpop.f32.mrf.mxu1  ;;  %6101 = vmatmul.mubr.msk.f32.gmra.mxu1 %vm365_vm1, %v6898_v39  ;;  %6153 = vmatprep.mubr.msk.f32.mxu0 %vm365_vm1, %v8376_v35 }
 0x117   : > { %v7497_v29 = vadd.f32 %v1488_v27, %v1154_v46  ;;  %v1157_v37 = vadd.f32 %v5802_v9, %v7377_v44  ;;  %6103 = vmatprep.mubr.msk.f32.mxu1 %vm365_vm1, %v6904_v5  ;;  %v1498_v24 = vpop.f32.mrf.mxu0  ;;  %v8416_v9 = vld [vmem:[#allocation35_spill] sm:$0xff] }
 0x118   : > { %v1045_v31 = vpop.f32.mrf.mxu1 }
 0x119   : > { %v7504_v34 = vadd.f32 %v5852_v51, %v1157_v37  ;;  %v1156_v42 = vadd.f32 %v1045_v31, %v7392_v32  ;;  %v5855_v13 = vpop.f32.mrf.mxu0  ;;  %6154 = vmatmul.mubr.msk.f32.gmra.mxu0 %vm365_vm1, %v8377_v10  ;;  %v8417_v51 = vld [vmem:[#allocation36_spill] sm:$0xff]  ;;  %v8418_v31 = vld [vmem:[#allocation11_spill] sm:$0xff] }
 0x11a   : > { %v5805_v39 = vpop.f32.mrf.mxu1  ;;  %6104 = vmatmul.mubr.msk.f32.gmra.mxu1 %vm365_vm1, %v6918_v38  ;;  %6156 = vmatprep.mubr.msk.f32.mxu0 %vm365_vm1, %v8378_v8 }
 0x11b   : > { %v7511_v44 = vadd.f32 %v1498_v24, %v1156_v42  ;;  %v1159_v5 = vadd.f32 %v5805_v39, %v7396_v52  ;;  %6106 = vmatprep.mubr.msk.f32.mxu1 %vm365_vm1, %v6924_v0  ;;  %v1508_v35 = vpop.f32.mrf.mxu0  ;;  %v8419_v42 = vld [vmem:[#allocation37_spill] sm:$0xff]  ;;  %v8420_v39 = vld [vmem:[#allocation38_spill] sm:$0xff] }
 0x11c   : > { %v1055_v33 = vpop.f32.mrf.mxu1 }
 0x11d   : > { %v7518_v32 = vadd.f32 %v5855_v13, %v1159_v5  ;;  %v1158_v12 = vadd.f32 %v1055_v33, %v7407_v56  ;;  %v5858_v53 = vpop.f32.mrf.mxu0  ;;  %6157 = vmatmul.mubr.msk.f32.gmra.mxu0 %vm365_vm1, %v8380_v11  ;;  %v8405_v11 = vld [vmem:[#allocation28_spill] sm:$0xff] }
 0x11e   : > { %v5808_v38 = vpop.f32.mrf.mxu1  ;;  %6107 = vmatmul.mubr.msk.f32.gmra.mxu1 %vm365_vm1, %v6938_v2  ;;  %6159 = vmatprep.mubr.msk.f32.mxu0 %vm365_vm1, %v8381_v16  ;;  %v8408_v16 = vld [vmem:[#allocation30_spill] sm:$0xff]  ;;  %v5289_v33 = vld [vmem:[%s6549_s13 + $0x169] sm:$0xff] }
 0x11f   : > { %v7525_v52 = vadd.f32 %v1508_v35, %v1158_v12  ;;  %v1161_v0 = vadd.f32 %v5808_v38, %v7279_v6  ;;  %6109 = vmatprep.mubr.msk.f32.mxu1 %vm365_vm1, %v6944_v60  ;;  %v1518_v8 = vpop.f32.mrf.mxu0  ;;  %v8406_v60 = vld [vmem:[#allocation7_spill] sm:$0xff]  ;;  %v8421_v38 = vld [vmem:[#allocation12_spill] sm:$0xff] }
 0x120   : > { %v1065_v10 = vpop.f32.mrf.mxu1  ;;  %v5354_v35 = vld [vmem:[%s6549_s13 + $0x16a] sm:$0xff] }
 0x121   : > { %v7532_v56 = vadd.f32 %v5858_v53, %v1161_v0  ;;  %v1160_v20 = vadd.f32 %v1065_v10, %v7291_v45  ;;  %v5861_v55 = vpop.f32.mrf.mxu0  ;;  %6160 = vmatmul.mubr.msk.f32.gmra.mxu0 %vm365_vm1, %v8405_v11 }
 0x122   : > { %v5811_v2 = vpop.f32.mrf.mxu1  ;;  %6110 = vmatmul.mubr.msk.f32.gmra.mxu1 %vm365_vm1, %v6958_v62  ;;  %6162 = vmatprep.mubr.msk.f32.mxu0 %vm365_vm1, %v8408_v16 }
 0x123   : > { %v7539_v6 = vadd.f32 %v1518_v8, %v1160_v20  ;;  %v1163_v36 = vadd.f32 %v5811_v2, %v8406_v60  ;;  %6112 = vmatprep.mubr.msk.f32.mxu1 %vm365_vm1, %v8407_v14  ;;  %v1528_v45 = vpop.f32.mrf.mxu0  ;;  %v8422_v8 = vld [vmem:[#allocation39_spill] sm:$0xff]  ;;  %v8423_v20 = vld [vmem:[#allocation40_spill] sm:$0xff] }
 0x124   : > { %v1075_v28 = vpop.f32.mrf.mxu1  ;;  %v5290_v60 = vld [vmem:[%s6549_s13 + $0x171] sm:$0xff] }
 0x125   : > { %v7546_v57 = vadd.f32 %v5861_v55, %v1163_v36  ;;  %v1162_v59 = vadd.f32 %v1075_v28, %v8409_v7  ;;  %v5864_v17 = vpop.f32.mrf.mxu0  ;;  %6163 = vmatmul.mubr.msk.f32.gmra.mxu0 %vm365_vm1, %v8411_v40  ;;  %v8424_v55 = vld [vmem:[#allocation13_spill] sm:$0xff] }
 0x126   : > { %v5814_v62 = vpop.f32.mrf.mxu1  ;;  %6113 = vmatmul.mubr.msk.f32.gmra.mxu1 %vm365_vm1, %v8410_v19  ;;  %6165 = vmatprep.mubr.msk.f32.mxu0 %vm365_vm1, %v8414_v23  ;;  %v5355_v36 = vld [vmem:[%s6549_s13 + $0x172] sm:$0xff]  ;;  %v8426_v19 = vld [vmem:[#allocation15_spill] sm:$0xff] }
 0x127   : > { %v7553_v61 = vadd.f32 %v1528_v45, %v1162_v59  ;;  %v1165_v63 = vadd.f32 %v5814_v62, %v8412_v43  ;;  %6115 = vmatprep.mubr.msk.f32.mxu1 %vm365_vm1, %v8413_v21  ;;  %v1538_v1 = vpop.f32.mrf.mxu0  ;;  %v8425_v45 = vld [vmem:[#allocation14_spill] sm:$0xff]  ;;  %v8427_v43 = vld [vmem:[#allocation43_spill] sm:$0xff] }
 0x128   : > { %v1085_v41 = vpop.f32.mrf.mxu1 }
 0x129   : > { %v7560_v47 = vadd.f32 %v5864_v17, %v1165_v63  ;;  %v1164_v25 = vadd.f32 %v1085_v41, %v8415_v3  ;;  %v5867_v46 = vpop.f32.mrf.mxu0  ;;  %6166 = vmatmul.mubr.msk.f32.gmra.mxu0 %vm365_vm1, %v8417_v51  ;;  %v8428_v63 = vld [vmem:[#allocation17_spill] sm:$0xff]  ;;  %v8430_v51 = vld [vmem:[#allocation6_spill] sm:$0xff] }
 0x12a   : > { %v5817_v27 = vpop.f32.mrf.mxu1  ;;  %6116 = vmatmul.mubr.msk.f32.gmra.mxu1 %vm365_vm1, %v8416_v9  ;;  %6168 = vmatprep.mubr.msk.f32.mxu0 %vm365_vm1, %v8420_v39  ;;  %v5293_v41 = vld [vmem:[%s6549_s13 + $0x199] sm:$0xff] }
 0x12b   : > { %v7567_v37 = vadd.f32 %v1538_v1, %v1164_v25  ;;  %v1167_v24 = vadd.f32 %v5817_v27, %v8418_v31  ;;  %6118 = vmatprep.mubr.msk.f32.mxu1 %vm365_vm1, %v8419_v42  ;;  %v1548_v5 = vpop.f32.mrf.mxu0  ;;  %v5358_v1 = vld [vmem:[%s6549_s13 + $0x19a] sm:$0xff]  ;;  %v8429_v25 = vld [vmem:[#allocation16_spill] sm:$0xff]  ;;  %v8431_v31 = vld [vmem:[#allocation19_spill] sm:$0xff] }
 0x12c   : > { %v1095_v13 = vpop.f32.mrf.mxu1  ;;  %v8432_v42 = vld [vmem:[#allocation18_spill] sm:$0xff] }
 0x12d   : > { %v7576_v12 = vadd.f32 %v5867_v46, %v1167_v24  ;;  %v1166_v53 = vadd.f32 %v1095_v13, %v8421_v38  ;;  %v5870_v10 = vpop.f32.mrf.mxu0  ;;  %6169 = vmatmul.mubr.msk.f32.gmra.mxu0 %vm365_vm1, %v8423_v20  ;;  %v5294_v13 = vld [vmem:[%s6549_s13 + $0x1a1] sm:$0xff] }
 0x12e   : > { %v5820_v0 = vpop.f32.mrf.mxu1  ;;  %6119 = vmatmul.mubr.msk.f32.gmra.mxu1 %vm365_vm1, %v8422_v8  ;;  %6171 = vmatprep.mubr.msk.f32.mxu0 %vm365_vm1, %v5354_v35 }
 0x12f   : > { %v7583_v2 = vadd.f32 %v1548_v5, %v1166_v53  ;;  %v1169_v11 = vadd.f32 %v5820_v0, %v8424_v55  ;;  %6121 = vmatprep.mubr.msk.f32.mxu1 %vm365_vm1, %v5289_v33  ;;  %v1558_v16 = vpop.f32.mrf.mxu0  ;;  %v5359_v5 = vld [vmem:[%s6549_s13 + $0x1a2] sm:$0xff]  ;;  %v8433_v53 = vld [vmem:[#allocation20_spill] sm:$0xff]  ;;  %v8434_v55 = vld [vmem:[#allocation21_spill] sm:$0xff] }
 0x130   : > { %v1105_v14 = vpop.f32.mrf.mxu1 }
 0x131   : > { %v7590_v28 = vadd.f32 %v5870_v10, %v1169_v11  ;;  %v1168_v7 = vadd.f32 %v1105_v14, %v8425_v45  ;;  %v5873_v62 = vpop.f32.mrf.mxu0  ;;  %6172 = vmatmul.mubr.msk.f32.gmra.mxu0 %vm365_vm1, %v5355_v36 }
 0x132   : > { %v5823_v59 = vpop.f32.mrf.mxu1  ;;  %6122 = vmatmul.mubr.msk.f32.gmra.mxu1 %vm365_vm1, %v5290_v60  ;;  %6174 = vmatprep.mubr.msk.f32.mxu0 %vm365_vm1, %v8428_v63 }
 0x133   : > { %v7595_v17 = vadd.f32 %v1558_v16, %v1168_v7  ;;  %v1171_v40 = vadd.f32 %v5823_v59, %v8426_v19  ;;  %6124 = vmatprep.mubr.msk.f32.mxu1 %vm365_vm1, %v8427_v43  ;;  %v1568_v23 = vpop.f32.mrf.mxu0  ;;  %v8435_v16 = vld [vmem:[#allocation22_spill] sm:$0xff] }
 0x134   : > { %v1115_v21 = vpop.f32.mrf.mxu1 }
 0x135   : > { %v7604_v3 = vadd.f32 %v5873_v62, %v1171_v40  ;;  %v1170_v27 = vadd.f32 %v1115_v21, %v8429_v25  ;;  %v5876_v9 = vpop.f32.mrf.mxu0  ;;  %6175 = vmatmul.mubr.msk.f32.gmra.mxu0 %vm365_vm1, %v8431_v31 }
 0x136   : > { %v5826_v46 = vpop.f32.mrf.mxu1  ;;  %6125 = vmatmul.mubr.msk.f32.gmra.mxu1 %vm365_vm1, %v8430_v51  ;;  %6177 = vmatprep.mubr.msk.f32.mxu0 %vm365_vm1, %v5358_v1 }
 0x137   : > { %v7611_v24 = vadd.f32 %v1568_v23, %v1170_v27  ;;  %v1173_v39 = vadd.f32 %v5826_v46, %v8432_v42  ;;  %6127 = vmatprep.mubr.msk.f32.mxu1 %vm365_vm1, %v5293_v41  ;;  %v1578_v35 = vpop.f32.mrf.mxu0 }
 0x138   : > { %v1125_v33 = vpop.f32.mrf.mxu1 }
 0x139   : > { %v7618_v38 = vadd.f32 %v5876_v9, %v1173_v39  ;;  %v1172_v0 = vadd.f32 %v1125_v33, %v8433_v53  ;;  %v5879_v8 = vpop.f32.mrf.mxu0  ;;  %6178 = vmatmul.mubr.msk.f32.gmra.mxu0 %vm365_vm1, %v5359_v5 }
 0x13a   : > { %v5829_v10 = vpop.f32.mrf.mxu1  ;;  %6128 = vmatmul.mubr.msk.f32.gmra.mxu1 %vm365_vm1, %v5294_v13 }
 0x13b   : > { %v7623_v20 = vadd.f32 %v1578_v35, %v1172_v0  ;;  %v1175_v11 = vadd.f32 %v5829_v10, %v8434_v55  ;;  %v1588_v36 = vpop.f32.mrf.mxu0 }
 0x13c   : > { %v1135_v60 = vpop.f32.mrf.mxu1 }
 0x13d   : > { %v7626_v14 = vadd.f32 %v5879_v8, %v1175_v11  ;;  %v1174_v45 = vadd.f32 %v1135_v60, %v8435_v16  ;;  %v5934_v59 = vpop.f32.mrf.mxu0 }
 0x13e   : > { %v5884_v7 = vpop.f32.mrf.mxu1 }
 0x13f   : > { %v7629_v62 = vadd.f32 %v1588_v36, %v1174_v45  ;;  %v2054_v19 = vadd.f32 %v5884_v7, %v7420_v54  ;;  %v2347_v43 = vpop.f32.mrf.mxu0 }
 0x140   : > { %v1894_v40 = vpop.f32.mrf.mxu1 }
 0x141   : > { %v7632_v63 = vadd.f32 %v5934_v59, %v2054_v19  ;;  %v2053_v21 = vadd.f32 %v1894_v40, %v7427_v49  ;;  %v5937_v41 = vpop.f32.mrf.mxu0 }
 0x142   : > { %v5887_v23 = vpop.f32.mrf.mxu1 }
 0x143   : > { %v7635_v1 = vadd.f32 %v2347_v43, %v2053_v21  ;;  %v2056_v25 = vadd.f32 %v5887_v23, %v7434_v4  ;;  %v2357_v46 = vpop.f32.mrf.mxu0 }
 0x144   : > { %v1904_v27 = vpop.f32.mrf.mxu1 }
 0x145   : > { %v7638_v9 = vadd.f32 %v5937_v41, %v2056_v25  ;;  %v2055_v51 = vadd.f32 %v1904_v27, %v7441_v15  ;;  %v5940_v54 = vpop.f32.mrf.mxu0 }
 0x146   : > { %v5890_v31 = vpop.f32.mrf.mxu1 }
 0x147   : > { %v7641_v42 = vadd.f32 %v2357_v46, %v2055_v51  ;;  %v2058_v39 = vadd.f32 %v5890_v31, %v7448_v18  ;;  %v2367_v49 = vpop.f32.mrf.mxu0 }
 0x148   : > { %v1914_v13 = vpop.f32.mrf.mxu1 }
 0x149   : > { %v7644_v5 = vadd.f32 %v5940_v54, %v2058_v39  ;;  %v2057_v33 = vadd.f32 %v1914_v13, %v7455_v48  ;;  %v5943_v4 = vpop.f32.mrf.mxu0 }
 0x14a   : > { %v5893_v35 = vpop.f32.mrf.mxu1 }
 0x14b   : > { %v7647_v53 = vadd.f32 %v2367_v49, %v2057_v33  ;;  %v2060_v0 = vadd.f32 %v5893_v35, %v7462_v22  ;;  %v2377_v15 = vpop.f32.mrf.mxu0 }
 0x14c   : > { %v1924_v10 = vpop.f32.mrf.mxu1 }
 0x14d   : > { %v7650_v8 = vadd.f32 %v5943_v4, %v2060_v0  ;;  %v2059_v55 = vadd.f32 %v1924_v10, %v7469_v50  ;;  %v5946_v18 = vpop.f32.mrf.mxu0 }
 0x14e   : > { %v5896_v11 = vpop.f32.mrf.mxu1 }
 0x14f   : > { %v7653_v60 = vadd.f32 %v2377_v15, %v2059_v55  ;;  %v2062_v36 = vadd.f32 %v5896_v11, %v7476_v26  ;;  %v2387_v48 = vpop.f32.mrf.mxu0 }
 0x150   : > { %v1934_v16 = vpop.f32.mrf.mxu1 }
 0x151   : > { %v7656_v45 = vadd.f32 %v5946_v18, %v2062_v36  ;;  %v2061_v7 = vadd.f32 %v1934_v16, %v7483_v58  ;;  %v5949_v22 = vpop.f32.mrf.mxu0 }
 0x152   : > { %v5899_v59 = vpop.f32.mrf.mxu1 }
 0x153   : > { %v7659_v19 = vadd.f32 %v2387_v48, %v2061_v7  ;;  %v2064_v40 = vadd.f32 %v5899_v59, %v7490_v30  ;;  %v2397_v50 = vpop.f32.mrf.mxu0 }
 0x154   : > { %v1944_v43 = vpop.f32.mrf.mxu1 }
 0x155   : > { %v7662_v21 = vadd.f32 %v5949_v22, %v2064_v40  ;;  %v2063_v23 = vadd.f32 %v1944_v43, %v7497_v29  ;;  %v5952_v26 = vpop.f32.mrf.mxu0 }
 0x156   : > { %v5902_v41 = vpop.f32.mrf.mxu1 }
 0x157   : > { %v7665_v25 = vadd.f32 %v2397_v50, %v2063_v23  ;;  %v2066_v27 = vadd.f32 %v5902_v41, %v7504_v34  ;;  %v2407_v58 = vpop.f32.mrf.mxu0 }
 0x158   : > { %v1954_v46 = vpop.f32.mrf.mxu1 }
 0x159   : > { %v7668_v51 = vadd.f32 %v5952_v26, %v2066_v27  ;;  %v2065_v31 = vadd.f32 %v1954_v46, %v7511_v44  ;;  %v5955_v30 = vpop.f32.mrf.mxu0 }
 0x15a   : > { %v5905_v54 = vpop.f32.mrf.mxu1 }
 0x15b   : > { %v7671_v39 = vadd.f32 %v2407_v58, %v2065_v31  ;;  %v2068_v13 = vadd.f32 %v5905_v54, %v7518_v32  ;;  %v2417_v29 = vpop.f32.mrf.mxu0 }
 0x15c   : > { %v1964_v49 = vpop.f32.mrf.mxu1 }
 0x15d   : > { %8436 = vst [vmem:[#allocation23_spill] sm:$0xff] %v7671_v39  ;;  %v7674_v33 = vadd.f32 %v5955_v30, %v2068_v13  ;;  %v2067_v35 = vadd.f32 %v1964_v49, %v7525_v52  ;;  %v5958_v34 = vpop.f32.mrf.mxu0 }
 0x15e   : > { %v5908_v4 = vpop.f32.mrf.mxu1 }
 0x15f   : > { %8437 = vst [vmem:[#allocation24_spill] sm:$0xff] %v7674_v33  ;;  %v7677_v0 = vadd.f32 %v2417_v29, %v2067_v35  ;;  %v2070_v10 = vadd.f32 %v5908_v4, %v7532_v56  ;;  %v2427_v44 = vpop.f32.mrf.mxu0 }
 0x160   : > { %v1974_v15 = vpop.f32.mrf.mxu1 }
 0x161   : > { %8438 = vst [vmem:[#allocation25_spill] sm:$0xff] %v7677_v0  ;;  %v7680_v55 = vadd.f32 %v5958_v34, %v2070_v10  ;;  %v2069_v11 = vadd.f32 %v1974_v15, %v7539_v6  ;;  %v5961_v32 = vpop.f32.mrf.mxu0 }
 0x162   : > { %v5911_v18 = vpop.f32.mrf.mxu1 }
 0x163   : > { %8439 = vst [vmem:[#allocation26_spill] sm:$0xff] %v7680_v55  ;;  %v7683_v36 = vadd.f32 %v2427_v44, %v2069_v11  ;;  %v2072_v16 = vadd.f32 %v5911_v18, %v7546_v57  ;;  %v2437_v52 = vpop.f32.mrf.mxu0 }
 0x164   : > { %v1984_v48 = vpop.f32.mrf.mxu1 }
 0x165   : > { %8440 = vst [vmem:[#allocation27_spill] sm:$0xff] %v7683_v36  ;;  %v7686_v7 = vadd.f32 %v5961_v32, %v2072_v16  ;;  %v2071_v59 = vadd.f32 %v1984_v48, %v7553_v61  ;;  %v5964_v56 = vpop.f32.mrf.mxu0 }
 0x166   : > { %v5914_v22 = vpop.f32.mrf.mxu1 }
 0x167   : > { %8441 = vst [vmem:[#allocation41_spill] sm:$0xff] %v7686_v7  ;;  %v7689_v40 = vadd.f32 %v2437_v52, %v2071_v59  ;;  %v2074_v43 = vadd.f32 %v5914_v22, %v7560_v47  ;;  %v2447_v6 = vpop.f32.mrf.mxu0 }
 0x168   : > { %v1994_v50 = vpop.f32.mrf.mxu1 }
 0x169   : > { %8442 = vst [vmem:[#allocation42_spill] sm:$0xff] %v7689_v40  ;;  %v7692_v23 = vadd.f32 %v5964_v56, %v2074_v43  ;;  %v2073_v41 = vadd.f32 %v1994_v50, %v7567_v37  ;;  %v5967_v57 = vpop.f32.mrf.mxu0 }
 0x16a   : > { %v5917_v26 = vpop.f32.mrf.mxu1 }
 0x16b   : > { %8443 = vst [vmem:[#allocation28_spill] sm:$0xff] %v7692_v23  ;;  %v7695_v27 = vadd.f32 %v2447_v6, %v2073_v41  ;;  %v2076_v46 = vadd.f32 %v5917_v26, %v7576_v12  ;;  %v2457_v61 = vpop.f32.mrf.mxu0 }
 0x16c   : > { %v2004_v58 = vpop.f32.mrf.mxu1 }
 0x16d   : > { %v7698_v31 = vadd.f32 %v5967_v57, %v2076_v46  ;;  %v2075_v54 = vadd.f32 %v2004_v58, %v7583_v2  ;;  %v5970_v47 = vpop.f32.mrf.mxu0 }
 0x16e   : > { %v5920_v30 = vpop.f32.mrf.mxu1 }
 0x16f   : > { %v7701_v13 = vadd.f32 %v2457_v61, %v2075_v54  ;;  %v2078_v49 = vadd.f32 %v5920_v30, %v7590_v28  ;;  %v2467_v37 = vpop.f32.mrf.mxu0 }
 0x170   : > { %v2014_v29 = vpop.f32.mrf.mxu1 }
 0x171   : > { %v7704_v35 = vadd.f32 %v5970_v47, %v2078_v49  ;;  %v2077_v4 = vadd.f32 %v2014_v29, %v7595_v17  ;;  %v5973_v12 = vpop.f32.mrf.mxu0 }
 0x172   : > { %v5923_v34 = vpop.f32.mrf.mxu1 }
 0x173   : > { %v7707_v10 = vadd.f32 %v2467_v37, %v2077_v4  ;;  %v2080_v15 = vadd.f32 %v5923_v34, %v7604_v3  ;;  %v2477_v2 = vpop.f32.mrf.mxu0 }
 0x174   : > { %v2024_v44 = vpop.f32.mrf.mxu1 }
 0x175   : > { %v7710_v11 = vadd.f32 %v5973_v12, %v2080_v15  ;;  %v2079_v18 = vadd.f32 %v2024_v44, %v7611_v24  ;;  %v5976_v28 = vpop.f32.mrf.mxu0 }
 0x176   : > { %v5926_v32 = vpop.f32.mrf.mxu1 }
 0x177   : > { %v7713_v16 = vadd.f32 %v2477_v2, %v2079_v18  ;;  %v2082_v48 = vadd.f32 %v5926_v32, %v7618_v38  ;;  %v2487_v17 = vpop.f32.mrf.mxu0 }
 0x178   : > { %v2034_v52 = vpop.f32.mrf.mxu1 }
 0x179   : > { %v7716_v59 = vadd.f32 %v5976_v28, %v2082_v48  ;;  %v2081_v22 = vadd.f32 %v2034_v52, %v7623_v20  ;;  %v5979_v3 = vpop.f32.mrf.mxu0 }
 0x17a   : > { %v5929_v56 = vpop.f32.mrf.mxu1 }
 0x17b   : > { %v7719_v43 = vadd.f32 %v2487_v17, %v2081_v22  ;;  %v2084_v50 = vadd.f32 %v5929_v56, %v7626_v14  ;;  %v2497_v24 = vpop.f32.mrf.mxu0 }
 0x17c   : > { %v2044_v6 = vpop.f32.mrf.mxu1 }
 0x17d   : > { %v7722_v41 = vadd.f32 %v5979_v3, %v2084_v50  ;;  %v2083_v26 = vadd.f32 %v2044_v6, %v7629_v62  ;;  %v7727_v38 = vpop.f32.mrf.mxu0 }
 0x17e   : > { %v7725_v57 = vpop.f32.mrf.mxu1 }
 0x17f   : > { %v7729_v46 = vadd.f32 %v2497_v24, %v2083_v26  ;;  %v7733_v20 = vpop.f32.mrf.mxu0 }
 0x180   : > { %v7731_v58 = vpop.f32.mrf.mxu1 }
 0x181   : > { %v7737_v54 = vpop.f32.mrf.mxu0 }
 0x182   : > { %v7735_v61 = vpop.f32.mrf.mxu1 }
 0x183   : > { %v7741_v30 = vpop.f32.mrf.mxu0 }
 0x184   : > { %v7739_v14 = vpop.f32.mrf.mxu1 }
 0x185   : > { %v7745_v62 = vpop.f32.mrf.mxu0 }
 0x186   : > { %v7743_v47 = vpop.f32.mrf.mxu1 }
 0x187   : > { %v7749_v29 = vpop.f32.mrf.mxu0 }
 0x188   : > { %v7747_v49 = vpop.f32.mrf.mxu1 }
 0x189   : > { %v7753_v4 = vpop.f32.mrf.mxu0 }
 0x18a   : > { %v7751_v37 = vpop.f32.mrf.mxu1 }
 0x18b   : > { %v7757_v12 = vpop.f32.mrf.mxu0 }
 0x18c   : > { %v7755_v34 = vpop.f32.mrf.mxu1 }
 0x18d   : > { %v7761_v44 = vpop.f32.mrf.mxu0 }
 0x18e   : > { %v7759_v15 = vpop.f32.mrf.mxu1 }
 0x18f   : > { %v7765_v18 = vpop.f32.mrf.mxu0 }
 0x190   : > { %v7763_v2 = vpop.f32.mrf.mxu1 }
 0x191   : > { %v7769_v28 = vpop.f32.mrf.mxu0 }
 0x192   : > { %v7767_v32 = vpop.f32.mrf.mxu1 }
 0x193   : > { %v7773_v52 = vpop.f32.mrf.mxu0 }
 0x194   : > { %v7771_v48 = vpop.f32.mrf.mxu1 }
 0x195   : > { %v7777_v22 = vpop.f32.mrf.mxu0 }
 0x196   : > { %v7775_v17 = vpop.f32.mrf.mxu1  ;;  %8445 = vst [vmem:[#allocation29_spill] sm:$0xff] %v7777_v22 }
 0x197   : > { %8444 = vst [vmem:[#allocation7_spill] sm:$0xff] %v7775_v17  ;;  %v7781_v3 = vpop.f32.mrf.mxu0 }
 0x198   : > { %v7779_v56 = vpop.f32.mrf.mxu1  ;;  %8447 = vst [vmem:[#allocation8_spill] sm:$0xff] %v7781_v3 }
 0x199   : > { %8446 = vst [vmem:[#allocation30_spill] sm:$0xff] %v7779_v56  ;;  %v7785_v6 = vpop.f32.mrf.mxu0 }
 0x19a   : > { %v7783_v50 = vpop.f32.mrf.mxu1  ;;  %8449 = vst [vmem:[#allocation32_spill] sm:$0xff] %v7785_v6 }
 0x19b   : > { %8448 = vst [vmem:[#allocation31_spill] sm:$0xff] %v7783_v50  ;;  %v7789_v26 = vpop.f32.mrf.mxu0 }
 0x19c   : > { %v7787_v24 = vpop.f32.mrf.mxu1  ;;  %8451 = vst [vmem:[#allocation33_spill] sm:$0xff] %v7789_v26 }
 0x19d   : > { %8450 = vst [vmem:[#allocation9_spill] sm:$0xff] %v7787_v24  ;;  %v7793_v40 = vpop.f32.mrf.mxu0 }
 0x19e   : > { %v7791_v23 = vpop.f32.mrf.mxu1  ;;  %8453 = vst [vmem:[#allocation10_spill] sm:$0xff] %v7793_v40 }
 0x19f   : > { %8452 = vst [vmem:[#allocation34_spill] sm:$0xff] %v7791_v23  ;;  %v7797_v36 = vpop.f32.mrf.mxu0 }
 0x1a0   : > { %v7795_v7 = vpop.f32.mrf.mxu1  ;;  %8455 = vst [vmem:[#allocation36_spill] sm:$0xff] %v7797_v36 }
 0x1a1   : > { %8454 = vst [vmem:[#allocation35_spill] sm:$0xff] %v7795_v7  ;;  %v7801_v22 = vpop.f32.mrf.mxu0 }
 0x1a2   : > { %v7799_v55 = vpop.f32.mrf.mxu1  ;;  %8457 = vst [vmem:[#allocation37_spill] sm:$0xff] %v7801_v22 }
 0x1a3   : > { %8456 = vst [vmem:[#allocation11_spill] sm:$0xff] %v7799_v55  ;;  %v7805_v0 = vpop.f32.mrf.mxu0 }
 0x1a4   : > { %v7803_v3 = vpop.f32.mrf.mxu1  ;;  %8459 = vst [vmem:[#allocation12_spill] sm:$0xff] %v7805_v0 }
 0x1a5   : > { %8458 = vst [vmem:[#allocation38_spill] sm:$0xff] %v7803_v3  ;;  %v7809_v24 = vpop.f32.mrf.mxu0 }
 0x1a6   : > { %v7807_v6 = vpop.f32.mrf.mxu1  ;;  %8461 = vst [vmem:[#allocation40_spill] sm:$0xff] %v7809_v24 }
 0x1a7   : > { %8460 = vst [vmem:[#allocation39_spill] sm:$0xff] %v7807_v6  ;;  %v3356_v23 = vpop.f32.mrf.mxu0 }
 0x1a8   : > { %v2900_v26 = vpop.f32.mrf.mxu1 }
 0x1a9   : > { %v2979_v40 = vadd.f32 %v2900_v26, %v7695_v27  ;;  %v6067_v7 = vpop.f32.mrf.mxu0 }
 0x1aa   : > { %v6017_v50 = vpop.f32.mrf.mxu1 }
 0x1ab   : > { %v7812_v33 = vadd.f32 %v3356_v23, %v2979_v40  ;;  %v2982_v36 = vadd.f32 %v6017_v50, %v7698_v31  ;;  %v3366_v22 = vpop.f32.mrf.mxu0 }
 0x1ac   : > { %v2910_v55 = vpop.f32.mrf.mxu1 }
 0x1ad   : > { %v7815_v56 = vadd.f32 %v6067_v7, %v2982_v36  ;;  %v2981_v0 = vadd.f32 %v2910_v55, %v7701_v13  ;;  %v6070_v6 = vpop.f32.mrf.mxu0 }
 0x1ae   : > { %v6020_v3 = vpop.f32.mrf.mxu1 }
 0x1af   : > { %v7818_v39 = vadd.f32 %v3366_v22, %v2981_v0  ;;  %v2984_v24 = vadd.f32 %v6020_v3, %v7704_v35  ;;  %v3376_v27 = vpop.f32.mrf.mxu0 }
 0x1b0   : > { %v2920_v17 = vpop.f32.mrf.mxu1 }
 0x1b1   : > { %v7821_v26 = vadd.f32 %v6070_v6, %v2984_v24  ;;  %v2983_v40 = vadd.f32 %v2920_v17, %v7707_v10  ;;  %v6073_v31 = vpop.f32.mrf.mxu0  ;;  %v2960_v17 = vadd.f32 %v7725_v57, %v7632_v63  ;;  %v2962_v63 = vadd.f32 %v7735_v61, %v7638_v9 }
 0x1b2   : > { %v6023_v23 = vpop.f32.mrf.mxu1  ;;  %v2963_v9 = vadd.f32 %v7747_v49, %v7647_v53  ;;  %v2966_v61 = vadd.f32 %v7751_v37, %v7650_v8  ;;  %v2968_v53 = vadd.f32 %v7759_v15, %v7656_v45  ;;  %v2967_v8 = vadd.f32 %v7763_v2, %v7659_v19  ;;  %v7877_v49 = vld [vmem:[%s8249_s3] ss:$0 sm:$0xff] }
 0x1b3   : > { %v7824_v50 = vadd.f32 %v3376_v27, %v2983_v40  ;;  %v2986_v36 = vadd.f32 %v6023_v23, %v7710_v11  ;;  %v3386_v55 = vpop.f32.mrf.mxu0 }
 0x1b4   : > { %v2930_v7 = vpop.f32.mrf.mxu1  ;;  %v3419_v19 = vadd.f32 %v7749_v29, %v2963_v9  ;;  %v3422_v15 = vadd.f32 %v7753_v4, %v2966_v61  ;;  %v3423_v29 = vadd.f32 %v7765_v18, %v2967_v8  ;;  %v8463_v18 = vld [vmem:[#allocation23_spill] sm:$0xff]  ;;  %v8465_v9 = vld [vmem:[#allocation24_spill] sm:$0xff] }
 0x1b5   : > { %v7827_v13 = vadd.f32 %v6073_v31, %v2986_v36  ;;  %v2985_v0 = vadd.f32 %v2930_v7, %v7713_v16  ;;  %v6076_v35 = vpop.f32.mrf.mxu0  ;;  %v2959_v16 = vadd.f32 %v7731_v58, %v7635_v1  ;;  %v2961_v1 = vadd.f32 %v7739_v14, %v7641_v42 }
 0x1b6   : > { %v6026_v22 = vpop.f32.mrf.mxu1  ;;  %v3418_v42 = vadd.f32 %v7737_v54, %v2962_v63 }
 0x1b7   : > { %v7830_v3 = vadd.f32 %v3386_v55, %v2985_v0  ;;  %v2988_v6 = vadd.f32 %v6026_v22, %v7716_v59  ;;  %v3396_v10 = vpop.f32.mrf.mxu0  ;;  %v3416_v55 = vadd.f32 %v7727_v38, %v2960_v17  ;;  %v2964_v38 = vadd.f32 %v7743_v47, %v7644_v5 }
 0x1b8   : > { %v2940_v24 = vpop.f32.mrf.mxu1  ;;  %v2965_v5 = vadd.f32 %v7755_v34, %v7653_v60  ;;  %v2970_v47 = vadd.f32 %v7767_v32, %v7662_v21  ;;  %v2969_v21 = vadd.f32 %v7771_v48, %v7665_v25 }
 0x1b9   : > { %v7835_v27 = vadd.f32 %v6076_v35, %v2988_v6  ;;  %v2987_v11 = vadd.f32 %v2940_v24, %v7719_v43  ;;  %v6079_v23 = vpop.f32.mrf.mxu0  ;;  %v3415_v35 = vadd.f32 %v7733_v20, %v2959_v16  ;;  %v3420_v45 = vadd.f32 %v7745_v62, %v2964_v38 }
 0x1ba   : > { %v6029_v40 = vpop.f32.mrf.mxu1  ;;  %v3421_v16 = vadd.f32 %v7757_v12, %v2965_v5  ;;  %v3424_v62 = vadd.f32 %v7761_v44, %v2968_v53  ;;  %v7894_v4 = vadd.f32 %v7769_v28, %v2970_v47  ;;  %v7902_v63 = vadd.f32 %v7773_v52, %v2969_v21  ;;  %v8462_v12 = vld [vmem:[#allocation7_spill] sm:$0xff] }
 0x1bb   : > { %v7840_v31 = vadd.f32 %v3396_v10, %v2987_v11  ;;  %v2990_v36 = vadd.f32 %v6029_v40, %v7722_v41  ;;  %v3406_v59 = vpop.f32.mrf.mxu0  ;;  %v3417_v10 = vadd.f32 %v7741_v30, %v2961_v1  ;;  %v2972_v44 = vadd.f32 %v8462_v12, %v7668_v51  ;;  %v8466_v52 = vld [vmem:[#allocation31_spill] sm:$0xff] }
 0x1bc   : > { %v2950_v7 = vpop.f32.mrf.mxu1  ;;  %v2974_v61 = vadd.f32 %v8466_v52, %v8465_v9 }
 0x1bd   : > { %v7846_v57 = vadd.f32 %v6079_v23, %v2990_v36  ;;  %v2989_v43 = vadd.f32 %v2950_v7, %v7729_v46  ;;  %v6134_v22 = vpop.f32.mrf.mxu0  ;;  %v7863_v46 = vld [vmem:[%s8248_s2] ss:$0 sm:$0xff] }
 0x1be   : > { %v6084_v0 = vpop.f32.mrf.mxu1 }
 0x1bf   : > { %v7852_v58 = vadd.f32 %v3406_v59, %v2989_v43  ;;  %v3869_v41 = vadd.f32 %v6084_v0, %v3416_v55  ;;  %v4162_v6 = vpop.f32.mrf.mxu0  ;;  %v8464_v43 = vld [vmem:[#allocation30_spill] sm:$0xff] }
 0x1c0   : > { %v3709_v20 = vpop.f32.mrf.mxu1  ;;  %v2971_v28 = vadd.f32 %v8464_v43, %v8463_v18  ;;  %v8473_v18 = vld [vmem:[#allocation26_spill] sm:$0xff] }
 0x1c1   : > { %v4322_v14 = vadd.f32 %v6134_v22, %v3869_v41  ;;  %v3868_v24 = vadd.f32 %v3709_v20, %v3415_v35  ;;  %v6137_v37 = vpop.f32.mrf.mxu0  ;;  %v8467_v20 = vld [vmem:[#allocation25_spill] sm:$0xff] }
 0x1c2   : > { %v6087_v54 = vpop.f32.mrf.mxu1 }
 0x1c3   : > { %v4425_v60 = vmul.f32 %v7863_v46, %v4322_v14  ;;  %v4321_v34 = vadd.f32 %v4162_v6, %v3868_v24  ;;  %v3871_v17 = vadd.f32 %v6087_v54, %v3418_v42  ;;  %v4172_v32 = vpop.f32.mrf.mxu0  ;;  %v8468_v6 = vld [vmem:[#allocation9_spill] sm:$0xff] }
 0x1c4   : > { %v3719_v2 = vpop.f32.mrf.mxu1  ;;  %v2973_v51 = vadd.f32 %v8468_v6, %v8467_v20  ;;  %v8469_v54 = vld [vmem:[#allocation29_spill] sm:$0xff] }
 0x1c5   : > { %v7887_v11 = vadd.f32 %v7877_v49, %v4425_v60  ;;  %v4424_v30 = vmul.f32 %v7863_v46, %v4321_v34  ;;  %v4324_v40 = vadd.f32 %v6137_v37, %v3871_v17  ;;  %v3870_v23 = vadd.f32 %v3719_v2, %v3417_v10  ;;  %v6140_v25 = vpop.f32.mrf.mxu0  ;;  %v8470_v10 = vld [vmem:[#allocation8_spill] sm:$0xff]  ;;  %v8477_v6 = vld [vmem:[#allocation41_spill] sm:$0xff] }
 0x1c6   : > { %v6090_v36 = vpop.f32.mrf.mxu1  ;;  %v7922_v37 = vadd.f32 %v8469_v54, %v2972_v44  ;;  %v7925_v60 = vadd.f32 %v8470_v10, %v2971_v28  ;;  %v8475_v28 = vld [vmem:[#allocation27_spill] sm:$0xff] }
 0x1c7   : > { %v5396_v48 = vmul.f32 -1.442695, %v7887_v11  ;;  %v7898_v7 = vadd.f32 %v7877_v49, %v4424_v30  ;;  %v4427_v59 = vmul.f32 %v7863_v46, %v4324_v40  ;;  %v4323_v55 = vadd.f32 %v4172_v32, %v3870_v23  ;;  %v4182_v35 = vpop.f32.mrf.mxu0  ;;  %v8471_v30 = vld [vmem:[#allocation32_spill] sm:$0xff] }
 0x1c8   : > { %v3873_v0 = vadd.f32 %v6090_v36, %v3420_v45  ;;  %v3729_v22 = vpop.f32.mrf.mxu1  ;;  %v7930_v40 = vadd.f32 %v8471_v30, %v2974_v61 }
 0x1c9   : > { %6240 = vpow2.f32 %v5396_v48  ;;  %v5395_v1 = vmul.f32 -1.442695, %v7898_v7  ;;  %v7910_v41 = vadd.f32 %v7877_v49, %v4427_v59  ;;  %v4426_v38 = vmul.f32 %v7863_v46, %v4323_v55  ;;  %v6143_v5 = vpop.f32.mrf.mxu0 }
 0x1ca   : > { %v4326_v42 = vadd.f32 %v6140_v25, %v3873_v0  ;;  %v3872_v14 = vadd.f32 %v3729_v22, %v3419_v19  ;;  %v6093_v24 = vpop.f32.mrf.mxu1  ;;  %v8476_v0 = vld [vmem:[#allocation35_spill] sm:$0xff] }
 0x1cb   : > { %6242 = vpow2.f32 %v5395_v1  ;;  %v5398_v53 = vmul.f32 -1.442695, %v7910_v41  ;;  %v7919_v8 = vadd.f32 %v7877_v49, %v4426_v38  ;;  %v3875_v47 = vadd.f32 %v6093_v24, %v3422_v15  ;;  %v4192_v19 = vpop.f32.mrf.mxu0  ;;  %v8472_v15 = vld [vmem:[#allocation33_spill] sm:$0xff]  ;;  %v8480_v24 = vld [vmem:[#allocation38_spill] sm:$0xff] }
 0x1cc   : > { %v4429_v34 = vmul.f32 %v7863_v46, %v4326_v42  ;;  %v4325_v17 = vadd.f32 %v4182_v35, %v3872_v14  ;;  %v3739_v45 = vpop.f32.mrf.mxu1  ;;  %v7933_v23 = vadd.f32 %v8472_v15, %v2973_v51  ;;  %v2975_v22 = vadd.f32 %v8476_v0, %v8475_v28  ;;  %v8478_v51 = vld [vmem:[#allocation11_spill] sm:$0xff]  ;;  %v8479_v14 = vld [vmem:[#allocation42_spill] sm:$0xff] }
 0x1cd   : > { %6244 = vpow2.f32 %v5398_v53  ;;  %v5397_v21 = vmul.f32 -1.442695, %v7919_v8  ;;  %v4328_v2 = vadd.f32 %v6143_v5, %v3875_v47  ;;  %v3874_v32 = vadd.f32 %v3739_v45, %v3421_v16  ;;  %v6146_v59 = vpop.f32.mrf.mxu0  ;;  %v8474_v16 = vld [vmem:[#allocation34_spill] sm:$0xff] }
 0x1ce   : > { %v7936_v36 = vadd.f32 %v7877_v49, %v4429_v34  ;;  %v4428_v25 = vmul.f32 %v7863_v46, %v4325_v17  ;;  %v6096_v48 = vpop.f32.mrf.mxu1  ;;  %v2976_v43 = vadd.f32 %v8474_v16, %v8473_v18  ;;  %v2978_v42 = vadd.f32 %v8478_v51, %v8477_v6  ;;  %v8484_v18 = vld [vmem:[#allocation12_spill] sm:$0xff] }
 0x1cf   : > { %6246 = vpow2.f32 %v5397_v21  ;;  %v4431_v55 = vmul.f32 %v7863_v46, %v4328_v2  ;;  %v4327_v12 = vadd.f32 %v4192_v19, %v3874_v32  ;;  %v3877_v44 = vadd.f32 %v6096_v48, %v3424_v62  ;;  %v4202_v9 = vpop.f32.mrf.mxu0  ;;  %v8482_v21 = vld [vmem:[#allocation36_spill] sm:$0xff] }
 0x1d0   : > { %v5400_v35 = vmul.f32 -1.442695, %v7936_v36  ;;  %v7946_v1 = vadd.f32 %v7877_v49, %v4428_v25  ;;  %v3749_v38 = vpop.f32.mrf.mxu1  ;;  %v2977_v5 = vadd.f32 %v8480_v24, %v8479_v14  ;;  %v7966_v2 = vadd.f32 %v8482_v21, %v2975_v22 }
 0x1d1   : > { %v7949_v52 = vadd.f32 %v7877_v49, %v4431_v55  ;;  %v4430_v61 = vmul.f32 %v7863_v46, %v4327_v12  ;;  %v4330_v20 = vadd.f32 %v6146_v59, %v3877_v44  ;;  %v3876_v62 = vadd.f32 %v3749_v38, %v3423_v29  ;;  %v6149_v54 = vpop.f32.mrf.mxu0  ;;  %v8481_v29 = vld [vmem:[#allocation10_spill] sm:$0xff]  ;;  %v8483_v12 = vld [vmem:[#allocation37_spill] sm:$0xff] }
 0x1d2   : > { %6248 = vpow2.f32 %v5400_v35  ;;  %v5399_v53 = vmul.f32 -1.442695, %v7946_v1  ;;  %v6099_v47 = vpop.f32.mrf.mxu1  ;;  %v7963_v19 = vadd.f32 %v8481_v29, %v2976_v43  ;;  %v7975_v44 = vadd.f32 %v8483_v12, %v2978_v42 }
 0x1d3   : > { %v5402_v10 = vmul.f32 -1.442695, %v7949_v52  ;;  %v7959_v34 = vadd.f32 %v7877_v49, %v4430_v61  ;;  %v4433_v17 = vmul.f32 %v7863_v46, %v4330_v20  ;;  %v4329_v45 = vadd.f32 %v4202_v9, %v3876_v62  ;;  %v4212_v15 = vpop.f32.mrf.mxu0  ;;  %v8485_v61 = vld [vmem:[#allocation28_spill] sm:$0xff]  ;;  %v8486_v20 = vld [vmem:[#allocation39_spill] sm:$0xff] }
 0x1d4   : > { %6250 = vpow2.f32 %v5399_v53  ;;  %v3879_v32 = vadd.f32 %v6099_v47, %v7894_v4  ;;  %v3759_v30 = vpop.f32.mrf.mxu1  ;;  %v7978_v16 = vadd.f32 %v8484_v18, %v2977_v5  ;;  %v2980_v62 = vadd.f32 %v8486_v20, %v8485_v61 }
 0x1d5   : > { %6252 = vpow2.f32 %v5402_v10  ;;  %v5401_v25 = vmul.f32 -1.442695, %v7959_v34  ;;  %v7971_v48 = vadd.f32 %v7877_v49, %v4433_v17  ;;  %v4432_v59 = vmul.f32 %v7863_v46, %v4329_v45  ;;  %v6152_v0 = vpop.f32.mrf.mxu0 }
 0x1d6   : > { %v6241_v55 = vpop.eup %6240  ;;  %v4332_v43 = vadd.f32 %v6149_v54, %v3879_v32  ;;  %v3878_v4 = vadd.f32 %v3759_v30, %v7902_v63  ;;  %v6102_v28 = vpop.f32.mrf.mxu1 }
 0x1d7   : > { %v4592_v22 = vadd.f32 1.0, %v6241_v55  ;;  %6254 = vpow2.f32 %v5401_v25  ;;  %v5404_v35 = vmul.f32 -1.442695, %v7971_v48  ;;  %v7983_v38 = vadd.f32 %v7877_v49, %v4432_v59  ;;  %v4222_v63 = vpop.f32.mrf.mxu0 }
 0x1d8   : > { %v6243_v9 = vpop.eup %6242  ;;  %v4435_v6 = vmul.f32 %v7863_v46, %v4332_v43  ;;  %v4331_v51 = vadd.f32 %v4212_v15, %v3878_v4  ;;  %v3881_v42 = vadd.f32 %v6102_v28, %v7922_v37  ;;  %v3769_v14 = vpop.f32.mrf.mxu1 }
 0x1d9   : > { %6256 = vrcp.f32 %v4592_v22  ;;  %v4591_v24 = vadd.f32 1.0, %v6243_v9  ;;  %v5403_v5 = vmul.f32 -1.442695, %v7983_v38  ;;  %v3880_v53 = vadd.f32 %v3769_v14, %v7925_v60  ;;  %v6155_v29 = vpop.f32.mrf.mxu0 }
 0x1da   : > { %v6245_v47 = vpop.eup %6244  ;;  %6258 = vpow2.f32 %v5404_v35  ;;  %v7992_v54 = vadd.f32 %v7877_v49, %v4435_v6  ;;  %v4434_v10 = vmul.f32 %v7863_v46, %v4331_v51  ;;  %v4334_v17 = vadd.f32 %v6152_v0, %v3881_v42  ;;  %v6105_v45 = vpop.f32.mrf.mxu1 }
 0x1db   : > { %6260 = vrcp.f32 %v4591_v24  ;;  %v4594_v37 = vadd.f32 1.0, %v6245_v47  ;;  %v4333_v21 = vadd.f32 %v4222_v63, %v3880_v53  ;;  %v3883_v32 = vadd.f32 %v6105_v45, %v7930_v40  ;;  %v4232_v55 = vpop.f32.mrf.mxu0  ;;  %v8487_v24 = vld [vmem:[#allocation40_spill] sm:$0xff] }
 0x1dc   : > { %v6247_v30 = vpop.eup %6246  ;;  %6262 = vpow2.f32 %v5403_v5  ;;  %v5406_v15 = vmul.f32 -1.442695, %v7992_v54  ;;  %v7998_v60 = vadd.f32 %v7877_v49, %v4434_v10  ;;  %v4437_v25 = vmul.f32 %v7863_v46, %v4334_v17  ;;  %v3779_v59 = vpop.f32.mrf.mxu1 }
 0x1dd   : > { %6264 = vrcp.f32 %v4594_v37  ;;  %v4593_v12 = vadd.f32 1.0, %v6247_v30  ;;  %v4436_v18 = vmul.f32 %v7863_v46, %v4333_v21  ;;  %v4336_v43 = vadd.f32 %v6155_v29, %v3883_v32  ;;  %v6158_v22 = vpop.f32.mrf.mxu0 }
 0x1de   : > { %6266 = vpow2.f32 %v5406_v15  ;;  %v5405_v40 = vmul.f32 -1.442695, %v7998_v60  ;;  %v8004_v4 = vadd.f32 %v7877_v49, %v4437_v25  ;;  %v3882_v28 = vadd.f32 %v3779_v59, %v7933_v23  ;;  %v6108_v0 = vpop.f32.mrf.mxu1 }
 0x1df   : > { %v6249_v35 = vpop.eup %6248  ;;  %6268 = vrcp.f32 %v4593_v12  ;;  %v8008_v9 = vadd.f32 %v7877_v49, %v4436_v18  ;;  %v4439_v61 = vmul.f32 %v7863_v46, %v4336_v43  ;;  %v3885_v20 = vadd.f32 %v6108_v0, %v7963_v19  ;;  %v4242_v23 = vpop.f32.mrf.mxu0 }
 0x1e0   : > { %v4596_v6 = vadd.f32 1.0, %v6249_v35  ;;  %6270 = vpow2.f32 %v5405_v40  ;;  %v5408_v51 = vmul.f32 -1.442695, %v8004_v4  ;;  %v4335_v42 = vadd.f32 %v4232_v55, %v3882_v28  ;;  %v3789_v14 = vpop.f32.mrf.mxu1 }
 0x1e1   : > { %v6251_v63 = vpop.eup %6250  ;;  %v3436_v5 = vadd.f32 %v8487_v24, %v2980_v62  ;;  %v8016_v53 = vadd.f32 %v7877_v49, %v4439_v61  ;;  %v4338_v47 = vadd.f32 %v6158_v22, %v3885_v20  ;;  %v3884_v10 = vadd.f32 %v3789_v14, %v7966_v2  ;;  %v6161_v21 = vpop.f32.mrf.mxu0 }
 0x1e2   : > { %v6253_v17 = vpop.eup %6252  ;;  %6272 = vrcp.f32 %v4596_v6  ;;  %v4595_v19 = vadd.f32 1.0, %v6251_v63  ;;  %v5407_v45 = vmul.f32 -1.442695, %v8008_v9  ;;  %v4438_v29 = vmul.f32 %v7863_v46, %v4335_v42  ;;  %v6111_v37 = vpop.f32.mrf.mxu1 }
 0x1e3   : > { %v4598_v32 = vadd.f32 1.0, %v6253_v17  ;;  %6274 = vpow2.f32 %v5408_v51  ;;  %v5410_v62 = vmul.f32 -1.442695, %v8016_v53  ;;  %v4441_v30 = vmul.f32 %v7863_v46, %v4338_v47  ;;  %v4252_v12 = vpop.f32.mrf.mxu0 }
 0x1e4   : > { %v6255_v15 = vpop.eup %6254  ;;  %6276 = vrcp.f32 %v4595_v19  ;;  %v8028_v2 = vadd.f32 %v7877_v49, %v4438_v29  ;;  %v4337_v25 = vadd.f32 %v4242_v23, %v3884_v10  ;;  %v3887_v59 = vadd.f32 %v6111_v37, %v7975_v44  ;;  %v3799_v55 = vpop.f32.mrf.mxu1 }
 0x1e5   : > { %6278 = vrcp.f32 %v4598_v32  ;;  %v4597_v18 = vadd.f32 1.0, %v6255_v15  ;;  %v8032_v43 = vadd.f32 %v7877_v49, %v4441_v30  ;;  %v3886_v40 = vadd.f32 %v3799_v55, %v7978_v16  ;;  %v6164_v20 = vpop.f32.mrf.mxu0 }
 0x1e6   : > { %v6257_v28 = vpop.eup %6256  ;;  %6280 = vpow2.f32 %v5407_v45  ;;  %v5409_v0 = vmul.f32 -1.442695, %v8028_v2  ;;  %v4440_v22 = vmul.f32 %v7863_v46, %v4337_v25  ;;  %v4340_v35 = vadd.f32 %v6161_v21, %v3887_v59  ;;  %v6114_v61 = vpop.f32.mrf.mxu1 }
 0x1e7   : > { %v6259_v44 = vpop.eup %6258  ;;  %v4688_v6 = vmul.f32 %v6257_v28, %v7887_v11  ;;  %6282 = vrcp.f32 %v4597_v18  ;;  %v5412_v51 = vmul.f32 -1.442695, %v8032_v43  ;;  %v4339_v42 = vadd.f32 %v4252_v12, %v3886_v40  ;;  %v4262_v47 = vpop.f32.mrf.mxu0 }
 0x1e8   : > { %v6261_v14 = vpop.eup %6260  ;;  %v4600_v23 = vadd.f32 1.0, %v6259_v44  ;;  %6284 = vpow2.f32 %v5410_v62  ;;  %v8040_v16 = vadd.f32 %v7877_v49, %v4440_v22  ;;  %v4443_v63 = vmul.f32 %v7863_v46, %v4340_v35  ;;  %v3809_v24 = vpop.f32.mrf.mxu1 }
 0x1e9   : > { %v6263_v10 = vpop.eup %6262  ;;  %4720 = vst [vmem:[%s8044_s22 + $0x8] sm:$0xff] %v4688_v6  ;;  %v4687_v11 = vmul.f32 %v6261_v14, %v7898_v7  ;;  %6286 = vpow2.f32 %v5409_v0  ;;  %v4442_v17 = vmul.f32 %v7863_v46, %v4339_v42  ;;  %v3889_v19 = vadd.f32 %v6114_v61, %v3436_v5  ;;  %v6167_v62 = vpop.f32.mrf.mxu0 }
 0x1ea   : > { %v6265_v45 = vpop.eup %6264  ;;  %6288 = vrcp.f32 %v4600_v23  ;;  %v4599_v29 = vadd.f32 1.0, %v6263_v10  ;;  %v5411_v37 = vmul.f32 -1.442695, %v8040_v16  ;;  %v8051_v21 = vadd.f32 %v7877_v49, %v4443_v63  ;;  %v6117_v32 = vpop.f32.mrf.mxu1 }
 0x1eb   : > { %v6267_v30 = vpop.eup %6266  ;;  %4719 = vst [vmem:[%s8044_s22] sm:$0xff] %v4687_v11  ;;  %v4690_v15 = vmul.f32 %v6265_v45, %v7910_v41  ;;  %6290 = vpow2.f32 %v5412_v51  ;;  %v8056_v7 = vadd.f32 %v7877_v49, %v4442_v17  ;;  %v4342_v5 = vadd.f32 %v6164_v20, %v3889_v19  ;;  %v4272_v40 = vpop.f32.mrf.mxu0 }
 0x1ec   : > { %v6269_v25 = vpop.eup %6268  ;;  %6292 = vrcp.f32 %v4599_v29  ;;  %v4602_v59 = vadd.f32 1.0, %v6267_v30  ;;  %v5414_v55 = vmul.f32 -1.442695, %v8051_v21  ;;  %v3888_v12 = vadd.f32 %v3809_v24, %v7812_v33  ;;  %v3819_v18 = vpop.f32.mrf.mxu1 }
 0x1ed   : > { %v6271_v28 = vpop.eup %6270  ;;  %4722 = vst [vmem:[%s8044_s22 + $0x18] sm:$0xff] %v4690_v15  ;;  %v4689_v0 = vmul.f32 %v6269_v25, %v7919_v8  ;;  %6294 = vpow2.f32 %v5411_v37  ;;  %v5413_v41 = vmul.f32 -1.442695, %v8056_v7  ;;  %v4445_v22 = vmul.f32 %v7863_v46, %v4342_v5  ;;  %v6170_v6 = vpop.f32.mrf.mxu0 }
 0x1ee   : > { %6296 = vrcp.f32 %v4602_v59  ;;  %v4601_v35 = vadd.f32 1.0, %v6271_v28  ;;  %v4341_v61 = vadd.f32 %v4262_v47, %v3888_v12  ;;  %v3891_v20 = vadd.f32 %v6117_v32, %v7815_v56  ;;  %v6120_v44 = vpop.f32.mrf.mxu1 }
 0x1ef   : > { %v6273_v33 = vpop.eup %6272  ;;  %4721 = vst [vmem:[%s8044_s22 + $0x10] sm:$0xff] %v4689_v0  ;;  %6298 = vpow2.f32 %v5414_v55  ;;  %v8067_v51 = vadd.f32 %v7877_v49, %v4445_v22  ;;  %v3890_v8 = vadd.f32 %v3819_v18, %v7818_v39  ;;  %v3893_v42 = vadd.f32 %v6120_v44, %v7821_v26  ;;  %v4282_v47 = vpop.f32.mrf.mxu0 }
 0x1f0   : > { %v6275_v14 = vpop.eup %6274  ;;  %v4692_v23 = vmul.f32 %v6273_v33, %v7936_v36  ;;  %6300 = vrcp.f32 %v4601_v35  ;;  %v4444_v63 = vmul.f32 %v7863_v46, %v4341_v61  ;;  %v4344_v56 = vadd.f32 %v6167_v62, %v3891_v20  ;;  %v3829_v24 = vpop.f32.mrf.mxu1 }
 0x1f1   : > { %v6277_v10 = vpop.eup %6276  ;;  %v4604_v11 = vadd.f32 1.0, %v6275_v14  ;;  %6302 = vpow2.f32 %v5413_v41  ;;  %v5416_v17 = vmul.f32 -1.442695, %v8067_v51  ;;  %v4343_v19 = vadd.f32 %v4272_v40, %v3890_v8  ;;  %v6173_v32 = vpop.f32.mrf.mxu0 }
 0x1f2   : > { %v6279_v45 = vpop.eup %6278  ;;  %4724 = vst [vmem:[%s8044_s22 + $0x28] sm:$0xff] %v4692_v23  ;;  %v4691_v39 = vmul.f32 %v6277_v10, %v7946_v1  ;;  %v8077_v26 = vadd.f32 %v7877_v49, %v4444_v63  ;;  %v4447_v36 = vmul.f32 %v7863_v46, %v4344_v56  ;;  %v4346_v29 = vadd.f32 %v6170_v6, %v3893_v42  ;;  %v6123_v37 = vpop.f32.mrf.mxu1 }
 0x1f3   : > { %v6281_v62 = vpop.eup %6280  ;;  %v4694_v30 = vmul.f32 %v6279_v45, %v7949_v52  ;;  %6304 = vrcp.f32 %v4604_v11  ;;  %v4446_v15 = vmul.f32 %v7863_v46, %v4343_v19  ;;  %v3892_v5 = vadd.f32 %v3829_v24, %v7824_v50  ;;  %v4292_v18 = vpop.f32.mrf.mxu0 }
 0x1f4   : > { %v6283_v25 = vpop.eup %6282  ;;  %4723 = vst [vmem:[%s8044_s22 + $0x20] sm:$0xff] %v4691_v39  ;;  %v4603_v1 = vadd.f32 1.0, %v6281_v62  ;;  %6306 = vpow2.f32 %v5416_v17  ;;  %v5415_v59 = vmul.f32 -1.442695, %v8077_v26  ;;  %v8086_v55 = vadd.f32 %v7877_v49, %v4447_v36  ;;  %v3839_v12 = vpop.f32.mrf.mxu1 }
 0x1f5   : > { %v6285_v40 = vpop.eup %6284  ;;  %4726 = vst [vmem:[%s8044_s22 + $0x38] sm:$0xff] %v4694_v30  ;;  %v4693_v52 = vmul.f32 %v6283_v25, %v7959_v34  ;;  %v8091_v28 = vadd.f32 %v7877_v49, %v4446_v15  ;;  %v4449_v50 = vmul.f32 %v7863_v46, %v4346_v29  ;;  %v4345_v0 = vadd.f32 %v4282_v47, %v3892_v5  ;;  %v6176_v44 = vpop.f32.mrf.mxu0 }
 0x1f6   : > { %v6287_v41 = vpop.eup %6286  ;;  %6308 = vrcp.f32 %v4603_v1  ;;  %v4606_v22 = vadd.f32 1.0, %v6285_v40  ;;  %v5418_v35 = vmul.f32 -1.442695, %v8086_v55  ;;  %v3895_v61 = vadd.f32 %v6123_v37, %v7827_v13  ;;  %v6126_v20 = vpop.f32.mrf.mxu1 }
 0x1f7   : > { %v6289_v6 = vpop.eup %6288  ;;  %4725 = vst [vmem:[%s8044_s22 + $0x30] sm:$0xff] %v4693_v52  ;;  %v4605_v33 = vadd.f32 1.0, %v6287_v41  ;;  %6310 = vpow2.f32 %v5415_v59  ;;  %v5417_v34 = vmul.f32 -1.442695, %v8091_v28  ;;  %v8099_v8 = vadd.f32 %v7877_v49, %v4449_v50  ;;  %v4302_v45 = vpop.f32.mrf.mxu0 }
 0x1f8   : > { %v6291_v42 = vpop.eup %6290  ;;  %v4696_v14 = vmul.f32 %v6289_v6, %v7971_v48  ;;  %6312 = vrcp.f32 %v4606_v22  ;;  %v4448_v23 = vmul.f32 %v7863_v46, %v4345_v0  ;;  %v4348_v63 = vadd.f32 %v6173_v32, %v3895_v61  ;;  %v3849_v13 = vpop.f32.mrf.mxu1 }
 0x1f9   : > { %v6293_v56 = vpop.eup %6292  ;;  %6314 = vrcp.f32 %v4605_v33  ;;  %v4608_v24 = vadd.f32 1.0, %v6291_v42  ;;  %v5420_v47 = vmul.f32 -1.442695, %v8099_v8  ;;  %v3894_v10 = vadd.f32 %v3839_v12, %v7830_v3  ;;  %v6179_v40 = vpop.f32.mrf.mxu0 }
 0x1fa   : > { %v6295_v11 = vpop.eup %6294  ;;  %4728 = vst [vmem:[%s8044_s22 + $0x48] sm:$0xff] %v4696_v14  ;;  %v4695_v17 = vmul.f32 %v6293_v56, %v7983_v38  ;;  %6316 = vpow2.f32 %v5418_v35  ;;  %v8108_v48 = vadd.f32 %v7877_v49, %v4448_v23  ;;  %v4451_v19 = vmul.f32 %v7863_v46, %v4348_v63  ;;  %v6129_v39 = vpop.f32.mrf.mxu1 }
 0x1fb   : > { %v6297_v36 = vpop.eup %6296  ;;  %6318 = vrcp.f32 %v4608_v24  ;;  %v4607_v29 = vadd.f32 1.0, %v6295_v11  ;;  %v4347_v37 = vadd.f32 %v4292_v18, %v3894_v10  ;;  %v3897_v32 = vadd.f32 %v6126_v20, %v7835_v27  ;;  %v4312_v42 = vpop.f32.mrf.mxu0 }
 0x1fc   : > { %v6299_v3 = vpop.eup %6298  ;;  %4727 = vst [vmem:[%s8044_s22 + $0x40] sm:$0xff] %v4695_v17  ;;  %v4698_v62 = vmul.f32 %v6297_v36, %v7992_v54  ;;  %6320 = vpow2.f32 %v5417_v34  ;;  %v5419_v38 = vmul.f32 -1.442695, %v8108_v48  ;;  %v8116_v30 = vadd.f32 %v7877_v49, %v4451_v19  ;;  %v3859_v59 = vpop.f32.mrf.mxu1 }
 0x1fd   : > { %v6301_v15 = vpop.eup %6300  ;;  %6322 = vrcp.f32 %v4607_v29  ;;  %v4610_v5 = vadd.f32 1.0, %v6299_v3  ;;  %v4450_v25 = vmul.f32 %v7863_v46, %v4347_v37  ;;  %v4350_v1 = vadd.f32 %v6176_v44, %v3897_v32 }
 0x1fe   : > { %v6303_v12 = vpop.eup %6302  ;;  %4730 = vst [vmem:[%s8044_s22 + $0x58] sm:$0xff] %v4698_v62  ;;  %v4697_v27 = vmul.f32 %v6301_v15, %v7998_v60  ;;  %6324 = vpow2.f32 %v5420_v47  ;;  %v5422_v54 = vmul.f32 -1.442695, %v8116_v30  ;;  %v3896_v18 = vadd.f32 %v3849_v13, %v7840_v31 }
 0x1ff   : > { %6326 = vrcp.f32 %v4610_v5  ;;  %v4609_v52 = vadd.f32 1.0, %v6303_v12  ;;  %v8124_v50 = vadd.f32 %v7877_v49, %v4450_v25  ;;  %v4453_v0 = vmul.f32 %v7863_v46, %v4350_v1 }
 0x200   : > { %v6305_v41 = vpop.eup %6304  ;;  %4729 = vst [vmem:[%s8044_s22 + $0x50] sm:$0xff] %v4697_v27  ;;  %6328 = vpow2.f32 %v5419_v38  ;;  %v4349_v22 = vadd.f32 %v4302_v45, %v3896_v18  ;;  %v3899_v60 = vadd.f32 %v6129_v39, %v7846_v57  ;;  %v3898_v35 = vadd.f32 %v3859_v59, %v7852_v58 }
 0x201   : > { %v6307_v61 = vpop.eup %6306  ;;  %v4700_v31 = vmul.f32 %v6305_v41, %v8004_v4  ;;  %6330 = vrcp.f32 %v4609_v52  ;;  %v5421_v20 = vmul.f32 -1.442695, %v8124_v50  ;;  %v8133_v44 = vadd.f32 %v7877_v49, %v4453_v0 }
 0x202   : > { %v4612_v6 = vadd.f32 1.0, %v6307_v61  ;;  %6332 = vpow2.f32 %v5422_v54  ;;  %v4452_v33 = vmul.f32 %v7863_v46, %v4349_v22  ;;  %v4352_v34 = vadd.f32 %v6179_v40, %v3899_v60 }
 0x203   : > { %v6309_v14 = vpop.eup %6308  ;;  %4732 = vst [vmem:[%s8044_s22 + $0x68] sm:$0xff] %v4700_v31  ;;  %6334 = vpow2.f32 %v5421_v20  ;;  %v5424_v57 = vmul.f32 -1.442695, %v8133_v44  ;;  %v4351_v58 = vadd.f32 %v4312_v42, %v3898_v35 }
 0x204   : > { %v6311_v4 = vpop.eup %6310  ;;  %v4699_v23 = vmul.f32 %v6309_v14, %v8008_v9  ;;  %6336 = vrcp.f32 %v4612_v6  ;;  %v8140_v63 = vadd.f32 %v7877_v49, %v4452_v33  ;;  %v4455_v13 = vmul.f32 %v7863_v46, %v4352_v34 }
 0x205   : > { %v6313_v56 = vpop.eup %6312  ;;  %v4611_v24 = vadd.f32 1.0, %v6311_v4  ;;  %6338 = vpow2.f32 %v5424_v57  ;;  %v4454_v47 = vmul.f32 %v7863_v46, %v4351_v58 }
 0x206   : > { %v6315_v10 = vpop.eup %6314  ;;  %4731 = vst [vmem:[%s8044_s22 + $0x60] sm:$0xff] %v4699_v23  ;;  %v4702_v11 = vmul.f32 %v6313_v56, %v8016_v53  ;;  %v5423_v17 = vmul.f32 -1.442695, %v8140_v63  ;;  %v8148_v9 = vadd.f32 %v7877_v49, %v4455_v13 }
 0x207   : > { %v6317_v19 = vpop.eup %6316  ;;  %v4701_v45 = vmul.f32 %v6315_v10, %v8028_v2  ;;  %6340 = vrcp.f32 %v4611_v24  ;;  %v8152_v39 = vadd.f32 %v7877_v49, %v4454_v47 }
 0x208   : > { %v6319_v36 = vpop.eup %6318  ;;  %4734 = vst [vmem:[%s8044_s22 + $0x78] sm:$0xff] %v4702_v11  ;;  %v4614_v46 = vadd.f32 1.0, %v6317_v19  ;;  %6342 = vpow2.f32 %v5423_v17  ;;  %v5426_v29 = vmul.f32 -1.442695, %v8148_v9 }
 0x209   : > { %v6321_v53 = vpop.eup %6320  ;;  %4733 = vst [vmem:[%s8044_s22 + $0x70] sm:$0xff] %v4701_v45  ;;  %v4704_v37 = vmul.f32 %v6319_v36, %v8032_v43  ;;  %v5425_v32 = vmul.f32 -1.442695, %v8152_v39 }
 0x20a   : > { %v6323_v3 = vpop.eup %6322  ;;  %6344 = vrcp.f32 %v4614_v46  ;;  %v4613_v2 = vadd.f32 1.0, %v6321_v53 }
 0x20b   : > { %v6325_v62 = vpop.eup %6324  ;;  %4736 = vst [vmem:[%s8044_s22 + $0x88] sm:$0xff] %v4704_v37  ;;  %v4703_v49 = vmul.f32 %v6323_v3, %v8040_v16  ;;  %6346 = vpow2.f32 %v5426_v29 }
 0x20c   : > { %v6327_v38 = vpop.eup %6326  ;;  %6348 = vrcp.f32 %v4613_v2  ;;  %v4616_v15 = vadd.f32 1.0, %v6325_v62 }
 0x20d   : > { %v6329_v5 = vpop.eup %6328  ;;  %4735 = vst [vmem:[%s8044_s22 + $0x80] sm:$0xff] %v4703_v49  ;;  %v4706_v25 = vmul.f32 %v6327_v38, %v8051_v21  ;;  %6350 = vpow2.f32 %v5425_v32 }
 0x20e   : > { %v6331_v43 = vpop.eup %6330  ;;  %6352 = vrcp.f32 %v4616_v15  ;;  %v4615_v1 = vadd.f32 1.0, %v6329_v5 }
 0x20f   : > { %v6333_v59 = vpop.eup %6332  ;;  %4738 = vst [vmem:[%s8044_s22 + $0x98] sm:$0xff] %v4706_v25  ;;  %v4705_v12 = vmul.f32 %v6331_v43, %v8056_v7 }
 0x210   : > { %v6335_v27 = vpop.eup %6334  ;;  %6354 = vrcp.f32 %v4615_v1  ;;  %v4618_v16 = vadd.f32 1.0, %v6333_v59 }
 0x211   : > { %v6337_v54 = vpop.eup %6336  ;;  %4737 = vst [vmem:[%s8044_s22 + $0x90] sm:$0xff] %v4705_v12  ;;  %v4617_v18 = vadd.f32 1.0, %v6335_v27 }
 0x212   : > { %v6339_v40 = vpop.eup %6338  ;;  %v4708_v52 = vmul.f32 %v6337_v54, %v8067_v51  ;;  %6356 = vrcp.f32 %v4618_v16 }
 0x213   : > { %6358 = vrcp.f32 %v4617_v18  ;;  %v4620_v21 = vadd.f32 1.0, %v6339_v40 }
 0x214   : > { %v6341_v0 = vpop.eup %6340  ;;  %4740 = vst [vmem:[%s8044_s22 + $0xa8] sm:$0xff] %v4708_v52 }
 0x215   : > { %v6343_v41 = vpop.eup %6342  ;;  %v4707_v22 = vmul.f32 %v6341_v0, %v8077_v26  ;;  %6360 = vrcp.f32 %v4620_v21 }
 0x216   : > { %v4619_v7 = vadd.f32 1.0, %v6343_v41 }
 0x217   : > { %v6345_v60 = vpop.eup %6344  ;;  %4739 = vst [vmem:[%s8044_s22 + $0xa0] sm:$0xff] %v4707_v22 }
 0x218   : > { %v6347_v35 = vpop.eup %6346  ;;  %v4710_v61 = vmul.f32 %v6345_v60, %v8086_v55  ;;  %6362 = vrcp.f32 %v4619_v7 }
 0x219   : > { %v6349_v51 = vpop.eup %6348  ;;  %v4622_v31 = vadd.f32 1.0, %v6347_v35 }
 0x21a   : > { %v6351_v20 = vpop.eup %6350  ;;  %4742 = vst [vmem:[%s8044_s22 + $0xb8] sm:$0xff] %v4710_v61  ;;  %v4709_v6 = vmul.f32 %v6349_v51, %v8091_v28 }
 0x21b   : > { %v6353_v33 = vpop.eup %6352  ;;  %6364 = vrcp.f32 %v4622_v31  ;;  %v4621_v26 = vadd.f32 1.0, %v6351_v20 }
 0x21c   : > { %4741 = vst [vmem:[%s8044_s22 + $0xb0] sm:$0xff] %v4709_v6  ;;  %v4712_v34 = vmul.f32 %v6353_v33, %v8099_v8 }
 0x21d   : > { %v6355_v42 = vpop.eup %6354  ;;  %6366 = vrcp.f32 %v4621_v26 }
 0x21e   : > { %4744 = vst [vmem:[%s8044_s22 + $0xc8] sm:$0xff] %v4712_v34  ;;  %v4711_v55 = vmul.f32 %v6355_v42, %v8108_v48 }
 0x21f   : > { %v6357_v14 = vpop.eup %6356 }
 0x220   : > { %v6359_v57 = vpop.eup %6358  ;;  %4743 = vst [vmem:[%s8044_s22 + $0xc0] sm:$0xff] %v4711_v55  ;;  %v4714_v28 = vmul.f32 %v6357_v14, %v8116_v30 }
 0x221   : > { %v4713_v58 = vmul.f32 %v6359_v57, %v8124_v50 }
 0x222   : > { %v6361_v4 = vpop.eup %6360  ;;  %4746 = vst [vmem:[%s8044_s22 + $0xd8] sm:$0xff] %v4714_v28 }
 0x223   : > { %4745 = vst [vmem:[%s8044_s22 + $0xd0] sm:$0xff] %v4713_v58  ;;  %v4716_v8 = vmul.f32 %v6361_v4, %v8133_v44 }
 0x225   : > { %v6363_v23 = vpop.eup %6362  ;;  %4748 = vst [vmem:[%s8044_s22 + $0xe8] sm:$0xff] %v4716_v8 }
 0x226   : > { %v4715_v48 = vmul.f32 %v6363_v23, %v8140_v63 }
 0x228   : > { %v6365_v13 = vpop.eup %6364  ;;  %4747 = vst [vmem:[%s8044_s22 + $0xe0] sm:$0xff] %v4715_v48 }
 0x229   : > { %v4718_v30 = vmul.f32 %v6365_v13, %v8148_v9 }
 0x22a   : > { %v6367_v50 = vpop.eup %6366 }
 0x22b   : > { %4750 = vst [vmem:[%s8044_s22 + $0xf8] sm:$0xff] %v4718_v30  ;;  %v4717_v44 = vmul.f32 %v6367_v50, %v8152_v39 }
 0x22d   : > { %4749 = vst [vmem:[%s8044_s22 + $0xf0] sm:$0xff] %v4717_v44 }
 0x22e   : > { %6381 = shalt.err (!%p6378_p5)
}
 0x22f   : > { %s6382_s10 = scalar_lea.hbm %s8192_s5, 4096  ;;  %s6386_s13 = scalar_lea.hbm %s8250_s4, 8192 }
 0x230   : > { %p6383_p6 = scmp.ne.s32.totalorder %s8192_s5, %s6382_s10  ;;  %p6387_p10 = scmp.lt.s32.totalorder %s8192_s5, %s8250_s4 }
 0x231   : > { %p6388_p11 = scmp.lt.s32.totalorder %s6386_s13, %s6382_s10 }
 0x232   : > { %p6384_p7 = pnand %p6383_p6, %p6514_p4 }
 0x233   : > { %p6389_p12 = por %p6388_p11, %p6387_p10 }
 0x234   : > { %p6385_p9 = pneg %p6384_p7 }
 0x236   : > { %p6390_p13 = pnand %p6389_p12, %p6385_p9 }
 0x238   : > { %6393 = shalt.err (!%p6390_p13)
}
 0x239   : > { %s6447_s22 = smov 128   ;;  %s6448_s24 = smov 8  }
 0x23a   : > { %6183 = dma.vmem_to_hbm [thread:$0]  (%p6514_p4), %s8194_s26, 4096, %s8192_s5, %s8201_s18, %s6447_s22, %s6447_s22, %s6448_s24  }
 0x23b PF: > { %p6189_p0 = scmp.ge.s32.totalorder %s6444_s20, 2  ;;  %s4783_s29 = sand.u32 1, %s6424_s15  }
 0x23c   : > { %s4784_s30 = scalar_lea.sflag [#allocation4], %s4783_s29 }
 0x23d   : > { %p6186_p1 = pnand %p6189_p0, %p6521_p8 }
 0x23f   : > { %p6187_p2 = pneg %p6186_p1 }
 0x241   : > { %6419 = dma.done.wait (%p6187_p2), %s4784_s30, 4096  }
 0x242   : > { %6421 = vsyncadd (%p6187_p2), %s4784_s30, 4294963200  ;;  %s17_s20 = sadd.s32 1, %s6444_s20   ;;  %s8488_s15 = smov %s6428_s16 }
 0x243   : > { %p14_p3 = scmp.ge.s32.totalorder %s17_s20, 4   ;;  %s8489_s16 = smov %s6432_s17 }
 0x244   : > { %s8490_s17 = smov %s6527_s28  ;;  %s8491_s18 = smov %s6440_s19 }
 0x245   : > { %s8492_s19 = smov %s8494_s23  ;;  %16 = sbr.rel (!%p14_p3) target bundleno = 4 (0x4), region = 83 }
 0x24a   :  { %4789 = vsyncpa [#allocation4], 1 }
 0x24b   :  { %4791 = vsyncpa [#allocation4 + $0x1], 1 }

</bundles_post_ra>
